<compile_context>
chip_gen: v6e
topology: v6e:2x2x1
jax: 0.10.0
libtpu: 0.0.40
codegen_flags: <defaults>
</compile_context>

<pallas_src>
import jax
import jax.numpy as jnp
from jax import lax
from jax.experimental import pallas as pl
from jax.experimental.pallas import tpu as pltpu

C1 = 0.01 ** 2
C2 = 0.03 ** 2
# 3x3 mean-pool scale folded into the SSIM constants: every factor of
# ssim_n / ssim_d is multiplied by 81 (= 9^2), so the n/d ratio is unchanged.
_C1_81 = 81.0 * C1
_C2_81 = 81.0 * C2

_LIVE_PLANES = 20  # ~peak simultaneously-live f32 plane-sized buffers per
                   # batched (n, c) plane, incl. double-buffered I/O blocks.


def _make_ssim_kernel(use_roll):
    """Build the SSIM kernel body.

    use_roll=True  -> reflection halo via XLU rolls + one boundary select per
                      edge (requires natively tiled planes: H%8==0, W%128==0).
    use_roll=False -> concat-based halo fallback (any H >= 2, W >= 2).
    """

    def kernel(x_ref, y_ref, out_ref):
        x = x_ref[...].astype(jnp.float32)
        y = y_ref[...].astype(jnp.float32)
        B, H, W = x.shape

        if use_roll:
            # Edge masks computed once per block at full plane shape, so no
            # per-select broadcast_in_dim is emitted.
            ri = lax.broadcasted_iota(jnp.int32, (B, H, W), 1)
            ci = lax.broadcasted_iota(jnp.int32, (B, H, W), 2)
            top, bot = ri == 0, ri == H - 1
            lft, rgt = ci == 0, ci == W - 1

            def rshift(a):
                # (a_refl[i-1], a_refl[i+1]) along rows: circular XLU rolls,
                # then one select per edge row to turn wrap-around into
                # reflection (row 0 wants a[1], row H-1 wants a[H-2]).
                m = pltpu.roll(a, 1, 1)       # m[i] = a[i-1], m[0]   = a[H-1]
                p = pltpu.roll(a, H - 1, 1)   # p[i] = a[i+1], p[H-1] = a[0]
                return jnp.where(top, p, m), jnp.where(bot, m, p)

            def cshift(a):
                m = pltpu.roll(a, 1, 2)       # m[j] = a[j-1], m[0]   = a[W-1]
                p = pltpu.roll(a, W - 1, 2)   # p[j] = a[j+1], p[W-1] = a[0]
                return jnp.where(lft, p, m), jnp.where(rgt, m, p)
        else:
            def rshift(a):
                ap = jnp.concatenate(
                    [a[:, 1:2, :], a, a[:, H - 2:H - 1, :]], axis=1)
                return ap[:, 0:H, :], ap[:, 2:H + 2, :]

            def cshift(a):
                ap = jnp.concatenate(
                    [a[:, :, 1:2], a, a[:, :, W - 2:W - 1]], axis=2)
                return ap[:, :, 0:W], ap[:, :, 2:W + 2]

        # Row halo built once for x and once for y; the reflection-padded row
        # sums of x*x, y*y, x*y are formed from the already-shifted planes.
        xd, xu = rshift(x)
        yd, yu = rshift(y)
        vx = xd + x + xu                       # vertical 3-sum of x
        vy = yd + y + yu
        vxx = xd * xd + x * x + xu * xu        # vertical 3-sum of x*x
        vyy = yd * yd + y * y + yu * yu
        vxy = xd * yd + x * y + xu * yu        # vertical 3-sum of x*y

        def csum3(a):
            l, r = cshift(a)
            return l + a + r

        mx = csum3(vx)      # 9 * mu_x
        my = csum3(vy)      # 9 * mu_y
        sxx = csum3(vxx)    # 9 * pool(x*x)
        syy = csum3(vyy)    # 9 * pool(y*y)
        sxy = csum3(vxy)    # 9 * pool(x*y)

        # SSIM with the 1/9 scale folded into the constants:
        #   81*(2 mu_x mu_y + C1)       = 2 mx my + 81 C1
        #   81*(2 sigma_xy + C2)        = 18 sxy - 2 mx my + 81 C2
        #   81*(mu_x^2 + mu_y^2 + C1)   = mx^2 + my^2 + 81 C1
        #   81*(sigma_x + sigma_y + C2) = 9 (sxx + syy) - mx^2 - my^2 + 81 C2
        mm = mx * my
        mm2 = mm + mm
        m2 = mx * mx + my * my
        ssim_n = (mm2 + _C1_81) * (18.0 * sxy - mm2 + _C2_81)
        ssim_d = (m2 + _C1_81) * (9.0 * (sxx + syy) - m2 + _C2_81)

        # Divide -> EUP approximate reciprocal (ssim_d is strictly positive).
        loss = (1.0 - ssim_n * pl.reciprocal(ssim_d, approx=True)) * 0.5
        out_ref[...] = jnp.clip(loss, 0.0, 1.0).astype(out_ref.dtype)

    return kernel


def _tpu_params():
    """(batching budget, vmem_limit_bytes, num_tensorcores), generation-aware
    with safe fallbacks (v7x: 64 MiB VMEM / 2 TCs; v5e/v6e: 128 MiB / 1 TC)."""
    vmem_cap = None
    try:
        vmem_cap = int(pltpu.get_tpu_info().vmem_capacity_bytes)
    except Exception:
        vmem_cap = None
    kind = ""
    try:
        kind = jax.devices()[0].device_kind.lower()
    except Exception:
        pass
    two_cores = "v7" in kind
    if vmem_cap is None:
        # Be conservative if the hardware could not be queried.
        vmem_cap = 64 * 2**20 if (two_cores or not kind) else 128 * 2**20
    small_vmem = vmem_cap <= 96 * 2**20           # v7x-like
    budget = (16 if small_vmem else 40) * 2**20
    vmem_limit = (48 if small_vmem else 100) * 2**20
    return budget, vmem_limit, (2 if two_cores else 1)


def _pick_batch(nc, h, w, budget_bytes, num_cores):
    """Largest per-step plane batch fitting the VMEM budget.  Non-divisor
    batches are fine (ragged last block).  Only on multi-TC chips do we keep
    the grid >= num_cores; on 1-TC chips that would just add step overhead."""
    per_plane = _LIVE_PLANES * h * w * 4
    b = int(max(1, min(nc, budget_bytes // per_plane)))
    if num_cores > 1:
        b = min(b, max(1, -(-nc // num_cores)))
    return b


def ssim_loss(x, y):
    """x, y: (N, C, H, W). Returns (N, C, H, W) SSIM loss in x.dtype."""
    N, C, H, W = x.shape
    nc = N * C
    xr = x.reshape(nc, H, W)
    yr = y.reshape(nc, H, W)

    budget, vmem_limit, num_cores = _tpu_params()
    B = _pick_batch(nc, H, W, budget, num_cores)
    grid = (pl.cdiv(nc, B),)   # non-divisor B allowed; ragged last block masked

    # Roll path only for natively tiled planes (lane/sublane rotates are the
    # native case there); unaligned/small planes use the concat fallback.
    use_roll = (H % 8 == 0) and (W % 128 == 0)
    kernel = _make_ssim_kernel(use_roll)

    # TODO(synk): H-strip halo tiling (block (B, TH, W) output with a TH+2-row
    # input window) for planes too large to keep VMEM-resident on v7x (64 MiB).
    # TODO(synk): channels-on-lanes (H, W, nc_pad128) relayout when W < 128 and
    # nc >= 128, to make compute and stores fully lane-dense.
    out = pl.pallas_call(
        kernel,
        out_shape=jax.ShapeDtypeStruct((nc, H, W), x.dtype),
        grid_spec=pltpu.PrefetchScalarGridSpec(
            num_scalar_prefetch=0,
            grid=grid,
            in_specs=[
                pl.BlockSpec((B, H, W), lambda i: (i, 0, 0)),
                pl.BlockSpec((B, H, W), lambda i: (i, 0, 0)),
            ],
            out_specs=pl.BlockSpec((B, H, W), lambda i: (i, 0, 0)),
        ),
        compiler_params=pltpu.CompilerParams(
            dimension_semantics=("parallel",),
            vmem_limit_bytes=vmem_limit,
        ),
    )(xr, yr)

    return out.reshape(N, C, H, W)


def _ssim_ref(x, y):
    """Pure-JAX reference (same semantics as the PyTorch module)."""
    N, C, H, W = x.shape
    xp = jnp.pad(x.astype(jnp.float32), ((0, 0), (0, 0), (1, 1), (1, 1)),
                 mode="reflect")
    yp = jnp.pad(y.astype(jnp.float32), ((0, 0), (0, 0), (1, 1), (1, 1)),
                 mode="reflect")

    def pool3(a):
        s = jnp.zeros((N, C, H, W), jnp.float32)
        for dy in range(3):
            for dx in range(3):
                s = s + a[:, :, dy:dy + H, dx:dx + W]
        return s / 9.0

    mu_x = pool3(xp)
    mu_y = pool3(yp)
    sigma_x = pool3(xp * xp) - mu_x * mu_x
    sigma_y = pool3(yp * yp) - mu_y * mu_y
    sigma_xy = pool3(xp * yp) - mu_x * mu_y
    n = (2 * mu_x * mu_y + C1) * (2 * sigma_xy + C2)
    d = (mu_x ** 2 + mu_y ** 2 + C1) * (sigma_x + sigma_y + C2)
    return jnp.clip((1 - n / d) / 2, 0.0, 1.0)


if __name__ == "__main__":
    key = jax.random.PRNGKey(0)
    kx, ky = jax.random.split(key)
    N, C, H, W = 2, 4, 16, 16
    # image-like inputs in [0, 1]
    x = jax.random.uniform(kx, (N, C, H, W), dtype=jnp.float32)
    y = jax.random.uniform(ky, (N, C, H, W), dtype=jnp.float32)

    out = jax.block_until_ready(ssim_loss(x, y))
    ref = _ssim_ref(x, y)

    assert out.shape == (N, C, H, W)
    assert out.dtype == x.dtype
    # tolerance relaxed vs exact divide because of pl.reciprocal(approx=True)
    assert jnp.allclose(out, ref, atol=5e-3, rtol=1e-3), "mismatch vs reference"

    print("KERNEL_OK")
</pallas_src>

<mosaic_0001>
module attributes {stable_mosaic.version = 11 : i64} {
  func.func @kernel(%arg0: i32, %arg1: memref<8x16x16xf32, #tpu.memory_space<vmem>>, %arg2: memref<8x16x16xf32, #tpu.memory_space<vmem>>, %arg3: memref<8x16x16xf32, #tpu.memory_space<vmem>>) attributes {dimension_semantics = [#tpu.dimension_semantics<parallel>], iteration_bounds = array<i64: 1>, scalar_prefetch = 0 : i64, scratch_operands = 0 : i64, tpu.core_type = #tpu.core_type<tc>, window_params = [{transform_indices = @transform_0, window_bounds = array<i64: 8, 16, 16>}, {transform_indices = @transform_1, window_bounds = array<i64: 8, 16, 16>}, {transform_indices = @transform_2, window_bounds = array<i64: 8, 16, 16>}]} {
    %c0 = arith.constant 0 : index
    %c0_0 = arith.constant 0 : index
    %c0_1 = arith.constant 0 : index
    %0 = vector.load %arg1[%c0, %c0_0, %c0_1] : memref<8x16x16xf32, #tpu.memory_space<vmem>>, vector<8x16x16xf32>
    %c0_2 = arith.constant 0 : index
    %c0_3 = arith.constant 0 : index
    %c0_4 = arith.constant 0 : index
    %1 = vector.load %arg2[%c0_2, %c0_3, %c0_4] : memref<8x16x16xf32, #tpu.memory_space<vmem>>, vector<8x16x16xf32>
    %2 = vector.extract_strided_slice %0 {offsets = [0, 1, 0], sizes = [8, 1, 16], strides = [1, 1, 1]} : vector<8x16x16xf32> to vector<8x1x16xf32>
    %3 = vector.extract_strided_slice %0 {offsets = [0, 14, 0], sizes = [8, 1, 16], strides = [1, 1, 1]} : vector<8x16x16xf32> to vector<8x1x16xf32>
    %4 = tpu.concatenate %2, %0, %3 in 1 : vector<8x1x16xf32>, vector<8x16x16xf32>, vector<8x1x16xf32> -> vector<8x18x16xf32>
    %5 = vector.extract_strided_slice %4 {offsets = [0, 0, 0], sizes = [8, 16, 16], strides = [1, 1, 1]} : vector<8x18x16xf32> to vector<8x16x16xf32>
    %6 = vector.extract_strided_slice %4 {offsets = [0, 2, 0], sizes = [8, 16, 16], strides = [1, 1, 1]} : vector<8x18x16xf32> to vector<8x16x16xf32>
    %7 = vector.extract_strided_slice %1 {offsets = [0, 1, 0], sizes = [8, 1, 16], strides = [1, 1, 1]} : vector<8x16x16xf32> to vector<8x1x16xf32>
    %8 = vector.extract_strided_slice %1 {offsets = [0, 14, 0], sizes = [8, 1, 16], strides = [1, 1, 1]} : vector<8x16x16xf32> to vector<8x1x16xf32>
    %9 = tpu.concatenate %7, %1, %8 in 1 : vector<8x1x16xf32>, vector<8x16x16xf32>, vector<8x1x16xf32> -> vector<8x18x16xf32>
    %10 = vector.extract_strided_slice %9 {offsets = [0, 0, 0], sizes = [8, 16, 16], strides = [1, 1, 1]} : vector<8x18x16xf32> to vector<8x16x16xf32>
    %11 = vector.extract_strided_slice %9 {offsets = [0, 2, 0], sizes = [8, 16, 16], strides = [1, 1, 1]} : vector<8x18x16xf32> to vector<8x16x16xf32>
    %12 = arith.addf %5, %0 : vector<8x16x16xf32>
    %13 = arith.addf %12, %6 : vector<8x16x16xf32>
    %14 = arith.addf %10, %1 : vector<8x16x16xf32>
    %15 = arith.addf %14, %11 : vector<8x16x16xf32>
    %16 = arith.mulf %5, %5 : vector<8x16x16xf32>
    %17 = arith.mulf %0, %0 : vector<8x16x16xf32>
    %18 = arith.addf %16, %17 : vector<8x16x16xf32>
    %19 = arith.mulf %6, %6 : vector<8x16x16xf32>
    %20 = arith.addf %18, %19 : vector<8x16x16xf32>
    %21 = arith.mulf %10, %10 : vector<8x16x16xf32>
    %22 = arith.mulf %1, %1 : vector<8x16x16xf32>
    %23 = arith.addf %21, %22 : vector<8x16x16xf32>
    %24 = arith.mulf %11, %11 : vector<8x16x16xf32>
    %25 = arith.addf %23, %24 : vector<8x16x16xf32>
    %26 = arith.mulf %5, %10 : vector<8x16x16xf32>
    %27 = arith.mulf %0, %1 : vector<8x16x16xf32>
    %28 = arith.addf %26, %27 : vector<8x16x16xf32>
    %29 = arith.mulf %6, %11 : vector<8x16x16xf32>
    %30 = arith.addf %28, %29 : vector<8x16x16xf32>
    %31 = vector.extract_strided_slice %13 {offsets = [0, 0, 1], sizes = [8, 16, 1], strides = [1, 1, 1]} : vector<8x16x16xf32> to vector<8x16x1xf32>
    %32 = vector.extract_strided_slice %13 {offsets = [0, 0, 14], sizes = [8, 16, 1], strides = [1, 1, 1]} : vector<8x16x16xf32> to vector<8x16x1xf32>
    %33 = tpu.concatenate %31, %13, %32 in 2 : vector<8x16x1xf32>, vector<8x16x16xf32>, vector<8x16x1xf32> -> vector<8x16x18xf32>
    %34 = vector.extract_strided_slice %33 {offsets = [0, 0, 0], sizes = [8, 16, 16], strides = [1, 1, 1]} : vector<8x16x18xf32> to vector<8x16x16xf32>
    %35 = vector.extract_strided_slice %33 {offsets = [0, 0, 2], sizes = [8, 16, 16], strides = [1, 1, 1]} : vector<8x16x18xf32> to vector<8x16x16xf32>
    %36 = arith.addf %34, %13 : vector<8x16x16xf32>
    %37 = arith.addf %36, %35 : vector<8x16x16xf32>
    %38 = vector.extract_strided_slice %15 {offsets = [0, 0, 1], sizes = [8, 16, 1], strides = [1, 1, 1]} : vector<8x16x16xf32> to vector<8x16x1xf32>
    %39 = vector.extract_strided_slice %15 {offsets = [0, 0, 14], sizes = [8, 16, 1], strides = [1, 1, 1]} : vector<8x16x16xf32> to vector<8x16x1xf32>
    %40 = tpu.concatenate %38, %15, %39 in 2 : vector<8x16x1xf32>, vector<8x16x16xf32>, vector<8x16x1xf32> -> vector<8x16x18xf32>
    %41 = vector.extract_strided_slice %40 {offsets = [0, 0, 0], sizes = [8, 16, 16], strides = [1, 1, 1]} : vector<8x16x18xf32> to vector<8x16x16xf32>
    %42 = vector.extract_strided_slice %40 {offsets = [0, 0, 2], sizes = [8, 16, 16], strides = [1, 1, 1]} : vector<8x16x18xf32> to vector<8x16x16xf32>
    %43 = arith.addf %41, %15 : vector<8x16x16xf32>
    %44 = arith.addf %43, %42 : vector<8x16x16xf32>
    %45 = vector.extract_strided_slice %20 {offsets = [0, 0, 1], sizes = [8, 16, 1], strides = [1, 1, 1]} : vector<8x16x16xf32> to vector<8x16x1xf32>
    %46 = vector.extract_strided_slice %20 {offsets = [0, 0, 14], sizes = [8, 16, 1], strides = [1, 1, 1]} : vector<8x16x16xf32> to vector<8x16x1xf32>
    %47 = tpu.concatenate %45, %20, %46 in 2 : vector<8x16x1xf32>, vector<8x16x16xf32>, vector<8x16x1xf32> -> vector<8x16x18xf32>
    %48 = vector.extract_strided_slice %47 {offsets = [0, 0, 0], sizes = [8, 16, 16], strides = [1, 1, 1]} : vector<8x16x18xf32> to vector<8x16x16xf32>
    %49 = vector.extract_strided_slice %47 {offsets = [0, 0, 2], sizes = [8, 16, 16], strides = [1, 1, 1]} : vector<8x16x18xf32> to vector<8x16x16xf32>
    %50 = arith.addf %48, %20 : vector<8x16x16xf32>
    %51 = arith.addf %50, %49 : vector<8x16x16xf32>
    %52 = vector.extract_strided_slice %25 {offsets = [0, 0, 1], sizes = [8, 16, 1], strides = [1, 1, 1]} : vector<8x16x16xf32> to vector<8x16x1xf32>
    %53 = vector.extract_strided_slice %25 {offsets = [0, 0, 14], sizes = [8, 16, 1], strides = [1, 1, 1]} : vector<8x16x16xf32> to vector<8x16x1xf32>
    %54 = tpu.concatenate %52, %25, %53 in 2 : vector<8x16x1xf32>, vector<8x16x16xf32>, vector<8x16x1xf32> -> vector<8x16x18xf32>
    %55 = vector.extract_strided_slice %54 {offsets = [0, 0, 0], sizes = [8, 16, 16], strides = [1, 1, 1]} : vector<8x16x18xf32> to vector<8x16x16xf32>
    %56 = vector.extract_strided_slice %54 {offsets = [0, 0, 2], sizes = [8, 16, 16], strides = [1, 1, 1]} : vector<8x16x18xf32> to vector<8x16x16xf32>
    %57 = arith.addf %55, %25 : vector<8x16x16xf32>
    %58 = arith.addf %57, %56 : vector<8x16x16xf32>
    %59 = vector.extract_strided_slice %30 {offsets = [0, 0, 1], sizes = [8, 16, 1], strides = [1, 1, 1]} : vector<8x16x16xf32> to vector<8x16x1xf32>
    %60 = vector.extract_strided_slice %30 {offsets = [0, 0, 14], sizes = [8, 16, 1], strides = [1, 1, 1]} : vector<8x16x16xf32> to vector<8x16x1xf32>
    %61 = tpu.concatenate %59, %30, %60 in 2 : vector<8x16x1xf32>, vector<8x16x16xf32>, vector<8x16x1xf32> -> vector<8x16x18xf32>
    %62 = vector.extract_strided_slice %61 {offsets = [0, 0, 0], sizes = [8, 16, 16], strides = [1, 1, 1]} : vector<8x16x18xf32> to vector<8x16x16xf32>
    %63 = vector.extract_strided_slice %61 {offsets = [0, 0, 2], sizes = [8, 16, 16], strides = [1, 1, 1]} : vector<8x16x18xf32> to vector<8x16x16xf32>
    %64 = arith.addf %62, %30 : vector<8x16x16xf32>
    %65 = arith.addf %64, %63 : vector<8x16x16xf32>
    %66 = arith.mulf %37, %44 : vector<8x16x16xf32>
    %67 = arith.addf %66, %66 : vector<8x16x16xf32>
    %68 = arith.mulf %37, %37 : vector<8x16x16xf32>
    %69 = arith.mulf %44, %44 : vector<8x16x16xf32>
    %70 = arith.addf %68, %69 : vector<8x16x16xf32>
    %cst = arith.constant 8.100000e-03 : f32
    %71 = vector.broadcast %cst : f32 to vector<8x16x16xf32>
    %72 = arith.addf %67, %71 : vector<8x16x16xf32>
    %cst_5 = arith.constant 1.800000e+01 : f32
    %73 = vector.broadcast %cst_5 : f32 to vector<8x16x16xf32>
    %74 = arith.mulf %73, %65 : vector<8x16x16xf32>
    %75 = arith.subf %74, %67 : vector<8x16x16xf32>
    %cst_6 = arith.constant 7.290000e-02 : f32
    %76 = vector.broadcast %cst_6 : f32 to vector<8x16x16xf32>
    %77 = arith.addf %75, %76 : vector<8x16x16xf32>
    %78 = arith.mulf %72, %77 : vector<8x16x16xf32>
    %cst_7 = arith.constant 8.100000e-03 : f32
    %79 = vector.broadcast %cst_7 : f32 to vector<8x16x16xf32>
    %80 = arith.addf %70, %79 : vector<8x16x16xf32>
    %81 = arith.addf %51, %58 : vector<8x16x16xf32>
    %cst_8 = arith.constant 9.000000e+00 : f32
    %82 = vector.broadcast %cst_8 : f32 to vector<8x16x16xf32>
    %83 = arith.mulf %82, %81 : vector<8x16x16xf32>
    %84 = arith.subf %83, %70 : vector<8x16x16xf32>
    %cst_9 = arith.constant 7.290000e-02 : f32
    %85 = vector.broadcast %cst_9 : f32 to vector<8x16x16xf32>
    %86 = arith.addf %84, %85 : vector<8x16x16xf32>
    %87 = arith.mulf %80, %86 : vector<8x16x16xf32>
    %88 = tpu.reciprocal %87 {approx = true} : vector<8x16x16xf32> -> vector<8x16x16xf32>
    %89 = arith.mulf %78, %88 : vector<8x16x16xf32>
    %cst_10 = arith.constant 1.000000e+00 : f32
    %90 = vector.broadcast %cst_10 : f32 to vector<8x16x16xf32>
    %91 = arith.subf %90, %89 : vector<8x16x16xf32>
    %cst_11 = arith.constant 5.000000e-01 : f32
    %92 = vector.broadcast %cst_11 : f32 to vector<8x16x16xf32>
    %93 = arith.mulf %91, %92 : vector<8x16x16xf32>
    %cst_12 = arith.constant 0.000000e+00 : f32
    %cst_13 = arith.constant 1.000000e+00 : f32
    %94 = vector.broadcast %cst_12 : f32 to vector<8x16x16xf32>
    %95 = arith.maximumf %94, %93 : vector<8x16x16xf32>
    %96 = vector.broadcast %cst_13 : f32 to vector<8x16x16xf32>
    %97 = arith.minimumf %96, %95 : vector<8x16x16xf32>
    %c0_14 = arith.constant 0 : index
    %c0_15 = arith.constant 0 : index
    %c0_16 = arith.constant 0 : index
    %98 = vector.load %arg3[%c0_14, %c0_15, %c0_16] : memref<8x16x16xf32, #tpu.memory_space<vmem>>, vector<8x16x16xf32>
    tpu.vector_store %arg3[%c0_14, %c0_15, %c0_16], %97 {strides = array<i32>} : memref<8x16x16xf32, #tpu.memory_space<vmem>>, vector<8x16x16xf32>,
    return
  }
  func.func @transform_0(%arg0: i32) -> (i32, i32, i32) {
    %c0_i32 = arith.constant 0 : i32
    %c0_i32_0 = arith.constant 0 : i32
    %c0_i32_1 = arith.constant 0 : i32
    return %arg0, %c0_i32, %c0_i32_0 : i32, i32, i32
  }
  func.func @transform_1(%arg0: i32) -> (i32, i32, i32) {
    %c0_i32 = arith.constant 0 : i32
    %c0_i32_0 = arith.constant 0 : i32
    %c0_i32_1 = arith.constant 0 : i32
    return %arg0, %c0_i32, %c0_i32_0 : i32, i32, i32
  }
  func.func @transform_2(%arg0: i32) -> (i32, i32, i32) {
    %c0_i32 = arith.constant 0 : i32
    %c0_i32_0 = arith.constant 0 : i32
    %c0_i32_1 = arith.constant 0 : i32
    return %arg0, %c0_i32, %c0_i32_0 : i32, i32, i32
  }
}

</mosaic_0001>

<bundles_post_ra>
// kernel: tpu_custom_call.1
= control target key start
LH: loop header
LB: loop body
LE: loop exit
PB: predicated region body
PF: predicated region fallthrough
CT: control target
= control target key end

     0   :  { %7 = vsyncpa [#allocation3], 0  ;;  %s5464_s0 = inlined_call_operand.hbm [shape: f32[8,16,16], index: 0, kind: input, shape index: {}]   ;;  %s5465_s1 = inlined_call_operand.hbm [shape: f32[8,16,16], index: 1, kind: input, shape index: {}]   ;;  %s5466_s2 = inlined_call_operand.hbm [shape: f32[8,16,16], index: 2, kind: output, shape index: {}]  }
   0x1   :  { %8 = vsyncpa [#allocation6], 0 }
   0x2   :  { %9 = vsyncpa [#allocation4], 0  ;;  %s2946_s9 = smov [#allocation2]  }
   0x3   :  { %s15_s10 = sshll.u32 %s2946_s9, 4  ;;  %s16_s10 = int_to_ptr.vmem [resolvable:$true] %s15_s10 }
   0x4   :  { %s2888_s11 = scalar_lea.vmem %s16_s10, 2048  ;;  %p2893_p1 = scmp.lt.s32.totalorder %s16_s10, %s16_s10 }
   0x5   :  { %p2889_p0 = scmp.ne.s32.totalorder %s16_s10, %s2888_s11  ;;  %p2894_p2 = scmp.lt.s32.totalorder %s2888_s11, %s2888_s11 }
   0x7   :  { %p2895_p3 = por %p2894_p2, %p2893_p1 }
   0x9   :  { %p2896_p4 = pnand %p2895_p3, %p2889_p0 }
   0xb   :  { %2899 = shalt.err (!%p2896_p4)
}
   0xc   :  { %s2947_s12 = smov 128   ;;  %s2948_s13 = smov 8  }
   0xd   :  { %21 = dma.hbm_to_vmem [thread:$0]  %s5464_s0, 2048, %s16_s10, [#allocation3], %s2947_s12, %s2947_s12, %s2948_s13  }
   0xe   :  { %s2949_s16 = smov [#allocation5]  }
   0xf   :  { %s27_s17 = sshll.u32 %s2949_s16, 4  ;;  %s28_s17 = int_to_ptr.vmem [resolvable:$true] %s27_s17 }
  0x10   :  { %s2908_s18 = scalar_lea.vmem %s28_s17, 2048  ;;  %p2913_p6 = scmp.lt.s32.totalorder %s28_s17, %s28_s17 }
  0x11   :  { %p2909_p5 = scmp.ne.s32.totalorder %s28_s17, %s2908_s18  ;;  %p2914_p7 = scmp.lt.s32.totalorder %s2908_s18, %s2908_s18 }
  0x13   :  { %p2915_p8 = por %p2914_p7, %p2913_p6 }
  0x15   :  { %p2916_p9 = pnand %p2915_p8, %p2909_p5 }
  0x17   :  { %2919 = shalt.err (!%p2916_p9)
}
  0x18   :  { %33 = dma.hbm_to_vmem [thread:$0]  %s5465_s1, 2048, %s28_s17, [#allocation6], %s2947_s12, %s2947_s12, %s2948_s13  }
  0x19   :  { %2940 = dma.done.wait [#allocation3], 2048  }
  0x1a   :  { %2941 = vsyncadd [#allocation3], 4294965248 }
  0x1b   :  { %2942 = dma.done.wait [#allocation6], 2048  }
  0x1c   :  { %2943 = vsyncadd [#allocation6], 4294965248  ;;  %v42_v0 = vld [vmem:[#allocation2 + $0x10] sm:$0xff]  ;;  %v43_v1 = vld [vmem:[#allocation2 + $0x18] sm:$0xff]  ;;  %vm104_vm0 = vcmask 1040384   ;;  %vm329_vm1 = vcmask 1045504  }
  0x1d   :  { %v40_v2 = vld [vmem:[#allocation2] sm:$0xff]  ;;  %v81_v3 = vrot.slane %v42_v0, 1  ;;  %v108_v4 = vrot.slane %v42_v0, 7  ;;  %v109_v5 = vrot.slane %v43_v1, 7  ;;  %v41_v6 = vld [vmem:[#allocation2 + $0x8] sm:$0xff]  ;;  %v154_v11 = vrot.slane %v43_v1, 5 }
  0x1e   :  { %v80_v7 = vrot.slane %v40_v2, 1  ;;  %v44_v8 = vld [vmem:[#allocation2 + $0x20] sm:$0xff]  ;;  %v105_v9 = vrot.slane %v40_v2, 7  ;;  %v106_v10 = vrot.slane %v41_v6, 7  ;;  %v153_v12 = vrot.slane %v41_v6, 5  ;;  %v45_v13 = vld [vmem:[#allocation2 + $0x28] sm:$0xff] }
  0x1f   :  { %v2983_v14 = vsel %vm104_vm0, %v108_v4, %v109_v5  ;;  %v2986_v15 = vsel %vm104_vm0, %v81_v3, %v108_v4  ;;  %v111_v16 = vrot.slane %v44_v8, 7  ;;  %v112_v17 = vrot.slane %v45_v13, 7  ;;  %v46_v34 = vld [vmem:[#allocation2 + $0x30] sm:$0xff]  ;;  %v47_v39 = vld [vmem:[#allocation2 + $0x38] sm:$0xff]  ;;  %s2950_s0 = smov 127   ;;  %v48_v44 = vld [vmem:[#allocation2 + $0x40] sm:$0xff] }
  0x20   :  { %v299_v18 = vadd.f32 %v2986_v15, %v42_v0  ;;  %v335_v19 = vrot.slane %v2986_v15, 2  ;;  %v336_v20 = vrot.slane %v2983_v14, 2  ;;  %v2992_v21 = vsel %vm104_vm0, %v105_v9, %v106_v10  ;;  %v49_v45 = vld [vmem:[#allocation2 + $0x48] sm:$0xff]  ;;  %s2951_s1 = smov 1   ;;  %s2952_s21 = smov 3  }
  0x21   :  { %v2995_v22 = vsel %vm104_vm0, %v80_v7, %v105_v9  ;;  %v331_v23 = vrot.slane %v2992_v21, 2  ;;  %v2999_v24 = vsel %vm104_vm0, %v109_v5, %v154_v11  ;;  %v300_v25 = vadd.f32 %v2983_v14, %v43_v1  ;;  %v51_v11 = vld [vmem:[#allocation2 + $0x58] sm:$0xff]  ;;  %s2953_s22 = smov 126   ;;  %s2954_s23 = smov [#allocation7]  }
  0x22   :  { %5659 = vst [vmem:[#allocation11_spill] sm:$0xff] %v2999_v24  ;;  %v337_v26 = vsel %vm329_vm1, %v335_v19, %v336_v20  ;;  %v297_v27 = vadd.f32 %v2995_v22, %v40_v2  ;;  %v330_v28 = vrot.slane %v2995_v22, 2  ;;  %v338_v29 = vrot.slane %v2999_v24, 2  ;;  %s2778_s24 = sshll.u32 %s2954_s23, 4  ;;  %s2779_s24 = int_to_ptr.vmem [resolvable:$true] %s2778_s24 }
  0x23   :  { %v3006_v30 = vadd.f32 %v337_v26, %v299_v18  ;;  %v3009_v31 = vsel %vm104_vm0, %v106_v10, %v153_v12  ;;  %v298_v32 = vadd.f32 %v2992_v21, %v41_v6  ;;  %v3013_v33 = vsel %vm104_vm0, %v111_v16, %v112_v17  ;;  %v50_v6 = vld [vmem:[#allocation2 + $0x50] sm:$0xff]  ;;  %v53_v26 = vld [vmem:[#allocation2 + $0x68] sm:$0xff]  ;;  %s2920_s25 = scalar_lea.vmem %s2779_s24, 2048  ;;  %p2925_p11 = scmp.lt.s32.totalorder %s2779_s24, %s2779_s24 }
  0x24   :  { %5661 = vst [vmem:[#allocation13_spill] sm:$0xff] %v3013_v33  ;;  %v332_v35 = vsel %vm329_vm1, %v330_v28, %v331_v23  ;;  %v339_v36 = vsel %vm329_vm1, %v336_v20, %v338_v29  ;;  %v333_v37 = vrot.slane %v3009_v31, 2  ;;  %v155_v38 = vrot.slane %v45_v13, 5  ;;  %p2921_p10 = scmp.ne.s32.totalorder %s2779_s24, %s2920_s25  ;;  %p2926_p12 = scmp.lt.s32.totalorder %s2920_s25, %s2920_s25 }
  0x25   :  { %5660 = vst [vmem:[#allocation12_spill] sm:$0xff] %v3006_v30  ;;  %982 = vrot.lane.b32.xlu1 %v3006_v30, %s2950_s0  ;;  %v3020_v40 = vadd.f32 %v332_v35, %v297_v27  ;;  %v3022_v41 = vadd.f32 %v339_v36, %v300_v25  ;;  %v302_v42 = vadd.f32 %v3013_v33, %v45_v13  ;;  %v341_v43 = vrot.slane %v3013_v33, 2  ;;  %v52_v25 = vld [vmem:[#allocation2 + $0x60] sm:$0xff] }
  0x26   :  { %v334_v46 = vsel %vm329_vm1, %v331_v23, %v333_v37  ;;  %v3028_v47 = vsel %vm104_vm0, %v112_v17, %v155_v38  ;;  %v82_v48 = vrot.slane %v44_v8, 1  ;;  %v114_v49 = vrot.slane %v46_v34, 7  ;;  %p2927_p13 = por %p2926_p12, %p2925_p11 }
  0x27   :  { %5662 = vst [vmem:[#allocation14_spill] sm:$0xff] %v3020_v40  ;;  %5663 = vst [vmem:[#allocation15_spill] sm:$0xff] %v3022_v41  ;;  %978 = vrot.lane.b32.xlu0 %v3020_v40, %s2950_s0  ;;  %v3032_v50 = vadd.f32 %v334_v46, %v298_v32  ;;  %v343_v51 = vrot.slane %v3028_v47, 2  ;;  %v115_v52 = vrot.slane %v47_v39, 7  ;;  %v156_v53 = vrot.slane %v47_v39, 5 }
  0x28   :  { %5664 = vst [vmem:[#allocation16_spill] sm:$0xff] %v3028_v47  ;;  %v3036_v54 = vsel %vm104_vm0, %v82_v48, %v111_v16  ;;  %v83_v55 = vrot.slane %v46_v34, 1  ;;  %v117_v56 = vrot.slane %v48_v44, 7  ;;  %v118_v57 = vrot.slane %v49_v45, 7  ;;  %p2928_p0 = pnand %p2927_p13, %p2921_p10 }
  0x29   :  { %5665 = vst [vmem:[#allocation17_spill] sm:$0xff] %v3032_v50  ;;  %984 = vrot.lane.b32.xlu1 %v3022_v41, %s2950_s0  ;;  %v344_v58 = vsel %vm329_vm1, %v341_v43, %v343_v51  ;;  %v301_v59 = vadd.f32 %v3036_v54, %v44_v8  ;;  %v340_v60 = vrot.slane %v3036_v54, 2  ;;  %v3044_v61 = vsel %vm104_vm0, %v114_v49, %v115_v52 }
  0x2a   :  { %5666 = vst [vmem:[#allocation18_spill] sm:$0xff] %v3044_v61  ;;  %v3046_v62 = vadd.f32 %v344_v58, %v302_v42  ;;  %v3049_v63 = vsel %vm104_vm0, %v115_v52, %v156_v53  ;;  %v304_v0 = vadd.f32 %v3044_v61, %v47_v39  ;;  %v346_v1 = vrot.slane %v3044_v61, 2 }
  0x2b   :  { %5668 = vst [vmem:[#allocation20_spill] sm:$0xff] %v3049_v63  ;;  %980 = vrot.lane.b32.xlu0 %v3032_v50, %s2950_s0  ;;  %v342_v2 = vsel %vm329_vm1, %v340_v60, %v341_v43  ;;  %v348_v3 = vrot.slane %v3049_v63, 2  ;;  %v3058_v4 = vsel %vm104_vm0, %v83_v55, %v114_v49  ;;  %v3061_v5 = vsel %vm104_vm0, %v117_v56, %v118_v57  ;;  %v54_v55 = vld [vmem:[#allocation2 + $0x70] sm:$0xff]  ;;  %v55_v60 = vld [vmem:[#allocation2 + $0x78] sm:$0xff] }
  0x2c   :  { %5667 = vst [vmem:[#allocation19_spill] sm:$0xff] %v3046_v62  ;;  %5669 = vst [vmem:[#allocation21_spill] sm:$0xff] %v3061_v5  ;;  %v3063_v7 = vadd.f32 %v342_v2, %v301_v59  ;;  %v303_v8 = vadd.f32 %v3058_v4, %v46_v34  ;;  %v345_v9 = vrot.slane %v3058_v4, 2  ;;  %v157_v10 = vrot.slane %v49_v45, 5 }
  0x2d   :  { %988 = vrot.lane.b32.xlu1 %v3046_v62, %s2950_s0  ;;  %v349_v12 = vsel %vm329_vm1, %v346_v1, %v348_v3  ;;  %v306_v13 = vadd.f32 %v3061_v5, %v49_v45  ;;  %v351_v16 = vrot.slane %v3061_v5, 2  ;;  %v84_v17 = vrot.slane %v48_v44, 1 }
  0x2e   :  { %5670 = vst [vmem:[#allocation22_spill] sm:$0xff] %v3063_v7  ;;  %v3072_v18 = vadd.f32 %v349_v12, %v304_v0  ;;  %v347_v19 = vsel %vm329_vm1, %v345_v9, %v346_v1  ;;  %v3076_v20 = vsel %vm104_vm0, %v118_v57, %v157_v10  ;;  %v120_v23 = vrot.slane %v50_v6, 7 }
  0x2f   :  { %5672 = vst [vmem:[#allocation24_spill] sm:$0xff] %v3076_v20  ;;  %986 = vrot.lane.b32.xlu0 %v3063_v7, %s2950_s0  ;;  %v3080_v27 = vadd.f32 %v347_v19, %v303_v8  ;;  %v353_v28 = vrot.slane %v3076_v20, 2  ;;  %v3084_v29 = vsel %vm104_vm0, %v84_v17, %v117_v56  ;;  %v121_v32 = vrot.slane %v51_v11, 7 }
  0x30   :  { %5671 = vst [vmem:[#allocation23_spill] sm:$0xff] %v3072_v18  ;;  %v305_v34 = vadd.f32 %v3084_v29, %v48_v44  ;;  %v350_v35 = vrot.slane %v3084_v29, 2  ;;  %v158_v36 = vrot.slane %v51_v11, 5  ;;  %v85_v37 = vrot.slane %v50_v6, 1 }
  0x31   :  { %5673 = vst [vmem:[#allocation25_spill] sm:$0xff] %v3080_v27  ;;  %992 = vrot.lane.b32.xlu1 %v3072_v18, %s2950_s0  ;;  %v354_v38 = vsel %vm329_vm1, %v351_v16, %v353_v28  ;;  %v3092_v39 = vsel %vm104_vm0, %v120_v23, %v121_v32  ;;  %v123_v42 = vrot.slane %v52_v25, 7  ;;  %v124_v43 = vrot.slane %v53_v26, 7 }
  0x32   :  { %5674 = vst [vmem:[#allocation26_spill] sm:$0xff] %v3092_v39  ;;  %v3094_v45 = vadd.f32 %v354_v38, %v306_v13  ;;  %v352_v46 = vsel %vm329_vm1, %v350_v35, %v351_v16  ;;  %v3098_v44 = vsel %vm104_vm0, %v121_v32, %v158_v36  ;;  %v308_v48 = vadd.f32 %v3092_v39, %v51_v11 }
  0x33   :  { %5676 = vst [vmem:[#allocation28_spill] sm:$0xff] %v3098_v44  ;;  %990 = vrot.lane.b32.xlu0 %v3080_v27, %s2950_s0  ;;  %v3103_v49 = vadd.f32 %v352_v46, %v305_v34  ;;  %v356_v51 = vrot.slane %v3092_v39, 2  ;;  %v358_v52 = vrot.slane %v3098_v44, 2  ;;  %v3108_v53 = vsel %vm104_vm0, %v85_v37, %v120_v23 }
  0x34   :  { %5675 = vst [vmem:[#allocation27_spill] sm:$0xff] %v3094_v45  ;;  %5678 = vst [vmem:[#allocation30_spill] sm:$0xff] %v3108_v53  ;;  %v307_v56 = vadd.f32 %v3108_v53, %v50_v6  ;;  %v355_v57 = vrot.slane %v3108_v53, 2  ;;  %v3113_v58 = vsel %vm104_vm0, %v123_v42, %v124_v43  ;;  %v159_v59 = vrot.slane %v53_v26, 5 }
  0x35   :  { %5677 = vst [vmem:[#allocation29_spill] sm:$0xff] %v3103_v49  ;;  %5679 = vst [vmem:[#allocation31_spill] sm:$0xff] %v3113_v58  ;;  %996 = vrot.lane.b32.xlu1 %v3094_v45, %s2950_s0  ;;  %v359_v0 = vsel %vm329_vm1, %v356_v51, %v358_v52  ;;  %v310_v1 = vadd.f32 %v3113_v58, %v53_v26  ;;  %v361_v2 = vrot.slane %v3113_v58, 2  ;;  %v86_v3 = vrot.slane %v52_v25, 1 }
  0x36   :  { %v3120_v8 = vadd.f32 %v359_v0, %v308_v48  ;;  %v357_v6 = vsel %vm329_vm1, %v355_v57, %v356_v51  ;;  %v3124_v9 = vsel %vm104_vm0, %v124_v43, %v159_v59  ;;  %v126_v10 = vrot.slane %v54_v55, 7  ;;  %v57_v59 = vld [vmem:[#allocation5 + $0x8] sm:$0xff] }
  0x37   :  { %5681 = vst [vmem:[#allocation33_spill] sm:$0xff] %v3124_v9  ;;  %994 = vrot.lane.b32.xlu0 %v3103_v49, %s2950_s0  ;;  %v3128_v11 = vadd.f32 %v357_v6, %v307_v56  ;;  %v363_v12 = vrot.slane %v3124_v9, 2  ;;  %v3132_v13 = vsel %vm104_vm0, %v86_v3, %v123_v42  ;;  %v127_v16 = vrot.slane %v55_v60, 7  ;;  %v59_v3 = vld [vmem:[#allocation5 + $0x18] sm:$0xff] }
  0x38   :  { %5680 = vst [vmem:[#allocation32_spill] sm:$0xff] %v3120_v8  ;;  %5683 = vst [vmem:[#allocation35_spill] sm:$0xff] %v3132_v13  ;;  %v309_v17 = vadd.f32 %v3132_v13, %v52_v25  ;;  %v360_v19 = vrot.slane %v3132_v13, 2  ;;  %v160_v23 = vrot.slane %v55_v60, 5  ;;  %v87_v26 = vrot.slane %v54_v55, 1 }
  0x39   :  { %5682 = vst [vmem:[#allocation34_spill] sm:$0xff] %v3128_v11  ;;  %1000 = vrot.lane.b32.xlu1 %v3120_v8, %s2950_s0  ;;  %v364_v28 = vsel %vm329_vm1, %v361_v2, %v363_v12  ;;  %v3140_v32 = vsel %vm104_vm0, %v126_v10, %v127_v16  ;;  %v218_v0 = vrot.slane %v57_v59, 7  ;;  %vm1122_vm2 = vcmask 7168  }
  0x3a   :  { %5684 = vst [vmem:[#allocation36_spill] sm:$0xff] %v3140_v32  ;;  %v3142_v34 = vadd.f32 %v364_v28, %v310_v1  ;;  %v362_v35 = vsel %vm329_vm1, %v360_v19, %v361_v2  ;;  %v3146_v36 = vsel %vm104_vm0, %v127_v16, %v160_v23  ;;  %v312_v25 = vadd.f32 %v3140_v32, %v55_v60  ;;  %v58_v2 = vld [vmem:[#allocation5 + $0x10] sm:$0xff] }
  0x3b   :  { %5686 = vst [vmem:[#allocation38_spill] sm:$0xff] %v3146_v36  ;;  %998 = vrot.lane.b32.xlu0 %v3128_v11, %s2950_s0  ;;  %v3151_v37 = vadd.f32 %v362_v35, %v309_v17  ;;  %v366_v38 = vrot.slane %v3140_v32, 2  ;;  %v368_v42 = vrot.slane %v3146_v36, 2  ;;  %v3156_v43 = vsel %vm104_vm0, %v87_v26, %v126_v10 }
  0x3c   :  { %5685 = vst [vmem:[#allocation37_spill] sm:$0xff] %v3142_v34  ;;  %5688 = vst [vmem:[#allocation40_spill] sm:$0xff] %v3156_v43  ;;  %v311_v46 = vadd.f32 %v3156_v43, %v54_v55  ;;  %v365_v48 = vrot.slane %v3156_v43, 2  ;;  %v56_v55 = vld [vmem:[#allocation5] sm:$0xff]  ;;  %v265_v1 = vrot.slane %v57_v59, 5  ;;  %v220_v16 = vrot.slane %v58_v2, 7 }
  0x3d   :  { %5687 = vst [vmem:[#allocation39_spill] sm:$0xff] %v3151_v37  ;;  %1004 = vrot.lane.b32.xlu1 %v3142_v34, %s2950_s0  ;;  %v369_v51 = vsel %vm329_vm1, %v366_v38, %v368_v42  ;;  %v217_v60 = vrot.slane %v56_v55, 7  ;;  %v193_v6 = vrot.slane %v56_v55, 1  ;;  %v221_v17 = vrot.slane %v59_v3, 7 }
  0x3e   :  { %v3163_v52 = vadd.f32 %v369_v51, %v312_v25  ;;  %v367_v56 = vsel %vm329_vm1, %v365_v48, %v366_v38  ;;  %v3230_v12 = vsel %vm104_vm0, %v218_v0, %v265_v1  ;;  %v266_v19 = vrot.slane %v59_v3, 5 }
  0x3f   :  { %1002 = vrot.lane.b32.xlu0 %v3151_v37, %s2950_s0  ;;  %v3168_v57 = vadd.f32 %v367_v56, %v311_v46  ;;  %v3225_v10 = vsel %vm104_vm0, %v217_v60, %v218_v0  ;;  %5692 = vst [vmem:[#allocation44_spill] sm:$0xff] %v3230_v12  ;;  %v3235_v23 = vsel %vm104_vm0, %v193_v6, %v217_v60  ;;  %v194_v26 = vrot.slane %v58_v2, 1 }
  0x40   :  { %5689 = vst [vmem:[#allocation41_spill] sm:$0xff] %v3163_v52  ;;  %5691 = vst [vmem:[#allocation43_spill] sm:$0xff] %v3225_v10  ;;  %v435_v28 = vrot.slane %v3225_v10, 2  ;;  %v437_v35 = vrot.slane %v3230_v12, 2  ;;  %v3242_v25 = vsel %vm104_vm0, %v220_v16, %v221_v17  ;;  %v3245_v38 = vsel %vm104_vm0, %v221_v17, %v266_v19 }
  0x41   :  { %5690 = vst [vmem:[#allocation42_spill] sm:$0xff] %v3168_v57  ;;  %1008 = vrot.lane.b32.xlu1 %v3163_v52, %s2950_s0  ;;  %5693 = vst [vmem:[#allocation45_spill] sm:$0xff] %v3235_v23  ;;  %v434_v42 = vrot.slane %v3235_v23, 2  ;;  %v403_v46 = vadd.f32 %v3225_v10, %v57_v59  ;;  %v3252_v48 = vsel %vm104_vm0, %v194_v26, %v220_v16  ;;  %v440_v56 = vrot.slane %v3242_v25, 2 }
  0x42   :  { %5694 = vst [vmem:[#allocation46_spill] sm:$0xff] %v3242_v25  ;;  %5695 = vst [vmem:[#allocation47_spill] sm:$0xff] %v3245_v38  ;;  %v438_v51 = vsel %vm329_vm1, %v435_v28, %v437_v35  ;;  %v442_v60 = vrot.slane %v3245_v38, 2  ;;  %v402_v0 = vadd.f32 %v3235_v23, %v56_v55  ;;  %v439_v6 = vrot.slane %v3252_v48, 2 }
  0x43   :  { %1006 = vrot.lane.b32.xlu0 %v3168_v57, %s2950_s0  ;;  %5696 = vst [vmem:[#allocation48_spill] sm:$0xff] %v3252_v48  ;;  %v436_v1 = vsel %vm329_vm1, %v434_v42, %v435_v28  ;;  %v3264_v59 = vadd.f32 %v438_v51, %v403_v46  ;;  %v405_v16 = vadd.f32 %v3242_v25, %v59_v3  ;;  %vm1139_vm3 = vcmask 138240  }
  0x44   :  { %v443_v17 = vsel %vm329_vm1, %v440_v56, %v442_v60  ;;  %v3270_v19 = vadd.f32 %v436_v1, %v402_v0  ;;  %v404_v55 = vadd.f32 %v3252_v48, %v58_v2  ;;  %v441_v26 = vsel %vm329_vm1, %v439_v6, %v440_v56 }
  0x45   :  { %1028 = vrot.lane.b32.xlu1 %v3032_v50, %s2951_s1  ;;  %5697 = vst [vmem:[#allocation49_spill] sm:$0xff] %v3264_v59  ;;  %v3276_v28 = vadd.f32 %v443_v17, %v405_v16  ;;  %vm2756_vm4 = vcmask 130048  }
  0x46   :  { %5698 = vst [vmem:[#allocation50_spill] sm:$0xff] %v3270_v19  ;;  %v3280_v3 = vadd.f32 %v441_v26, %v404_v55 }
  0x47   :  { %1026 = vrot.lane.b32.xlu0 %v3020_v40, %s2951_s1  ;;  %5699 = vst [vmem:[#allocation51_spill] sm:$0xff] %v3276_v28 }
  0x48   :  { %5700 = vst [vmem:[#allocation52_spill] sm:$0xff] %v3280_v3 }
  0x49   :  { %1032 = vrot.lane.b32.xlu1 %v3022_v41, %s2951_s1 }
  0x4b   :  { %1030 = vrot.lane.b32.xlu0 %v3006_v30, %s2951_s1 }
  0x4d   :  { %1036 = vrot.lane.b32.xlu1 %v3046_v62, %s2951_s1 }
  0x4f   :  { %1034 = vrot.lane.b32.xlu0 %v3063_v7, %s2951_s1 }
  0x51   :  { %1040 = vrot.lane.b32.xlu1 %v3072_v18, %s2951_s1 }
  0x53   :  { %1038 = vrot.lane.b32.xlu0 %v3080_v27, %s2951_s1 }
  0x55   :  { %1044 = vrot.lane.b32.xlu1 %v3094_v45, %s2951_s1 }
  0x57   :  { %1042 = vrot.lane.b32.xlu0 %v3103_v49, %s2951_s1 }
  0x59   :  { %1048 = vrot.lane.b32.xlu1 %v3120_v8, %s2951_s1 }
  0x5b   :  { %1046 = vrot.lane.b32.xlu0 %v3128_v11, %s2951_s1 }
  0x5d   :  { %1052 = vrot.lane.b32.xlu1 %v3142_v34, %s2951_s1 }
  0x5f   :  { %1050 = vrot.lane.b32.xlu0 %v3151_v37, %s2951_s1 }
  0x61   :  { %1056 = vrot.lane.b32.xlu1 %v3163_v52, %s2951_s1 }
  0x63   :  { %1054 = vrot.lane.b32.xlu0 %v3168_v57, %s2951_s1 }
  0x65   :  { %1076 = vrot.lane.b32.xlu1 %v3032_v50, %s2952_s21 }
  0x67   :  { %1074 = vrot.lane.b32.xlu0 %v3020_v40, %s2952_s21 }
  0x69   :  { %1080 = vrot.lane.b32.xlu1 %v3022_v41, %s2952_s21 }
  0x6b   :  { %1078 = vrot.lane.b32.xlu0 %v3006_v30, %s2952_s21 }
  0x6d   :  { %1084 = vrot.lane.b32.xlu1 %v3046_v62, %s2952_s21 }
  0x6f   :  { %1082 = vrot.lane.b32.xlu0 %v3063_v7, %s2952_s21 }
  0x71   :  { %1088 = vrot.lane.b32.xlu1 %v3072_v18, %s2952_s21 }
  0x73   :  { %1086 = vrot.lane.b32.xlu0 %v3080_v27, %s2952_s21 }
  0x75   :  { %1092 = vrot.lane.b32.xlu1 %v3094_v45, %s2952_s21 }
  0x77   :  { %1090 = vrot.lane.b32.xlu0 %v3103_v49, %s2952_s21 }
  0x79   :  { %1096 = vrot.lane.b32.xlu1 %v3120_v8, %s2952_s21 }
  0x7b   :  { %1094 = vrot.lane.b32.xlu0 %v3128_v11, %s2952_s21 }
  0x7d   :  { %1100 = vrot.lane.b32.xlu1 %v3142_v34, %s2952_s21 }
  0x7f   :  { %1098 = vrot.lane.b32.xlu0 %v3151_v37, %s2952_s21 }
  0x81   :  { %1104 = vrot.lane.b32.xlu1 %v3163_v52, %s2952_s21 }
  0x83   :  { %1102 = vrot.lane.b32.xlu0 %v3168_v57, %s2952_s21 }
  0x85   :  { %1270 = vrot.lane.b32.xlu1 %v3264_v59, %s2950_s0 }
  0x87   :  { %1268 = vrot.lane.b32.xlu0 %v3270_v19, %s2950_s0 }
  0x89   :  { %1274 = vrot.lane.b32.xlu1 %v3276_v28, %s2950_s0 }
  0x8b   :  { %1272 = vrot.lane.b32.xlu0 %v3280_v3, %s2950_s0 }
  0x97   :  { %v983_v35 = vpop.permute.xlu1 %982 }
  0x99   :  { %v979_v2 = vpop.permute.xlu0 %978 }
  0x9b   :  { %v985_v42 = vpop.permute.xlu1 %984 }
  0x9d   :  { %v981_v46 = vpop.permute.xlu0 %980 }
  0x9f   :  { %v989_v51 = vpop.permute.xlu1 %988 }
  0xa1   :  { %v987_v56 = vpop.permute.xlu0 %986 }
  0xa3   :  { %v993_v60 = vpop.permute.xlu1 %992 }
  0xa5   :  { %v991_v0 = vpop.permute.xlu0 %990 }
  0xa7   :  { %v3286_v1 = vpop.permute.xlu1 %996 }
  0xa9   :  { %v3288_v6 = vpop.permute.xlu0 %994 }
  0xab   :  { %v3290_v16 = vpop.permute.xlu1 %1000 }
  0xad   :  { %v3292_v17 = vpop.permute.xlu0 %998 }
  0xaf   :  { %v3294_v55 = vpop.permute.xlu1 %1004 }
  0xb1   :  { %v3296_v26 = vpop.permute.xlu0 %1002 }
  0xb3   :  { %v3298_v48 = vpop.permute.xlu1 %1008 }
  0xb5   :  { %v3300_v38 = vpop.permute.xlu0 %1006 }
  0xb7   :  { %v1029_v25 = vpop.permute.xlu1 %1028 }
  0xb8   :  { %v1124_v30 = vsel %vm1122_vm2, %v981_v46, %v1029_v25 }
  0xb9   :  { %v1027_v23 = vpop.permute.xlu0 %1026 }
  0xba   :  { %v1123_v50 = vsel %vm1122_vm2, %v979_v2, %v1027_v23 }
  0xbb   :  { %v1033_v12 = vpop.permute.xlu1 %1032 }
  0xbc   :  { %v1126_v32 = vsel %vm1122_vm2, %v985_v42, %v1033_v12 }
  0xbd   :  { %v1031_v10 = vpop.permute.xlu0 %1030 }
  0xbf   :  { %v1037_v57 = vpop.permute.xlu1 %1036 }
  0xc0   :  { %v1128_v12 = vsel %vm1122_vm2, %v989_v51, %v1037_v57 }
  0xc1   :  { %v1035_v52 = vpop.permute.xlu0 %1034 }
  0xc3   :  { %v1041_v37 = vpop.permute.xlu1 %1040 }
  0xc4   :  { %v1130_v57 = vsel %vm1122_vm2, %v993_v60, %v1041_v37  ;;  %v3367_v60 = vld [vmem:[#allocation5 + $0x30] sm:$0xff] }
  0xc5   :  { %v1039_v34 = vpop.permute.xlu0 %1038 }
  0xc7   :  { %v1045_v11 = vpop.permute.xlu1 %1044 }
  0xc9   :  { %v1043_v8 = vpop.permute.xlu0 %1042 }
  0xcb   :  { %v3302_v49 = vpop.permute.xlu1 %1048 }
  0xcd   :  { %v3304_v45 = vpop.permute.xlu0 %1046 }
  0xcf   :  { %v3306_v27 = vpop.permute.xlu1 %1052 }
  0xd1   :  { %v3308_v18 = vpop.permute.xlu0 %1050 }
  0xd3   :  { %v3310_v7 = vpop.permute.xlu1 %1056 }
  0xd5   :  { %v3312_v62 = vpop.permute.xlu0 %1054 }
  0xd7   :  { %v1077_v41 = vpop.permute.xlu1 %1076 }
  0xd8   :  { %v3316_v40 = vsel %vm1139_vm3, %v1124_v30, %v1077_v41  ;;  %v1125_v30 = vsel %vm1122_vm2, %v983_v35, %v1031_v10  ;;  %v1127_v10 = vsel %vm1122_vm2, %v987_v56, %v1035_v52  ;;  %v1129_v56 = vsel %vm1122_vm2, %v991_v0, %v1039_v34 }
  0xd9   :  { %v1075_v43 = vpop.permute.xlu0 %1074  ;;  %1190 = vrot.lane.b32.xlu1 %v3316_v40, %s2953_s22 }
  0xda   :  { %v3322_v36 = vsel %vm1139_vm3, %v1123_v50, %v1075_v43  ;;  %v3336_v50 = vld [vmem:[#allocation5 + $0x20] sm:$0xff]  ;;  %v61_v43 = vld [vmem:[#allocation5 + $0x28] sm:$0xff] }
  0xdb   :  { %1188 = vrot.lane.b32.xlu0 %v3322_v36, %s2953_s22  ;;  %v1081_v25 = vpop.permute.xlu1 %1080  ;;  %v223_v42 = vrot.slane %v3336_v50, 7 }
  0xdc   :  { %v3328_v46 = vsel %vm1139_vm3, %v1126_v32, %v1081_v25  ;;  %v224_v25 = vrot.slane %v61_v43, 7 }
  0xdd   :  { %5701 = vst [vmem:[#allocation53_spill] sm:$0xff] %v3328_v46  ;;  %v1079_v41 = vpop.permute.xlu0 %1078  ;;  %1194 = vrot.lane.b32.xlu1 %v3328_v46, %s2953_s22 }
  0xde   :  { %v3334_v23 = vsel %vm1139_vm3, %v1125_v30, %v1079_v41  ;;  %v267_v30 = vrot.slane %v61_v43, 5 }
  0xdf   :  { %5702 = vst [vmem:[#allocation54_spill] sm:$0xff] %v3334_v23  ;;  %1192 = vrot.lane.b32.xlu0 %v3334_v23, %s2953_s22  ;;  %v1085_v2 = vpop.permute.xlu1 %1084 }
  0xe0   :  { %v3342_v32 = vsel %vm1139_vm3, %v1128_v12, %v1085_v2  ;;  %v195_v12 = vrot.slane %v3336_v50, 1  ;;  %v3365_v37 = vsel %vm104_vm0, %v224_v25, %v267_v30 }
  0xe1   :  { %5703 = vst [vmem:[#allocation55_spill] sm:$0xff] %v3342_v32  ;;  %v1083_v35 = vpop.permute.xlu0 %1082  ;;  %1198 = vrot.lane.b32.xlu1 %v3342_v32, %s2953_s22  ;;  %5707 = vst [vmem:[#allocation59_spill] sm:$0xff] %v3365_v37  ;;  %v447_v30 = vrot.slane %v3365_v37, 2 }
  0xe2   :  { %v3349_v41 = vsel %vm1139_vm3, %v1127_v10, %v1083_v35  ;;  %v3362_v10 = vsel %vm104_vm0, %v223_v42, %v224_v25  ;;  %v3377_v0 = vsel %vm104_vm0, %v195_v12, %v223_v42  ;;  %v196_v42 = vrot.slane %v3367_v60, 1 }
  0xe3   :  { %5704 = vst [vmem:[#allocation56_spill] sm:$0xff] %v3349_v41  ;;  %1196 = vrot.lane.b32.xlu0 %v3349_v41, %s2953_s22  ;;  %v1089_v51 = vpop.permute.xlu1 %1088  ;;  %5706 = vst [vmem:[#allocation58_spill] sm:$0xff] %v3362_v10  ;;  %v63_v41 = vld [vmem:[#allocation5 + $0x38] sm:$0xff]  ;;  %v445_v25 = vrot.slane %v3362_v10, 2 }
  0xe4   :  { %v3356_v52 = vsel %vm1139_vm3, %v1130_v57, %v1089_v51  ;;  %v1132_v57 = vsel %vm1122_vm2, %v3286_v1, %v1045_v11  ;;  %5709 = vst [vmem:[#allocation61_spill] sm:$0xff] %v3377_v0  ;;  %v227_v1 = vrot.slane %v63_v41, 7 }
  0xe5   :  { %5705 = vst [vmem:[#allocation57_spill] sm:$0xff] %v3356_v52  ;;  %v1087_v2 = vpop.permute.xlu0 %1086  ;;  %1202 = vrot.lane.b32.xlu1 %v3356_v52, %s2953_s22  ;;  %v67_v52 = vld [vmem:[#allocation5 + $0x58] sm:$0xff] }
  0xe6   :  { %v3370_v35 = vsel %vm1139_vm3, %v1129_v56, %v1087_v2  ;;  %v226_v56 = vrot.slane %v3367_v60, 7  ;;  %v1131_v2 = vsel %vm1122_vm2, %v3288_v6, %v1043_v8  ;;  %v3398_v8 = vld [vmem:[#allocation5 + $0x40] sm:$0xff]  ;;  %v3400_v6 = vld [vmem:[#allocation5 + $0x48] sm:$0xff] }
  0xe7   :  { %5708 = vst [vmem:[#allocation60_spill] sm:$0xff] %v3370_v35  ;;  %1200 = vrot.lane.b32.xlu0 %v3370_v35, %s2953_s22  ;;  %v1093_v34 = vpop.permute.xlu1 %1092  ;;  %v268_v35 = vrot.slane %v63_v41, 5 }
  0xe8   :  { %v3380_v51 = vsel %vm1139_vm3, %v1132_v57, %v1093_v34  ;;  %v1134_v57 = vsel %vm1122_vm2, %v3290_v16, %v3302_v49  ;;  %v1133_v49 = vsel %vm1122_vm2, %v3292_v17, %v3304_v45  ;;  %v230_v45 = vrot.slane %v3400_v6, 7 }
  0xe9   :  { %5710 = vst [vmem:[#allocation62_spill] sm:$0xff] %v3380_v51  ;;  %v1091_v11 = vpop.permute.xlu0 %1090  ;;  %1206 = vrot.lane.b32.xlu1 %v3380_v51, %s2953_s22  ;;  %v407_v51 = vadd.f32 %v3362_v10, %v61_v43  ;;  %v3420_v43 = vsel %vm104_vm0, %v196_v42, %v226_v56  ;;  %v269_v17 = vrot.slane %v3400_v6, 5  ;;  %v1136_v10 = vsel %vm1122_vm2, %v3294_v55, %v3306_v27 }
  0xea   :  { %v3391_v12 = vsel %vm1139_vm3, %v1131_v2, %v1091_v11  ;;  %v448_v2 = vsel %vm329_vm1, %v445_v25, %v447_v30  ;;  %v444_v11 = vrot.slane %v3377_v0, 2  ;;  %5715 = vst [vmem:[#allocation67_spill] sm:$0xff] %v3420_v43  ;;  %v1135_v27 = vsel %vm1122_vm2, %v3296_v26, %v3308_v18 }
  0xeb   :  { %5711 = vst [vmem:[#allocation63_spill] sm:$0xff] %v3391_v12  ;;  %1204 = vrot.lane.b32.xlu0 %v3391_v12, %s2953_s22  ;;  %v1097_v34 = vpop.permute.xlu1 %1096  ;;  %v3414_v12 = vsel %vm104_vm0, %v226_v56, %v227_v1  ;;  %v406_v56 = vadd.f32 %v3377_v0, %v3336_v50  ;;  %v3448_v50 = vadd.f32 %v448_v2, %v407_v51  ;;  %v233_v2 = vrot.slane %v67_v52, 7 }
  0xec   :  { %v3403_v37 = vsel %vm1139_vm3, %v1134_v57, %v1097_v34  ;;  %5713 = vst [vmem:[#allocation65_spill] sm:$0xff] %v3414_v12  ;;  %v3417_v57 = vsel %vm104_vm0, %v227_v1, %v268_v35  ;;  %v229_v34 = vrot.slane %v3398_v8, 7  ;;  %v450_v42 = vrot.slane %v3414_v12, 2 }
  0xed   :  { %5712 = vst [vmem:[#allocation64_spill] sm:$0xff] %v3403_v37  ;;  %v1095_v16 = vpop.permute.xlu0 %1094  ;;  %1210 = vrot.lane.b32.xlu1 %v3403_v37, %s2953_s22  ;;  %5714 = vst [vmem:[#allocation66_spill] sm:$0xff] %v3417_v57  ;;  %v3441_v37 = vld [vmem:[#allocation5 + $0x50] sm:$0xff]  ;;  %v409_v0 = vadd.f32 %v3414_v12, %v63_v41  ;;  %v3460_v18 = vsel %vm104_vm0, %v230_v45, %v269_v17  ;;  %v1138_v26 = vsel %vm1122_vm2, %v3298_v48, %v3310_v7  ;;  %v69_v41 = vld [vmem:[#allocation5 + $0x68] sm:$0xff] }
  0xee   :  { %v3423_v30 = vsel %vm1139_vm3, %v1133_v49, %v1095_v16  ;;  %v452_v49 = vrot.slane %v3417_v57, 2  ;;  %v449_v16 = vrot.slane %v3420_v43, 2  ;;  %5718 = vst [vmem:[#allocation70_spill] sm:$0xff] %v3448_v50  ;;  %5721 = vst [vmem:[#allocation73_spill] sm:$0xff] %v3460_v18  ;;  %v408_v17 = vadd.f32 %v3420_v43, %v3367_v60 }
  0xef   :  { %5716 = vst [vmem:[#allocation68_spill] sm:$0xff] %v3423_v30  ;;  %1208 = vrot.lane.b32.xlu0 %v3423_v30, %s2953_s22  ;;  %v1101_v35 = vpop.permute.xlu1 %1100  ;;  %v3457_v30 = vsel %vm104_vm0, %v229_v34, %v230_v45  ;;  %v1137_v48 = vsel %vm1122_vm2, %v3300_v38, %v3312_v62  ;;  %v457_v60 = vrot.slane %v3460_v18, 2  ;;  %v70_v18 = vld [vmem:[#allocation5 + $0x70] sm:$0xff] }
  0xf0   :  { %v3436_v1 = vsel %vm1139_vm3, %v1136_v10, %v1101_v35  ;;  %v446_v10 = vsel %vm329_vm1, %v444_v11, %v445_v25  ;;  %v197_v35 = vrot.slane %v3398_v8, 1  ;;  %5720 = vst [vmem:[#allocation72_spill] sm:$0xff] %v3457_v30  ;;  %v232_v25 = vrot.slane %v3441_v37, 7 }
  0xf1   :  { %5717 = vst [vmem:[#allocation69_spill] sm:$0xff] %v3436_v1  ;;  %v1099_v55 = vpop.permute.xlu0 %1098  ;;  %1214 = vrot.lane.b32.xlu1 %v3436_v1, %s2953_s22  ;;  %v270_v11 = vrot.slane %v67_v52, 5  ;;  %v453_v45 = vsel %vm329_vm1, %v450_v42, %v452_v49  ;;  %v451_v7 = vsel %vm329_vm1, %v449_v16, %v450_v42  ;;  %v198_v49 = vrot.slane %v3441_v37, 1 }
  0xf2   :  { %v3453_v57 = vsel %vm1139_vm3, %v1135_v27, %v1099_v55  ;;  %v3468_v27 = vld [vmem:[#allocation5 + $0x60] sm:$0xff]  ;;  %v236_v16 = vrot.slane %v69_v41, 7  ;;  %v3494_v62 = vadd.f32 %v446_v10, %v406_v56  ;;  %v3497_v38 = vsel %vm104_vm0, %v232_v25, %v233_v2 }
  0xf3   :  { %5719 = vst [vmem:[#allocation71_spill] sm:$0xff] %v3453_v57  ;;  %1212 = vrot.lane.b32.xlu0 %v3453_v57, %s2953_s22  ;;  %v1105_v51 = vpop.permute.xlu1 %1104  ;;  %v455_v57 = vrot.slane %v3457_v30, 2  ;;  %v235_v42 = vrot.slane %v3468_v27, 7  ;;  %5726 = vst [vmem:[#allocation78_spill] sm:$0xff] %v3497_v38  ;;  %v3502_v43 = vadd.f32 %v453_v45, %v409_v0  ;;  %v411_v56 = vadd.f32 %v3457_v30, %v3400_v6 }
  0xf4   :  { %v3471_v55 = vsel %vm1139_vm3, %v1138_v26, %v1105_v51  ;;  %v3484_v26 = vsel %vm104_vm0, %v197_v35, %v229_v34  ;;  %5725 = vst [vmem:[#allocation77_spill] sm:$0xff] %v3494_v62  ;;  %v3500_v34 = vsel %vm104_vm0, %v233_v2, %v270_v11  ;;  %v271_v35 = vrot.slane %v69_v41, 5 }
  0xf5   :  { %5722 = vst [vmem:[#allocation74_spill] sm:$0xff] %v3471_v55  ;;  %v1103_v12 = vpop.permute.xlu0 %1102  ;;  %1218 = vrot.lane.b32.xlu1 %v3471_v55, %s2953_s22  ;;  %5723 = vst [vmem:[#allocation75_spill] sm:$0xff] %v3484_v26  ;;  %v71_v55 = vld [vmem:[#allocation5 + $0x78] sm:$0xff]  ;;  %v410_v10 = vadd.f32 %v3484_v26, %v3398_v8  ;;  %v3514_v2 = vsel %vm104_vm0, %v198_v49, %v232_v25  ;;  %v199_v0 = vrot.slane %v3468_v27, 1  ;;  %v460_v45 = vrot.slane %v3497_v38, 2 }
  0xf6   :  { %v3488_v51 = vsel %vm1139_vm3, %v1137_v48, %v1103_v12  ;;  %5727 = vst [vmem:[#allocation79_spill] sm:$0xff] %v3500_v34  ;;  %5728 = vst [vmem:[#allocation80_spill] sm:$0xff] %v3502_v43  ;;  %v3504_v12 = vadd.f32 %v451_v7, %v408_v17  ;;  %v454_v48 = vrot.slane %v3484_v26, 2  ;;  %v458_v11 = vsel %vm329_vm1, %v455_v57, %v457_v60 }
  0xf7   :  { %5724 = vst [vmem:[#allocation76_spill] sm:$0xff] %v3488_v51  ;;  %1216 = vrot.lane.b32.xlu0 %v3488_v51, %s2953_s22  ;;  %5730 = vst [vmem:[#allocation82_spill] sm:$0xff] %v3514_v2  ;;  %v462_v17 = vrot.slane %v3500_v34, 2  ;;  %v3521_v7 = vsel %vm104_vm0, %v235_v42, %v236_v16  ;;  %v3526_v6 = vsel %vm104_vm0, %v236_v16, %v271_v35  ;;  %v238_v8 = vrot.slane %v70_v18, 7 }
  0xf8   :  { %5729 = vst [vmem:[#allocation81_spill] sm:$0xff] %v3504_v12  ;;  %5731 = vst [vmem:[#allocation83_spill] sm:$0xff] %v3521_v7  ;;  %v239_v25 = vrot.slane %v71_v55, 7  ;;  %v272_v49 = vrot.slane %v71_v55, 5  ;;  %v456_v26 = vsel %vm329_vm1, %v454_v48, %v455_v57  ;;  %v459_v60 = vrot.slane %v3514_v2, 2 }
  0xf9   :  { %1278 = vrot.lane.b32.xlu1 %v3448_v50, %s2950_s0  ;;  %5732 = vst [vmem:[#allocation84_spill] sm:$0xff] %v3526_v6  ;;  %v3532_v34 = vadd.f32 %v458_v11, %v411_v56  ;;  %v413_v30 = vadd.f32 %v3497_v38, %v67_v52  ;;  %v3536_v51 = vsel %vm104_vm0, %v199_v0, %v235_v42  ;;  %v200_v1 = vrot.slane %v70_v18, 1 }
  0xfa   :  { %5734 = vst [vmem:[#allocation86_spill] sm:$0xff] %v3536_v51  ;;  %v463_v16 = vsel %vm329_vm1, %v460_v45, %v462_v17  ;;  %v465_v35 = vrot.slane %v3521_v7, 2  ;;  %v467_v32 = vrot.slane %v3526_v6, 2  ;;  %v3543_v57 = vadd.f32 %v456_v26, %v410_v10 }
  0xfb   :  { %1276 = vrot.lane.b32.xlu0 %v3494_v62, %s2950_s0  ;;  %5733 = vst [vmem:[#allocation85_spill] sm:$0xff] %v3532_v34  ;;  %v412_v48 = vadd.f32 %v3514_v2, %v3441_v37  ;;  %v3548_v52 = vsel %vm104_vm0, %v238_v8, %v239_v25  ;;  %v3551_v42 = vsel %vm104_vm0, %v239_v25, %v272_v49  ;;  %v464_v0 = vrot.slane %v3536_v51, 2 }
  0xfc   :  { %5735 = vst [vmem:[#allocation87_spill] sm:$0xff] %v3543_v57  ;;  %5736 = vst [vmem:[#allocation88_spill] sm:$0xff] %v3548_v52  ;;  %v461_v56 = vsel %vm329_vm1, %v459_v60, %v460_v45  ;;  %v3557_v11 = vadd.f32 %v463_v16, %v413_v30  ;;  %v415_v26 = vadd.f32 %v3521_v7, %v69_v41  ;;  %v470_v17 = vrot.slane %v3548_v52, 2 }
  0xfd   :  { %1282 = vrot.lane.b32.xlu1 %v3502_v43, %s2950_s0  ;;  %5737 = vst [vmem:[#allocation89_spill] sm:$0xff] %v3551_v42  ;;  %v3561_v10 = vsel %vm104_vm0, %v200_v1, %v238_v8  ;;  %v468_v37 = vsel %vm329_vm1, %v465_v35, %v467_v32  ;;  %v472_v25 = vrot.slane %v3551_v42, 2  ;;  %v3568_v45 = vadd.f32 %v461_v56, %v412_v48  ;;  %v1269_v48 = vpop.permute.xlu0 %1268 }
  0xfe   :  { %5738 = vst [vmem:[#allocation90_spill] sm:$0xff] %v3557_v11  ;;  %5739 = vst [vmem:[#allocation91_spill] sm:$0xff] %v3561_v10  ;;  %v414_v30 = vadd.f32 %v3536_v51, %v3468_v27  ;;  %v466_v49 = vsel %vm329_vm1, %v464_v0, %v465_v35  ;;  %v469_v41 = vrot.slane %v3561_v10, 2  ;;  %v3576_v32 = vadd.f32 %v468_v37, %v415_v26 }
  0xff   :  { %1280 = vrot.lane.b32.xlu0 %v3504_v12, %s2950_s0  ;;  %5740 = vst [vmem:[#allocation92_spill] sm:$0xff] %v3568_v45  ;;  %v417_v1 = vadd.f32 %v3548_v52, %v71_v55  ;;  %v473_v8 = vsel %vm329_vm1, %v470_v17, %v472_v25  ;;  %v416_v27 = vadd.f32 %v3561_v10, %v70_v18  ;;  %v1271_v18 = vpop.permute.xlu1 %1270 }
 0x100   :  { %5741 = vst [vmem:[#allocation93_spill] sm:$0xff] %v3576_v32  ;;  %v3582_v60 = vadd.f32 %v466_v49, %v414_v30  ;;  %v471_v16 = vsel %vm329_vm1, %v469_v41, %v470_v17 }
 0x101   :  { %1286 = vrot.lane.b32.xlu1 %v3532_v34, %s2950_s0  ;;  %v3588_v35 = vadd.f32 %v473_v8, %v417_v1  ;;  %v3592_v55 = vadd.f32 %v471_v16, %v416_v27  ;;  %v1273_v0 = vpop.permute.xlu0 %1272 }
 0x102   :  { %5742 = vst [vmem:[#allocation94_spill] sm:$0xff] %v3582_v60 }
 0x103   :  { %1284 = vrot.lane.b32.xlu0 %v3543_v57, %s2950_s0  ;;  %5743 = vst [vmem:[#allocation95_spill] sm:$0xff] %v3588_v35  ;;  %5744 = vst [vmem:[#allocation96_spill] sm:$0xff] %v3592_v55  ;;  %v1275_v56 = vpop.permute.xlu1 %1274 }
 0x105   :  { %1290 = vrot.lane.b32.xlu1 %v3557_v11, %s2950_s0 }
 0x107   :  { %1288 = vrot.lane.b32.xlu0 %v3568_v45, %s2950_s0 }
 0x109   :  { %1294 = vrot.lane.b32.xlu1 %v3576_v32, %s2950_s0 }
 0x10b   :  { %1292 = vrot.lane.b32.xlu0 %v3582_v60, %s2950_s0 }
 0x10d   :  { %1298 = vrot.lane.b32.xlu1 %v3588_v35, %s2950_s0 }
 0x10f   :  { %1296 = vrot.lane.b32.xlu0 %v3592_v55, %s2950_s0 }
 0x111   :  { %1318 = vrot.lane.b32.xlu1 %v3264_v59, %s2951_s1 }
 0x113   :  { %1316 = vrot.lane.b32.xlu0 %v3270_v19, %s2951_s1 }
 0x115   :  { %1322 = vrot.lane.b32.xlu1 %v3276_v28, %s2951_s1 }
 0x117   :  { %1320 = vrot.lane.b32.xlu0 %v3280_v3, %s2951_s1 }
 0x119   :  { %1326 = vrot.lane.b32.xlu1 %v3448_v50, %s2951_s1 }
 0x11b   :  { %1324 = vrot.lane.b32.xlu0 %v3494_v62, %s2951_s1 }
 0x11d   :  { %1330 = vrot.lane.b32.xlu1 %v3502_v43, %s2951_s1 }
 0x11f   :  { %1328 = vrot.lane.b32.xlu0 %v3504_v12, %s2951_s1 }
 0x121   :  { %1334 = vrot.lane.b32.xlu1 %v3532_v34, %s2951_s1 }
 0x123   :  { %1332 = vrot.lane.b32.xlu0 %v3543_v57, %s2951_s1 }
 0x125   :  { %1338 = vrot.lane.b32.xlu1 %v3557_v11, %s2951_s1 }
 0x127   :  { %1336 = vrot.lane.b32.xlu0 %v3568_v45, %s2951_s1 }
 0x129   :  { %1342 = vrot.lane.b32.xlu1 %v3576_v32, %s2951_s1 }
 0x12b   :  { %1340 = vrot.lane.b32.xlu0 %v3582_v60, %s2951_s1 }
 0x12d   :  { %1346 = vrot.lane.b32.xlu1 %v3588_v35, %s2951_s1 }
 0x12f   :  { %1344 = vrot.lane.b32.xlu0 %v3592_v55, %s2951_s1 }
 0x131   :  { %1366 = vrot.lane.b32.xlu1 %v3264_v59, %s2952_s21 }
 0x133   :  { %1364 = vrot.lane.b32.xlu0 %v3270_v19, %s2952_s21 }
 0x135   :  { %1370 = vrot.lane.b32.xlu1 %v3276_v28, %s2952_s21 }
 0x137   :  { %1368 = vrot.lane.b32.xlu0 %v3280_v3, %s2952_s21 }
 0x139   :  { %1374 = vrot.lane.b32.xlu1 %v3448_v50, %s2952_s21 }
 0x13b   :  { %1372 = vrot.lane.b32.xlu0 %v3494_v62, %s2952_s21 }
 0x13d   :  { %1378 = vrot.lane.b32.xlu1 %v3502_v43, %s2952_s21 }
 0x13f   :  { %1376 = vrot.lane.b32.xlu0 %v3504_v12, %s2952_s21 }
 0x141   :  { %1382 = vrot.lane.b32.xlu1 %v3532_v34, %s2952_s21 }
 0x143   :  { %1380 = vrot.lane.b32.xlu0 %v3543_v57, %s2952_s21 }
 0x145   :  { %1386 = vrot.lane.b32.xlu1 %v3557_v11, %s2952_s21 }
 0x147   :  { %1384 = vrot.lane.b32.xlu0 %v3568_v45, %s2952_s21 }
 0x149   :  { %1390 = vrot.lane.b32.xlu1 %v3576_v32, %s2952_s21 }
 0x14b   :  { %1388 = vrot.lane.b32.xlu0 %v3582_v60, %s2952_s21  ;;  %v3658_v26 = vpop.permute.xlu1 %1190 }
 0x14d   :  { %v3660_v37 = vpop.permute.xlu0 %1188  ;;  %1394 = vrot.lane.b32.xlu1 %v3588_v35, %s2952_s21 }
 0x14e   :  { %5745 = vst [vmem:[#allocation97_spill] sm:$0xff] %v3660_v37 }
 0x14f   :  { %1392 = vrot.lane.b32.xlu0 %v3592_v55, %s2952_s21  ;;  %v3666_v17 = vpop.permute.xlu1 %1194 }
 0x150   :  { %5746 = vst [vmem:[#allocation98_spill] sm:$0xff] %v3666_v17 }
 0x151   :  { %v3668_v25 = vpop.permute.xlu0 %1192 }
 0x152   :  { %5747 = vst [vmem:[#allocation99_spill] sm:$0xff] %v3668_v25 }
 0x153   :  { %v3670_v30 = vpop.permute.xlu1 %1198 }
 0x154   :  { %5748 = vst [vmem:[#allocation100_spill] sm:$0xff] %v3670_v30 }
 0x155   :  { %v3672_v49 = vpop.permute.xlu0 %1196 }
 0x156   :  { %5749 = vst [vmem:[#allocation101_spill] sm:$0xff] %v3672_v49 }
 0x157   :  { %v3674_v41 = vpop.permute.xlu1 %1202 }
 0x158   :  { %5750 = vst [vmem:[#allocation102_spill] sm:$0xff] %v3674_v41 }
 0x159   :  { %v3676_v1 = vpop.permute.xlu0 %1200 }
 0x15a   :  { %5751 = vst [vmem:[#allocation103_spill] sm:$0xff] %v3676_v1 }
 0x15b   :  { %v3678_v8 = vpop.permute.xlu1 %1206 }
 0x15c   :  { %5752 = vst [vmem:[#allocation104_spill] sm:$0xff] %v3678_v8 }
 0x15d   :  { %v3680_v27 = vpop.permute.xlu0 %1204 }
 0x15e   :  { %5753 = vst [vmem:[#allocation105_spill] sm:$0xff] %v3680_v27 }
 0x15f   :  { %v3682_v16 = vpop.permute.xlu1 %1210 }
 0x160   :  { %5754 = vst [vmem:[#allocation106_spill] sm:$0xff] %v3682_v16 }
 0x161   :  { %v3684_v10 = vpop.permute.xlu0 %1208 }
 0x162   :  { %5755 = vst [vmem:[#allocation107_spill] sm:$0xff] %v3684_v10 }
 0x163   :  { %v3686_v42 = vpop.permute.xlu1 %1214 }
 0x164   :  { %5756 = vst [vmem:[#allocation108_spill] sm:$0xff] %v3686_v42 }
 0x165   :  { %v3688_v52 = vpop.permute.xlu0 %1212 }
 0x166   :  { %5757 = vst [vmem:[#allocation109_spill] sm:$0xff] %v3688_v52 }
 0x167   :  { %v3690_v51 = vpop.permute.xlu1 %1218 }
 0x168   :  { %5758 = vst [vmem:[#allocation110_spill] sm:$0xff] %v3690_v51 }
 0x169   :  { %v3692_v6 = vpop.permute.xlu0 %1216 }
 0x16a   :  { %5759 = vst [vmem:[#allocation111_spill] sm:$0xff] %v3692_v6 }
 0x16b   :  { %v1279_v7 = vpop.permute.xlu1 %1278 }
 0x16d   :  { %v1277_v2 = vpop.permute.xlu0 %1276 }
 0x16f   :  { %v1283_v38 = vpop.permute.xlu1 %1282 }
 0x171   :  { %v1281_v55 = vpop.permute.xlu0 %1280 }
 0x173   :  { %v1287_v35 = vpop.permute.xlu1 %1286 }
 0x175   :  { %v1285_v60 = vpop.permute.xlu0 %1284 }
 0x177   :  { %v3694_v32 = vpop.permute.xlu1 %1290 }
 0x179   :  { %v3696_v45 = vpop.permute.xlu0 %1288 }
 0x17b   :  { %v3698_v11 = vpop.permute.xlu1 %1294 }
 0x17d   :  { %v3700_v10 = vpop.permute.xlu0 %1292 }
 0x17f   :  { %v3702_v42 = vpop.permute.xlu1 %1298 }
 0x181   :  { %v3704_v52 = vpop.permute.xlu0 %1296 }
 0x183   :  { %v1319_v51 = vpop.permute.xlu1 %1318 }
 0x184   :  { %v1413_v25 = vsel %vm1122_vm2, %v1271_v18, %v1319_v51 }
 0x185   :  { %v1317_v6 = vpop.permute.xlu0 %1316 }
 0x186   :  { %v1412_v23 = vsel %vm1122_vm2, %v1269_v48, %v1317_v6 }
 0x187   :  { %v1323_v16 = vpop.permute.xlu1 %1322 }
 0x188   :  { %v1415_v37 = vsel %vm1122_vm2, %v1275_v56, %v1323_v16  ;;  %v554_v16 = vmul.f32 %v3009_v31, %v3009_v31 }
 0x189   :  { %v1321_v57 = vpop.permute.xlu0 %1320 }
 0x18b   :  { %v1327_v27 = vpop.permute.xlu1 %1326 }
 0x18d   :  { %v1325_v34 = vpop.permute.xlu0 %1324 }
 0x18f   :  { %v1331_v8 = vpop.permute.xlu1 %1330 }
 0x191   :  { %v1329_v12 = vpop.permute.xlu0 %1328 }
 0x193   :  { %v1335_v1 = vpop.permute.xlu1 %1334 }
 0x195   :  { %v1333_v43 = vpop.permute.xlu0 %1332 }
 0x197   :  { %v1339_v41 = vpop.permute.xlu1 %1338 }
 0x199   :  { %v1337_v62 = vpop.permute.xlu0 %1336 }
 0x19b   :  { %v3706_v49 = vpop.permute.xlu1 %1342 }
 0x19d   :  { %v3708_v50 = vpop.permute.xlu0 %1340 }
 0x19f   :  { %v3710_v30 = vpop.permute.xlu1 %1346 }
 0x1a1   :  { %v3712_v3 = vpop.permute.xlu0 %1344 }
 0x1a3   :  { %v1367_v28 = vpop.permute.xlu1 %1366 }
 0x1a4   :  { %v3716_v17 = vsel %vm1139_vm3, %v1413_v25, %v1367_v28  ;;  %v1414_v28 = vsel %vm1122_vm2, %v1273_v0, %v1321_v57  ;;  %v1419_v0 = vsel %vm1122_vm2, %v1283_v38, %v1331_v8  ;;  %v1418_v25 = vsel %vm1122_vm2, %v1281_v55, %v1329_v12 }
 0x1a5   :  { %v1365_v46 = vpop.permute.xlu0 %1364  ;;  %1478 = vrot.lane.b32.xlu1 %v3716_v17, %s2953_s22  ;;  %v507_v8 = vmul.f32 %v2992_v21, %v2992_v21  ;;  %v1420_v55 = vsel %vm1122_vm2, %v1285_v60, %v1333_v43  ;;  %v589_v60 = vrot.slane %v554_v16, 2  ;;  %v555_v16 = vmul.f32 %v2999_v24, %v2999_v24 }
 0x1a6   :  { %v3722_v19 = vsel %vm1139_vm3, %v1412_v23, %v1365_v46  ;;  %v1417_v46 = vsel %vm1122_vm2, %v1279_v7, %v1327_v27 }
 0x1a7   :  { %1476 = vrot.lane.b32.xlu0 %v3722_v19, %s2953_s22  ;;  %v1371_v59 = vpop.permute.xlu1 %1370  ;;  %v587_v43 = vrot.slane %v507_v8, 2 }
 0x1a8   :  { %v3728_v51 = vsel %vm1139_vm3, %v1415_v37, %v1371_v59  ;;  %v1416_v59 = vsel %vm1122_vm2, %v1277_v2, %v1325_v34  ;;  %v1421_v2 = vsel %vm1122_vm2, %v1287_v35, %v1335_v1  ;;  %v506_v35 = vmul.f32 %v2995_v22, %v2995_v22 }
 0x1a9   :  { %v1369_v18 = vpop.permute.xlu0 %1368  ;;  %1482 = vrot.lane.b32.xlu1 %v3728_v51, %s2953_s22 }
 0x1aa   :  { %v3734_v6 = vsel %vm1139_vm3, %v1414_v28, %v1369_v18  ;;  %v2832_v18 = vld [vmem:[#allocation2 + $0x8] sm:$0xff] }
 0x1ab   :  { %1480 = vrot.lane.b32.xlu0 %v3734_v6, %s2953_s22  ;;  %v1375_v23 = vpop.permute.xlu1 %1374 }
 0x1ac   :  { %v3740_v48 = vsel %vm1139_vm3, %v1417_v46, %v1375_v23  ;;  %v523_v46 = vmul.f32 %v2832_v18, %v2832_v18  ;;  %v1423_v23 = vsel %vm1122_vm2, %v3694_v32, %v1339_v41  ;;  %v511_v18 = vmul.f32 %v3013_v33, %v3013_v33 }
 0x1ad   :  { %v1373_v56 = vpop.permute.xlu0 %1372  ;;  %1486 = vrot.lane.b32.xlu1 %v3740_v48, %s2953_s22 }
 0x1ae   :  { %v3746_v57 = vsel %vm1139_vm3, %v1416_v59, %v1373_v56  ;;  %v539_v41 = vadd.f32 %v523_v46, %v507_v8  ;;  %v556_v46 = vmul.f32 %v3028_v47, %v3028_v47 }
 0x1af   :  { %1484 = vrot.lane.b32.xlu0 %v3746_v57, %s2953_s22  ;;  %v1379_v7 = vpop.permute.xlu1 %1378 }
 0x1b0   :  { %v3752_v37 = vsel %vm1139_vm3, %v1419_v0, %v1379_v7  ;;  %v1422_v0 = vsel %vm1122_vm2, %v3696_v45, %v1337_v62  ;;  %v1425_v62 = vsel %vm1122_vm2, %v3698_v11, %v3706_v49  ;;  %v1424_v11 = vsel %vm1122_vm2, %v3700_v10, %v3708_v50 }
 0x1b1   :  { %v1377_v27 = vpop.permute.xlu0 %1376  ;;  %1490 = vrot.lane.b32.xlu1 %v3752_v37, %s2953_s22  ;;  %v1427_v50 = vsel %vm1122_vm2, %v3702_v42, %v3710_v30  ;;  %v1426_v42 = vsel %vm1122_vm2, %v3704_v52, %v3712_v3 }
 0x1b2   :  { %v3758_v34 = vsel %vm1139_vm3, %v1418_v25, %v1377_v27  ;;  %v2833_v25 = vld [vmem:[#allocation2] sm:$0xff] }
 0x1b3   :  { %1488 = vrot.lane.b32.xlu0 %v3758_v34, %s2953_s22  ;;  %v1383_v38 = vpop.permute.xlu1 %1382  ;;  %v522_v27 = vmul.f32 %v2833_v25, %v2833_v25 }
 0x1b4   :  { %v3768_v12 = vsel %vm1139_vm3, %v1421_v2, %v1383_v38  ;;  %v586_v2 = vrot.slane %v506_v35, 2  ;;  %v509_v38 = vmul.f32 %v2983_v14, %v2983_v14 }
 0x1b5   :  { %v1381_v28 = vpop.permute.xlu0 %1380  ;;  %1494 = vrot.lane.b32.xlu1 %v3768_v12, %s2953_s22 }
 0x1b6   :  { %v3776_v1 = vsel %vm1139_vm3, %v1420_v55, %v1381_v28  ;;  %v590_v55 = vsel %vm329_vm1, %v587_v43, %v589_v60  ;;  %v508_v28 = vmul.f32 %v2986_v15, %v2986_v15  ;;  %v2834_v60 = vld [vmem:[#allocation2 + $0x18] sm:$0xff] }
 0x1b7   :  { %1492 = vrot.lane.b32.xlu0 %v3776_v1, %s2953_s22  ;;  %v1387_v59 = vpop.permute.xlu1 %1386  ;;  %v3820_v25 = vadd.f32 %v590_v55, %v539_v41  ;;  %v597_v41 = vrot.slane %v511_v18, 2  ;;  %v599_v55 = vrot.slane %v556_v46, 2 }
 0x1b8   :  { %v3783_v56 = vsel %vm1139_vm3, %v1423_v23, %v1387_v59  ;;  %v538_v23 = vadd.f32 %v522_v27, %v506_v35  ;;  %v588_v59 = vsel %vm329_vm1, %v586_v2, %v587_v43  ;;  %v2835_v35 = vld [vmem:[#allocation2 + $0x10] sm:$0xff]  ;;  %v591_v43 = vrot.slane %v508_v28, 2  ;;  %v2836_v2 = vld [vmem:[#allocation2 + $0x28] sm:$0xff] }
 0x1b9   :  { %v1385_v7 = vpop.permute.xlu0 %1384  ;;  %1498 = vrot.lane.b32.xlu1 %v3783_v56, %s2953_s22  ;;  %5760 = vst [vmem:[#allocation112_spill] sm:$0xff] %v3820_v25  ;;  %v524_v27 = vmul.f32 %v2835_v35, %v2835_v35  ;;  %v513_v35 = vmul.f32 %v3044_v61, %v3044_v61  ;;  %v600_v61 = vsel %vm329_vm1, %v597_v41, %v599_v55 }
 0x1ba   :  { %v3790_v32 = vsel %vm1139_vm3, %v1422_v0, %v1385_v7  ;;  %v525_v0 = vmul.f32 %v2834_v60, %v2834_v60  ;;  %v527_v60 = vmul.f32 %v2836_v2, %v2836_v2 }
 0x1bb   :  { %1496 = vrot.lane.b32.xlu0 %v3790_v32, %s2953_s22  ;;  %v1391_v45 = vpop.permute.xlu1 %1390  ;;  %v540_v3 = vadd.f32 %v524_v27, %v508_v28 }
 0x1bc   :  { %v3805_v8 = vsel %vm1139_vm3, %v1425_v62, %v1391_v45  ;;  %v592_v62 = vrot.slane %v509_v38, 2  ;;  %v594_v45 = vrot.slane %v555_v16, 2  ;;  %v510_v16 = vmul.f32 %v3036_v54, %v3036_v54 }
 0x1bd   :  { %v1389_v49 = vpop.permute.xlu0 %1388  ;;  %1502 = vrot.lane.b32.xlu1 %v3805_v8, %s2953_s22 }
 0x1be   :  { %v3818_v7 = vsel %vm1139_vm3, %v1424_v11, %v1389_v49  ;;  %v541_v49 = vadd.f32 %v525_v0, %v509_v38  ;;  %v595_v2 = vsel %vm329_vm1, %v592_v62, %v594_v45  ;;  %v593_v52 = vsel %vm329_vm1, %v591_v43, %v592_v62  ;;  %v2837_v0 = vld [vmem:[#allocation2 + $0x20] sm:$0xff] }
 0x1bf   :  { %1500 = vrot.lane.b32.xlu0 %v3818_v7, %s2953_s22  ;;  %v1395_v10 = vpop.permute.xlu1 %1394  ;;  %v543_v38 = vadd.f32 %v527_v60, %v511_v18  ;;  %v526_v47 = vmul.f32 %v2837_v0, %v2837_v0  ;;  %v596_v24 = vrot.slane %v510_v16, 2  ;;  %v602_v45 = vrot.slane %v513_v35, 2  ;;  %v2839_v60 = vld [vmem:[#allocation2 + $0x30] sm:$0xff]  ;;  %v2840_v0 = vld [vmem:[#allocation2 + $0x48] sm:$0xff] }
 0x1c0   :  { %v3828_v11 = vsel %vm1139_vm3, %v1427_v50, %v1395_v10  ;;  %v557_v50 = vmul.f32 %v3049_v63, %v3049_v63  ;;  %v3844_v10 = vadd.f32 %v588_v59, %v538_v23  ;;  %v2838_v63 = vld [vmem:[#allocation2 + $0x38] sm:$0xff]  ;;  %v512_v23 = vmul.f32 %v3058_v4, %v3058_v4 }
 0x1c1   :  { %v1393_v30 = vpop.permute.xlu0 %1392  ;;  %1506 = vrot.lane.b32.xlu1 %v3828_v11, %s2953_s22  ;;  %v529_v33 = vmul.f32 %v2838_v63, %v2838_v63  ;;  %v3855_v59 = vadd.f32 %v595_v2, %v541_v49  ;;  %v515_v18 = vmul.f32 %v3061_v5, %v3061_v5  ;;  %v558_v62 = vmul.f32 %v3076_v20, %v3076_v20 }
 0x1c2   :  { %v3842_v46 = vsel %vm1139_vm3, %v1426_v42, %v1393_v30  ;;  %5761 = vst [vmem:[#allocation113_spill] sm:$0xff] %v3844_v10  ;;  %v604_v28 = vrot.slane %v557_v50, 2  ;;  %v3863_v63 = vadd.f32 %v593_v52, %v540_v3  ;;  %v3865_v27 = vadd.f32 %v600_v61, %v543_v38 }
 0x1c3   :  { %1504 = vrot.lane.b32.xlu0 %v3842_v46, %s2953_s22  ;;  %5762 = vst [vmem:[#allocation114_spill] sm:$0xff] %v3855_v59  ;;  %v542_v43 = vadd.f32 %v526_v47, %v510_v16  ;;  %v528_v55 = vmul.f32 %v2839_v60, %v2839_v60  ;;  %v598_v42 = vsel %vm329_vm1, %v596_v24, %v597_v41  ;;  %v601_v49 = vrot.slane %v512_v23, 2 }
 0x1c4   :  { %5763 = vst [vmem:[#allocation115_spill] sm:$0xff] %v3863_v63  ;;  %5764 = vst [vmem:[#allocation116_spill] sm:$0xff] %v3865_v27  ;;  %v545_v30 = vadd.f32 %v529_v33, %v513_v35  ;;  %v514_v50 = vmul.f32 %v3084_v29, %v3084_v29  ;;  %v605_v2 = vsel %vm329_vm1, %v602_v45, %v604_v28  ;;  %v607_v16 = vrot.slane %v515_v18, 2  ;;  %v2841_v35 = vld [vmem:[#allocation2 + $0x40] sm:$0xff] }
 0x1c5   :  { %1558 = vrot.lane.b32.xlu1 %v3820_v25, %s2950_s0  ;;  %v531_v3 = vmul.f32 %v2840_v0, %v2840_v0  ;;  %v517_v61 = vmul.f32 %v3092_v39, %v3092_v39  ;;  %v559_v47 = vmul.f32 %v3098_v44, %v3098_v44  ;;  %v609_v24 = vrot.slane %v558_v62, 2  ;;  %v2842_v44 = vld [vmem:[#allocation2 + $0x58] sm:$0xff] }
 0x1c6   :  { %v3879_v33 = vadd.f32 %v598_v42, %v542_v43  ;;  %v544_v41 = vadd.f32 %v528_v55, %v512_v23  ;;  %v530_v52 = vmul.f32 %v2841_v35, %v2841_v35  ;;  %v3881_v38 = vadd.f32 %v605_v2, %v545_v30 }
 0x1c7   :  { %1556 = vrot.lane.b32.xlu0 %v3844_v10, %s2950_s0  ;;  %v603_v28 = vsel %vm329_vm1, %v601_v49, %v602_v45  ;;  %v606_v60 = vrot.slane %v514_v50, 2  ;;  %v516_v0 = vmul.f32 %v3108_v53, %v3108_v53  ;;  %v547_v62 = vadd.f32 %v531_v3, %v515_v18  ;;  %v2843_v49 = vld [vmem:[#allocation2 + $0x50] sm:$0xff] }
 0x1c8   :  { %5765 = vst [vmem:[#allocation117_spill] sm:$0xff] %v3879_v33  ;;  %5766 = vst [vmem:[#allocation118_spill] sm:$0xff] %v3881_v38  ;;  %v533_v20 = vmul.f32 %v2842_v44, %v2842_v44  ;;  %v612_v39 = vrot.slane %v517_v61, 2  ;;  %v614_v43 = vrot.slane %v559_v47, 2  ;;  %v610_v23 = vsel %vm329_vm1, %v607_v16, %v609_v24 }
 0x1c9   :  { %1562 = vrot.lane.b32.xlu1 %v3855_v59, %s2950_s0  ;;  %v519_v55 = vmul.f32 %v3113_v58, %v3113_v58  ;;  %v560_v45 = vmul.f32 %v3124_v9, %v3124_v9  ;;  %v3895_v42 = vadd.f32 %v603_v28, %v544_v41  ;;  %v546_v30 = vadd.f32 %v530_v52, %v514_v50  ;;  %v2844_v9 = vld [vmem:[#allocation2 + $0x68] sm:$0xff] }
 0x1ca   :  { %v532_v18 = vmul.f32 %v2843_v49, %v2843_v49  ;;  %v608_v44 = vsel %vm329_vm1, %v606_v60, %v607_v16  ;;  %v611_v2 = vrot.slane %v516_v0, 2  ;;  %v518_v3 = vmul.f32 %v3132_v13, %v3132_v13  ;;  %v5769_v52 = vld [vmem:[#allocation36_spill] sm:$0xff]  ;;  %v5770_v16 = vld [vmem:[#allocation38_spill] sm:$0xff] }
 0x1cb   :  { %1560 = vrot.lane.b32.xlu0 %v3863_v63, %s2950_s0  ;;  %5767 = vst [vmem:[#allocation119_spill] sm:$0xff] %v3895_v42  ;;  %v3902_v47 = vadd.f32 %v610_v23, %v547_v62  ;;  %v549_v24 = vadd.f32 %v533_v20, %v517_v61  ;;  %v615_v35 = vsel %vm329_vm1, %v612_v39, %v614_v43  ;;  %v617_v28 = vrot.slane %v519_v55, 2  ;;  %v2845_v23 = vld [vmem:[#allocation2 + $0x60] sm:$0xff]  ;;  %v2846_v13 = vld [vmem:[#allocation2 + $0x78] sm:$0xff] }
 0x1cc   :  { %v535_v41 = vmul.f32 %v2844_v9, %v2844_v9  ;;  %v619_v50 = vrot.slane %v560_v45, 2  ;;  %v521_v49 = vmul.f32 %v5769_v52, %v5769_v52  ;;  %v561_v60 = vmul.f32 %v5770_v16, %v5770_v16  ;;  %v5772_v9 = vld [vmem:[#allocation40_spill] sm:$0xff] }
 0x1cd   :  { %1566 = vrot.lane.b32.xlu1 %v3865_v27, %s2950_s0  ;;  %5768 = vst [vmem:[#allocation120_spill] sm:$0xff] %v3902_v47  ;;  %v3911_v58 = vadd.f32 %v608_v44, %v546_v30  ;;  %v548_v62 = vadd.f32 %v532_v18, %v516_v0  ;;  %v534_v20 = vmul.f32 %v2845_v23, %v2845_v23  ;;  %v616_v43 = vrot.slane %v518_v3, 2 }
 0x1ce   :  { %v613_v61 = vsel %vm329_vm1, %v611_v2, %v612_v39  ;;  %v520_v45 = vmul.f32 %v5772_v9, %v5772_v9  ;;  %v3918_v52 = vadd.f32 %v615_v35, %v549_v24  ;;  %v551_v16 = vadd.f32 %v535_v41, %v519_v55  ;;  %v2847_v2 = vld [vmem:[#allocation2 + $0x70] sm:$0xff] }
 0x1cf   :  { %1564 = vrot.lane.b32.xlu0 %v3879_v33, %s2950_s0  ;;  %5771 = vst [vmem:[#allocation121_spill] sm:$0xff] %v3911_v58  ;;  %v537_v53 = vmul.f32 %v2846_v13, %v2846_v13  ;;  %v620_v30 = vsel %vm329_vm1, %v617_v28, %v619_v50  ;;  %v622_v44 = vrot.slane %v521_v49, 2  ;;  %v624_v0 = vrot.slane %v561_v60, 2 }
 0x1d0   :  { %5773 = vst [vmem:[#allocation122_spill] sm:$0xff] %v3918_v52  ;;  %v3923_v39 = vadd.f32 %v613_v61, %v548_v62  ;;  %v550_v18 = vadd.f32 %v534_v20, %v518_v3  ;;  %v536_v23 = vmul.f32 %v2847_v2, %v2847_v2  ;;  %v618_v9 = vsel %vm329_vm1, %v616_v43, %v617_v28  ;;  %v5781_v62 = vld [vmem:[#allocation49_spill] sm:$0xff] }
 0x1d1   :  { %1570 = vrot.lane.b32.xlu1 %v3881_v38, %s2950_s0  ;;  %v621_v5 = vrot.slane %v520_v45, 2  ;;  %v3928_v55 = vadd.f32 %v620_v30, %v551_v16  ;;  %v553_v13 = vadd.f32 %v537_v53, %v521_v49  ;;  %v625_v24 = vsel %vm329_vm1, %v622_v44, %v624_v0  ;;  %v5780_v49 = vld [vmem:[#allocation14_spill] sm:$0xff]  ;;  %v5782_v43 = vld [vmem:[#allocation97_spill] sm:$0xff] }
 0x1d2   :  { %5774 = vst [vmem:[#allocation123_spill] sm:$0xff] %v3923_v39  ;;  %v3933_v35 = vadd.f32 %v618_v9, %v550_v18  ;;  %v552_v41 = vadd.f32 %v536_v23, %v520_v45  ;;  %v1156_v16 = vadd.f32 %v3322_v36, %v5780_v49  ;;  %v1445_v20 = vadd.f32 %v3716_v17, %v5781_v62  ;;  %v5783_v45 = vld [vmem:[#allocation50_spill] sm:$0xff]  ;;  %v5785_v0 = vld [vmem:[#allocation53_spill] sm:$0xff] }
 0x1d3   :  { %1568 = vrot.lane.b32.xlu0 %v3895_v42, %s2950_s0  ;;  %5775 = vst [vmem:[#allocation124_spill] sm:$0xff] %v3928_v55  ;;  %v623_v3 = vsel %vm329_vm1, %v621_v5, %v622_v44  ;;  %v3938_v28 = vadd.f32 %v625_v24, %v553_v13  ;;  %v5779_v5 = vld [vmem:[#allocation17_spill] sm:$0xff]  ;;  %v5784_v44 = vld [vmem:[#allocation15_spill] sm:$0xff]  ;;  %v5787_v13 = vld [vmem:[#allocation12_spill] sm:$0xff] }
 0x1d4   :  { %5776 = vst [vmem:[#allocation125_spill] sm:$0xff] %v3933_v35  ;;  %v3942_v50 = vadd.f32 %v623_v3, %v552_v41  ;;  %v1157_v53 = vadd.f32 %v3316_v40, %v5779_v5  ;;  %v1236_v9 = vadd.f32 %v5782_v43, %v1156_v16  ;;  %v1444_v40 = vadd.f32 %v3722_v19, %v5783_v45  ;;  %v5788_v24 = vld [vmem:[#allocation54_spill] sm:$0xff]  ;;  %v5789_v3 = vld [vmem:[#allocation19_spill] sm:$0xff] }
 0x1d5   :  { %1574 = vrot.lane.b32.xlu1 %v3902_v47, %s2950_s0  ;;  %5777 = vst [vmem:[#allocation126_spill] sm:$0xff] %v3938_v28  ;;  %v1159_v18 = vadd.f32 %v5785_v0, %v5784_v44  ;;  %v1158_v41 = vadd.f32 %v5788_v24, %v5787_v13  ;;  %v5790_v5 = vld [vmem:[#allocation55_spill] sm:$0xff]  ;;  %v5791_v19 = vld [vmem:[#allocation98_spill] sm:$0xff]  ;;  %v5798_v13 = vld [vmem:[#allocation52_spill] sm:$0xff] }
 0x1d6   :  { %5778 = vst [vmem:[#allocation127_spill] sm:$0xff] %v3942_v50  ;;  %v1237_v60 = vadd.f32 %v3658_v26, %v1157_v53  ;;  %v1161_v53 = vadd.f32 %v5790_v5, %v5789_v3  ;;  %v5792_v16 = vld [vmem:[#allocation51_spill] sm:$0xff]  ;;  %v5800_v5 = vld [vmem:[#allocation57_spill] sm:$0xff] }
 0x1d7   :  { %1572 = vrot.lane.b32.xlu0 %v3911_v58, %s2950_s0  ;;  %v1239_v49 = vadd.f32 %v5791_v19, %v1159_v18  ;;  %v1447_v62 = vadd.f32 %v3728_v51, %v5792_v16  ;;  %v5797_v0 = vld [vmem:[#allocation99_spill] sm:$0xff]  ;;  %v1446_v18 = vadd.f32 %v3734_v6, %v5798_v13  ;;  %v5802_v19 = vld [vmem:[#allocation70_spill] sm:$0xff] }
 0x1d8   :  { %v2437_v36 = vmul.f32 %v1237_v60, %v1237_v60  ;;  %v5799_v3 = vld [vmem:[#allocation23_spill] sm:$0xff] }
 0x1d9   :  { %1578 = vrot.lane.b32.xlu1 %v3918_v52, %s2950_s0 }
 0x1db   :  { %1576 = vrot.lane.b32.xlu0 %v3923_v39, %s2950_s0 }
 0x1dd   :  { %1582 = vrot.lane.b32.xlu1 %v3928_v55, %s2950_s0 }
 0x1df   :  { %1580 = vrot.lane.b32.xlu0 %v3933_v35, %s2950_s0 }
 0x1e1   :  { %1586 = vrot.lane.b32.xlu1 %v3938_v28, %s2950_s0 }
 0x1e3   :  { %1584 = vrot.lane.b32.xlu0 %v3942_v50, %s2950_s0 }
 0x1e5   :  { %1606 = vrot.lane.b32.xlu1 %v3820_v25, %s2951_s1 }
 0x1e7   :  { %1604 = vrot.lane.b32.xlu0 %v3844_v10, %s2951_s1 }
 0x1e9   :  { %1610 = vrot.lane.b32.xlu1 %v3855_v59, %s2951_s1 }
 0x1eb   :  { %1608 = vrot.lane.b32.xlu0 %v3863_v63, %s2951_s1 }
 0x1ed   :  { %1614 = vrot.lane.b32.xlu1 %v3865_v27, %s2951_s1 }
 0x1ef   :  { %1612 = vrot.lane.b32.xlu0 %v3879_v33, %s2951_s1 }
 0x1f1   :  { %1618 = vrot.lane.b32.xlu1 %v3881_v38, %s2951_s1 }
 0x1f3   :  { %1616 = vrot.lane.b32.xlu0 %v3895_v42, %s2951_s1 }
 0x1f5   :  { %1622 = vrot.lane.b32.xlu1 %v3902_v47, %s2951_s1 }
 0x1f7   :  { %1620 = vrot.lane.b32.xlu0 %v3911_v58, %s2951_s1 }
 0x1f9   :  { %1626 = vrot.lane.b32.xlu1 %v3918_v52, %s2951_s1 }
 0x1fb   :  { %1624 = vrot.lane.b32.xlu0 %v3923_v39, %s2951_s1 }
 0x1fd   :  { %1630 = vrot.lane.b32.xlu1 %v3928_v55, %s2951_s1 }
 0x1ff   :  { %1628 = vrot.lane.b32.xlu0 %v3933_v35, %s2951_s1 }
 0x201   :  { %1634 = vrot.lane.b32.xlu1 %v3938_v28, %s2951_s1 }
 0x203   :  { %1632 = vrot.lane.b32.xlu0 %v3942_v50, %s2951_s1 }
 0x205   :  { %1654 = vrot.lane.b32.xlu1 %v3820_v25, %s2952_s21 }
 0x207   :  { %1652 = vrot.lane.b32.xlu0 %v3844_v10, %s2952_s21  ;;  %v5908_v10 = vld [vmem:[#allocation75_spill] sm:$0xff] }
 0x209   :  { %1658 = vrot.lane.b32.xlu1 %v3855_v59, %s2952_s21  ;;  %v4357_v59 = vld [vmem:[#allocation5 + $0x30] sm:$0xff] }
 0x20b   :  { %1656 = vrot.lane.b32.xlu0 %v3863_v63, %s2952_s21 }
 0x20d   :  { %1662 = vrot.lane.b32.xlu1 %v3865_v27, %s2952_s21 }
 0x20f   :  { %1660 = vrot.lane.b32.xlu0 %v3879_v33, %s2952_s21 }
 0x211   :  { %1666 = vrot.lane.b32.xlu1 %v3881_v38, %s2952_s21 }
 0x213   :  { %1664 = vrot.lane.b32.xlu0 %v3895_v42, %s2952_s21 }
 0x215   :  { %1670 = vrot.lane.b32.xlu1 %v3902_v47, %s2952_s21 }
 0x217   :  { %1668 = vrot.lane.b32.xlu0 %v3911_v58, %s2952_s21  ;;  %v1479_v61 = vpop.permute.xlu1 %1478  ;;  %v5889_v58 = vld [vmem:[#allocation48_spill] sm:$0xff] }
 0x218   :  { %v1525_v30 = vadd.f32 %v1479_v61, %v1445_v20  ;;  %v2436_v61 = vmul.f32 %v1236_v9, %v1236_v9 }
 0x219   :  { %v1477_v2 = vpop.permute.xlu0 %1476  ;;  %1674 = vrot.lane.b32.xlu1 %v3918_v52, %s2952_s21 }
 0x21a   :  { %v4014_v26 = vmul.f32 %v1525_v30, %v1237_v60  ;;  %v2453_v17 = vmul.f32 %v1525_v30, %v1525_v30  ;;  %v1524_v23 = vadd.f32 %v1477_v2, %v1444_v40  ;;  %v5795_v40 = vld [vmem:[#allocation22_spill] sm:$0xff]  ;;  %v5796_v30 = vld [vmem:[#allocation56_spill] sm:$0xff]  ;;  %v1238_v2 = vadd.f32 %v5797_v0, %v1158_v41 }
 0x21b   :  { %1672 = vrot.lane.b32.xlu0 %v3923_v39, %s2952_s21  ;;  %v1483_v20 = vpop.permute.xlu1 %1482  ;;  %v1160_v44 = vadd.f32 %v5796_v30, %v5795_v40  ;;  %v2439_v40 = vmul.f32 %v1239_v49, %v1239_v49  ;;  %v5806_v0 = vld [vmem:[#allocation60_spill] sm:$0xff] }
 0x21c   :  { %5786 = vst [vmem:[#allocation17_spill] sm:$0xff] %v4014_v26  ;;  %v4025_v60 = vadd.f32 %v2453_v17, %v2437_v36  ;;  %v4027_v43 = vmul.f32 %v1524_v23, %v1236_v9  ;;  %v2452_v45 = vmul.f32 %v1524_v23, %v1524_v23  ;;  %v1527_v24 = vadd.f32 %v1483_v20, %v1447_v62  ;;  %v5801_v17 = vld [vmem:[#allocation100_spill] sm:$0xff]  ;;  %v5805_v20 = vld [vmem:[#allocation25_spill] sm:$0xff] }
 0x21d   :  { %v1481_v51 = vpop.permute.xlu0 %1480  ;;  %1678 = vrot.lane.b32.xlu1 %v3928_v55, %s2952_s21  ;;  %v1163_v36 = vadd.f32 %v5800_v5, %v5799_v3  ;;  %v1241_v9 = vadd.f32 %v5801_v17, %v1161_v53  ;;  %v1449_v23 = vadd.f32 %v3740_v48, %v5802_v19  ;;  %v1162_v13 = vadd.f32 %v5806_v0, %v5805_v20  ;;  %v5807_v3 = vld [vmem:[#allocation101_spill] sm:$0xff] }
 0x21e   :  { %5793 = vst [vmem:[#allocation14_spill] sm:$0xff] %v4025_v60  ;;  %5794 = vst [vmem:[#allocation49_spill] sm:$0xff] %v4027_v43  ;;  %v4041_v16 = vadd.f32 %v2452_v45, %v2436_v61  ;;  %v4043_v41 = vmul.f32 %v1527_v24, %v1239_v49  ;;  %v2455_v30 = vmul.f32 %v1527_v24, %v1527_v24  ;;  %v5808_v53 = vld [vmem:[#allocation77_spill] sm:$0xff]  ;;  %v5825_v43 = vld [vmem:[#allocation104_spill] sm:$0xff] }
 0x21f   :  { %v1526_v6 = vadd.f32 %v1481_v51, %v1446_v18  ;;  %1676 = vrot.lane.b32.xlu0 %v3933_v35, %s2952_s21  ;;  %v1487_v62 = vpop.permute.xlu1 %1486  ;;  %v1240_v5 = vadd.f32 %v5807_v3, %v1160_v44  ;;  %v1448_v17 = vadd.f32 %v3746_v57, %v5808_v53  ;;  %v2438_v61 = vmul.f32 %v1238_v2, %v1238_v2  ;;  %v5812_v44 = vld [vmem:[#allocation27_spill] sm:$0xff]  ;;  %v5813_v3 = vld [vmem:[#allocation62_spill] sm:$0xff] }
 0x220   :  { %5803 = vst [vmem:[#allocation97_spill] sm:$0xff] %v4041_v16  ;;  %5804 = vst [vmem:[#allocation50_spill] sm:$0xff] %v4043_v41  ;;  %v1529_v48 = vadd.f32 %v1487_v62, %v1449_v23  ;;  %v4052_v45 = vadd.f32 %v2455_v30, %v2439_v40  ;;  %v2441_v51 = vmul.f32 %v1241_v9, %v1241_v9  ;;  %v5814_v57 = vld [vmem:[#allocation102_spill] sm:$0xff]  ;;  %v5815_v62 = vld [vmem:[#allocation80_spill] sm:$0xff] }
 0x221   :  { %v4054_v49 = vmul.f32 %v1526_v6, %v1238_v2  ;;  %v2454_v24 = vmul.f32 %v1526_v6, %v1526_v6  ;;  %v1485_v18 = vpop.permute.xlu0 %1484  ;;  %1682 = vrot.lane.b32.xlu1 %v3938_v28, %s2952_s21  ;;  %v1165_v41 = vadd.f32 %v5813_v3, %v5812_v44  ;;  %v1243_v23 = vadd.f32 %v5814_v57, %v1163_v36  ;;  %v5821_v3 = vld [vmem:[#allocation103_spill] sm:$0xff]  ;;  %v5822_v57 = vld [vmem:[#allocation81_spill] sm:$0xff]  ;;  %v5914_v16 = vld [vmem:[#allocation82_spill] sm:$0xff] }
 0x222   :  { %5809 = vst [vmem:[#allocation15_spill] sm:$0xff] %v4052_v45  ;;  %v4058_v19 = vmul.f32 %v1529_v48, %v1241_v9  ;;  %v2457_v20 = vmul.f32 %v1529_v48, %v1529_v48  ;;  %v1528_v0 = vadd.f32 %v1485_v18, %v1448_v17  ;;  %v1451_v40 = vadd.f32 %v3752_v37, %v5815_v62  ;;  %v5819_v48 = vld [vmem:[#allocation29_spill] sm:$0xff]  ;;  %v5820_v18 = vld [vmem:[#allocation63_spill] sm:$0xff]  ;;  %v5823_v62 = vld [vmem:[#allocation32_spill] sm:$0xff] }
 0x223   :  { %5810 = vst [vmem:[#allocation53_spill] sm:$0xff] %v4054_v49  ;;  %v4065_v2 = vadd.f32 %v2454_v24, %v2438_v61  ;;  %1680 = vrot.lane.b32.xlu0 %v3942_v50, %s2952_s21  ;;  %v1491_v30 = vpop.permute.xlu1 %1490  ;;  %v2440_v6 = vmul.f32 %v1240_v5, %v1240_v5  ;;  %v1164_v44 = vadd.f32 %v5820_v18, %v5819_v48  ;;  %v5832_v50 = vld [vmem:[#allocation87_spill] sm:$0xff] }
 0x224   :  { %5811 = vst [vmem:[#allocation12_spill] sm:$0xff] %v4058_v19  ;;  %v4069_v53 = vadd.f32 %v2457_v20, %v2441_v51  ;;  %v4071_v9 = vmul.f32 %v1528_v0, %v1240_v5  ;;  %v2456_v17 = vmul.f32 %v1528_v0, %v1528_v0  ;;  %v1242_v36 = vadd.f32 %v5821_v3, %v1162_v13  ;;  %v5824_v19 = vld [vmem:[#allocation64_spill] sm:$0xff]  ;;  %v5826_v51 = vld [vmem:[#allocation85_spill] sm:$0xff]  ;;  %v5829_v3 = vld [vmem:[#allocation34_spill] sm:$0xff] }
 0x225   :  { %5816 = vst [vmem:[#allocation54_spill] sm:$0xff] %v4065_v2  ;;  %v1450_v37 = vadd.f32 %v3758_v34, %v5822_v57  ;;  %v1531_v61 = vadd.f32 %v1491_v30, %v1451_v40  ;;  %v1489_v24 = vpop.permute.xlu0 %1488  ;;  %v1167_v49 = vadd.f32 %v5824_v19, %v5823_v62  ;;  %v1245_v26 = vadd.f32 %v5825_v43, %v1165_v41  ;;  %v5830_v34 = vld [vmem:[#allocation68_spill] sm:$0xff]  ;;  %v5831_v30 = vld [vmem:[#allocation105_spill] sm:$0xff] }
 0x226   :  { %5817 = vst [vmem:[#allocation19_spill] sm:$0xff] %v4069_v53  ;;  %5818 = vst [vmem:[#allocation55_spill] sm:$0xff] %v4071_v9  ;;  %v1453_v5 = vadd.f32 %v3768_v12, %v5826_v51  ;;  %v4083_v20 = vadd.f32 %v2456_v17, %v2440_v6  ;;  %v2443_v0 = vmul.f32 %v1243_v23, %v1243_v23  ;;  %v5836_v51 = vld [vmem:[#allocation37_spill] sm:$0xff] }
 0x227   :  { %v4085_v9 = vmul.f32 %v1531_v61, %v1243_v23  ;;  %v2459_v48 = vmul.f32 %v1531_v61, %v1531_v61  ;;  %v1530_v13 = vadd.f32 %v1489_v24, %v1450_v37  ;;  %v1495_v18 = vpop.permute.xlu1 %1494  ;;  %v1166_v40 = vadd.f32 %v5830_v34, %v5829_v3  ;;  %v5837_v3 = vld [vmem:[#allocation69_spill] sm:$0xff] }
 0x228   :  { %5827 = vst [vmem:[#allocation98_spill] sm:$0xff] %v4083_v20  ;;  %v1244_v57 = vadd.f32 %v5831_v30, %v1164_v44  ;;  %v1452_v19 = vadd.f32 %v3776_v1, %v5832_v50  ;;  %v1533_v43 = vadd.f32 %v1495_v18, %v1453_v5  ;;  %v2442_v41 = vmul.f32 %v1242_v36, %v1242_v36  ;;  %v5838_v44 = vld [vmem:[#allocation106_spill] sm:$0xff] }
 0x229   :  { %5828 = vst [vmem:[#allocation51_spill] sm:$0xff] %v4085_v9  ;;  %v4092_v62 = vadd.f32 %v2459_v48, %v2443_v0  ;;  %v4094_v12 = vmul.f32 %v1530_v13, %v1242_v36  ;;  %v2458_v6 = vmul.f32 %v1530_v13, %v1530_v13  ;;  %v1493_v23 = vpop.permute.xlu0 %1492  ;;  %v2445_v17 = vmul.f32 %v1245_v26, %v1245_v26  ;;  %v5839_v9 = vld [vmem:[#allocation90_spill] sm:$0xff]  ;;  %v5843_v13 = vld [vmem:[#allocation107_spill] sm:$0xff] }
 0x22a   :  { %v4096_v61 = vmul.f32 %v1533_v43, %v1245_v26  ;;  %v2461_v37 = vmul.f32 %v1533_v43, %v1533_v43  ;;  %v1532_v24 = vadd.f32 %v1493_v23, %v1452_v19  ;;  %v1169_v34 = vadd.f32 %v5837_v3, %v5836_v51  ;;  %v5844_v19 = vld [vmem:[#allocation92_spill] sm:$0xff]  ;;  %v5846_v3 = vld [vmem:[#allocation71_spill] sm:$0xff] }
 0x22b   :  { %5833 = vst [vmem:[#allocation22_spill] sm:$0xff] %v4092_v62  ;;  %5834 = vst [vmem:[#allocation56_spill] sm:$0xff] %v4094_v12  ;;  %v1247_v30 = vadd.f32 %v5838_v44, %v1167_v49  ;;  %v1455_v1 = vadd.f32 %v3783_v56, %v5839_v9  ;;  %v4103_v50 = vadd.f32 %v2458_v6, %v2442_v41  ;;  %v1499_v5 = vpop.permute.xlu1 %1498  ;;  %v5845_v49 = vld [vmem:[#allocation39_spill] sm:$0xff]  ;;  %v5847_v56 = vld [vmem:[#allocation108_spill] sm:$0xff] }
 0x22c   :  { %5835 = vst [vmem:[#allocation99_spill] sm:$0xff] %v4096_v61  ;;  %v2444_v36 = vmul.f32 %v1244_v57, %v1244_v57  ;;  %v4105_v0 = vadd.f32 %v2461_v37, %v2445_v17  ;;  %v4107_v48 = vmul.f32 %v1532_v24, %v1244_v57  ;;  %v2460_v26 = vmul.f32 %v1532_v24, %v1532_v24  ;;  %v5848_v41 = vld [vmem:[#allocation93_spill] sm:$0xff]  ;;  %v5854_v61 = vld [vmem:[#allocation94_spill] sm:$0xff] }
 0x22d   :  { %5840 = vst [vmem:[#allocation52_spill] sm:$0xff] %v4103_v50  ;;  %v1246_v18 = vadd.f32 %v5843_v13, %v1166_v40  ;;  %v1454_v43 = vadd.f32 %v3790_v32, %v5844_v19  ;;  %v1535_v23 = vadd.f32 %v1499_v5, %v1455_v1  ;;  %v1497_v51 = vpop.permute.xlu0 %1496  ;;  %v1168_v44 = vadd.f32 %v5846_v3, %v5845_v49  ;;  %v5852_v32 = vld [vmem:[#allocation74_spill] sm:$0xff]  ;;  %v5853_v5 = vld [vmem:[#allocation109_spill] sm:$0xff] }
 0x22e   :  { %5841 = vst [vmem:[#allocation23_spill] sm:$0xff] %v4105_v0  ;;  %5842 = vst [vmem:[#allocation57_spill] sm:$0xff] %v4107_v48  ;;  %v1249_v9 = vadd.f32 %v5847_v56, %v1169_v34  ;;  %v1457_v6 = vadd.f32 %v3805_v8, %v5848_v41  ;;  %v4117_v17 = vadd.f32 %v2460_v26, %v2444_v36  ;;  %v5851_v48 = vld [vmem:[#allocation41_spill] sm:$0xff]  ;;  %v5858_v41 = vld [vmem:[#allocation42_spill] sm:$0xff] }
 0x22f   :  { %v2447_v57 = vmul.f32 %v1247_v30, %v1247_v30  ;;  %v4119_v37 = vmul.f32 %v1535_v23, %v1247_v30  ;;  %v2463_v24 = vmul.f32 %v1535_v23, %v1535_v23  ;;  %v1534_v40 = vadd.f32 %v1497_v51, %v1454_v43  ;;  %v1503_v13 = vpop.permute.xlu1 %1502 }
 0x230   :  { %5849 = vst [vmem:[#allocation100_spill] sm:$0xff] %v4117_v17  ;;  %v1171_v1 = vadd.f32 %v5852_v32, %v5851_v48  ;;  %v1248_v19 = vadd.f32 %v5853_v5, %v1168_v44  ;;  %v1456_v49 = vadd.f32 %v3818_v7, %v5854_v61  ;;  %v1537_v34 = vadd.f32 %v1503_v13, %v1457_v6  ;;  %v5859_v48 = vld [vmem:[#allocation76_spill] sm:$0xff]  ;;  %v5860_v44 = vld [vmem:[#allocation110_spill] sm:$0xff] }
 0x231   :  { %5850 = vst [vmem:[#allocation70_spill] sm:$0xff] %v4119_v37  ;;  %v2446_v3 = vmul.f32 %v1246_v18, %v1246_v18  ;;  %v4126_v56 = vadd.f32 %v2463_v24, %v2447_v57  ;;  %v4128_v8 = vmul.f32 %v1534_v40, %v1246_v18  ;;  %v2462_v36 = vmul.f32 %v1534_v40, %v1534_v40  ;;  %v1501_v30 = vpop.permute.xlu0 %1500  ;;  %v5861_v37 = vld [vmem:[#allocation95_spill] sm:$0xff] }
 0x232   :  { %v2449_v26 = vmul.f32 %v1249_v9, %v1249_v9  ;;  %v4130_v23 = vmul.f32 %v1537_v34, %v1249_v9  ;;  %v2465_v43 = vmul.f32 %v1537_v34, %v1537_v34  ;;  %v1536_v51 = vadd.f32 %v1501_v30, %v1456_v49  ;;  %v5865_v40 = vld [vmem:[#allocation111_spill] sm:$0xff]  ;;  %v5866_v49 = vld [vmem:[#allocation96_spill] sm:$0xff] }
 0x233   :  { %5855 = vst [vmem:[#allocation25_spill] sm:$0xff] %v4126_v56  ;;  %5856 = vst [vmem:[#allocation60_spill] sm:$0xff] %v4128_v8  ;;  %v1170_v32 = vadd.f32 %v5859_v48, %v5858_v41  ;;  %v1251_v5 = vadd.f32 %v5860_v44, %v1171_v1  ;;  %v1459_v7 = vadd.f32 %v3828_v11, %v5861_v37  ;;  %v1507_v6 = vpop.permute.xlu1 %1506 }
 0x234   :  { %5857 = vst [vmem:[#allocation101_spill] sm:$0xff] %v4130_v23  ;;  %v4137_v61 = vadd.f32 %v2462_v36, %v2446_v3  ;;  %v2448_v18 = vmul.f32 %v1248_v19, %v1248_v19  ;;  %v4139_v57 = vadd.f32 %v2465_v43, %v2449_v26  ;;  %v4141_v24 = vmul.f32 %v1536_v51, %v1248_v19 }
 0x235   :  { %v2464_v9 = vmul.f32 %v1536_v51, %v1536_v51  ;;  %v1250_v13 = vadd.f32 %v5865_v40, %v1170_v32  ;;  %v1458_v34 = vadd.f32 %v3842_v46, %v5866_v49  ;;  %v1539_v30 = vadd.f32 %v1507_v6, %v1459_v7  ;;  %v1505_v41 = vpop.permute.xlu0 %1504 }
 0x236   :  { %5862 = vst [vmem:[#allocation77_spill] sm:$0xff] %v4137_v61  ;;  %5863 = vst [vmem:[#allocation27_spill] sm:$0xff] %v4139_v57  ;;  %v2451_v48 = vmul.f32 %v1251_v5, %v1251_v5  ;;  %v668_v60 = vmul.f32 %v5914_v16, %v5914_v16 }
 0x237   :  { %5864 = vst [vmem:[#allocation62_spill] sm:$0xff] %v4141_v24  ;;  %v4146_v1 = vadd.f32 %v2464_v9, %v2448_v18  ;;  %v4148_v11 = vmul.f32 %v1539_v30, %v1251_v5  ;;  %v2467_v37 = vmul.f32 %v1539_v30, %v1539_v30  ;;  %v1538_v3 = vadd.f32 %v1505_v41, %v1458_v34  ;;  %v1559_v36 = vpop.permute.xlu1 %1558 }
 0x238   :  { %v2450_v26 = vmul.f32 %v1250_v13, %v1250_v13 }
 0x239   :  { %5867 = vst [vmem:[#allocation102_spill] sm:$0xff] %v4146_v1  ;;  %5868 = vst [vmem:[#allocation80_spill] sm:$0xff] %v4148_v11  ;;  %v4150_v43 = vadd.f32 %v2467_v37, %v2451_v48  ;;  %v4152_v19 = vmul.f32 %v1538_v3, %v1250_v13  ;;  %v2466_v51 = vmul.f32 %v1538_v3, %v1538_v3  ;;  %v1557_v32 = vpop.permute.xlu0 %1556 }
 0x23b   :  { %5869 = vst [vmem:[#allocation29_spill] sm:$0xff] %v4150_v43  ;;  %5870 = vst [vmem:[#allocation63_spill] sm:$0xff] %v4152_v19  ;;  %v4154_v44 = vadd.f32 %v2466_v51, %v2450_v26  ;;  %v1563_v46 = vpop.permute.xlu1 %1562 }
 0x23d   :  { %5871 = vst [vmem:[#allocation103_spill] sm:$0xff] %v4154_v44  ;;  %v1561_v7 = vpop.permute.xlu0 %1560 }
 0x23f   :  { %v1567_v6 = vpop.permute.xlu1 %1566 }
 0x241   :  { %v1565_v18 = vpop.permute.xlu0 %1564 }
 0x243   :  { %v1571_v9 = vpop.permute.xlu1 %1570 }
 0x245   :  { %v1569_v40 = vpop.permute.xlu0 %1568 }
 0x247   :  { %v1575_v5 = vpop.permute.xlu1 %1574 }
 0x249   :  { %v1573_v49 = vpop.permute.xlu0 %1572 }
 0x24b   :  { %v4156_v30 = vpop.permute.xlu1 %1578 }
 0x24d   :  { %v4158_v34 = vpop.permute.xlu0 %1576 }
 0x24f   :  { %v4160_v41 = vpop.permute.xlu1 %1582 }
 0x251   :  { %v4162_v13 = vpop.permute.xlu0 %1580 }
 0x253   :  { %v4164_v48 = vpop.permute.xlu1 %1586 }
 0x255   :  { %v4166_v37 = vpop.permute.xlu0 %1584 }
 0x257   :  { %v1607_v3 = vpop.permute.xlu1 %1606 }
 0x258   :  { %v1701_v55 = vsel %vm1122_vm2, %v1559_v36, %v1607_v3 }
 0x259   :  { %v1605_v26 = vpop.permute.xlu0 %1604 }
 0x25a   :  { %v1700_v17 = vsel %vm1122_vm2, %v1557_v32, %v1605_v26 }
 0x25b   :  { %v1611_v51 = vpop.permute.xlu1 %1610 }
 0x25c   :  { %v1703_v39 = vsel %vm1122_vm2, %v1563_v46, %v1611_v51 }
 0x25d   :  { %v1609_v11 = vpop.permute.xlu0 %1608 }
 0x25f   :  { %v1615_v19 = vpop.permute.xlu1 %1614 }
 0x261   :  { %v1613_v24 = vpop.permute.xlu0 %1612 }
 0x263   :  { %v1619_v23 = vpop.permute.xlu1 %1618 }
 0x265   :  { %v1617_v8 = vpop.permute.xlu0 %1616 }
 0x266   :  { %v1706_v3 = vsel %vm1122_vm2, %v1569_v40, %v1617_v8 }
 0x267   :  { %v1623_v12 = vpop.permute.xlu1 %1622 }
 0x269   :  { %v1621_v44 = vpop.permute.xlu0 %1620 }
 0x26a   :  { %v1708_v40 = vsel %vm1122_vm2, %v1573_v49, %v1621_v44 }
 0x26b   :  { %v1627_v43 = vpop.permute.xlu1 %1626 }
 0x26d   :  { %v1625_v1 = vpop.permute.xlu0 %1624 }
 0x26f   :  { %v4168_v57 = vpop.permute.xlu1 %1630 }
 0x271   :  { %v4170_v56 = vpop.permute.xlu0 %1628 }
 0x273   :  { %v4172_v28 = vpop.permute.xlu1 %1634 }
 0x275   :  { %v4174_v35 = vpop.permute.xlu0 %1632 }
 0x277   :  { %v1655_v52 = vpop.permute.xlu1 %1654 }
 0x278   :  { %v4178_v61 = vsel %vm1139_vm3, %v1701_v55, %v1655_v52  ;;  %v1702_v52 = vsel %vm1122_vm2, %v1561_v7, %v1609_v11  ;;  %v1707_v7 = vsel %vm1122_vm2, %v1571_v9, %v1619_v23  ;;  %v5880_v9 = vld [vmem:[#allocation43_spill] sm:$0xff] }
 0x279   :  { %5872 = vst [vmem:[#allocation81_spill] sm:$0xff] %v4178_v61  ;;  %v1653_v0 = vpop.permute.xlu0 %1652  ;;  %1766 = vrot.lane.b32.xlu1 %v4178_v61, %s2953_s22  ;;  %v659_v51 = vmul.f32 %v5880_v9, %v5880_v9  ;;  %v666_v61 = vmul.f32 %v5908_v10, %v5908_v10 }
 0x27a   :  { %v4184_v50 = vsel %vm1139_vm3, %v1700_v17, %v1653_v0  ;;  %v1705_v0 = vsel %vm1122_vm2, %v1567_v6, %v1615_v19 }
 0x27b   :  { %5873 = vst [vmem:[#allocation32_spill] sm:$0xff] %v4184_v50  ;;  %1764 = vrot.lane.b32.xlu0 %v4184_v50, %s2953_s22  ;;  %v1659_v62 = vpop.permute.xlu1 %1658  ;;  %v739_v49 = vrot.slane %v659_v51, 2  ;;  %v758_v45 = vrot.slane %v666_v61, 2 }
 0x27c   :  { %v4190_v36 = vsel %vm1139_vm3, %v1703_v39, %v1659_v62  ;;  %v1704_v39 = vsel %vm1122_vm2, %v1565_v18, %v1613_v24  ;;  %v1709_v18 = vsel %vm1122_vm2, %v1575_v5, %v1623_v12  ;;  %v5883_v12 = vld [vmem:[#allocation45_spill] sm:$0xff] }
 0x27d   :  { %5874 = vst [vmem:[#allocation64_spill] sm:$0xff] %v4190_v36  ;;  %v1657_v55 = vpop.permute.xlu0 %1656  ;;  %1770 = vrot.lane.b32.xlu1 %v4190_v36, %s2953_s22  ;;  %v658_v5 = vmul.f32 %v5883_v12, %v5883_v12 }
 0x27e   :  { %v4196_v32 = vsel %vm1139_vm3, %v1702_v52, %v1657_v55  ;;  %v5881_v52 = vld [vmem:[#allocation44_spill] sm:$0xff] }
 0x27f   :  { %5875 = vst [vmem:[#allocation104_spill] sm:$0xff] %v4196_v32  ;;  %1768 = vrot.lane.b32.xlu0 %v4196_v32, %s2953_s22  ;;  %v1663_v17 = vpop.permute.xlu1 %1662  ;;  %v706_v55 = vmul.f32 %v5881_v52, %v5881_v52 }
 0x280   :  { %v4202_v46 = vsel %vm1139_vm3, %v1705_v0, %v1663_v17 }
 0x281   :  { %5876 = vst [vmem:[#allocation85_spill] sm:$0xff] %v4202_v46  ;;  %v1661_v62 = vpop.permute.xlu0 %1660  ;;  %1774 = vrot.lane.b32.xlu1 %v4202_v46, %s2953_s22  ;;  %v5898_v46 = vld [vmem:[#allocation66_spill] sm:$0xff] }
 0x282   :  { %v4208_v11 = vsel %vm1139_vm3, %v1704_v39, %v1661_v62  ;;  %v4240_v39 = vld [vmem:[#allocation5 + $0x8] sm:$0xff] }
 0x283   :  { %5877 = vst [vmem:[#allocation34_spill] sm:$0xff] %v4208_v11  ;;  %1772 = vrot.lane.b32.xlu0 %v4208_v11, %s2953_s22  ;;  %v1667_v19 = vpop.permute.xlu1 %1666  ;;  %v675_v62 = vmul.f32 %v4240_v39, %v4240_v39  ;;  %v5897_v11 = vld [vmem:[#allocation65_spill] sm:$0xff] }
 0x284   :  { %v4214_v6 = vsel %vm1139_vm3, %v1707_v7, %v1667_v19  ;;  %v1711_v7 = vsel %vm1122_vm2, %v4156_v30, %v1627_v43  ;;  %v741_v19 = vrot.slane %v706_v55, 2  ;;  %v738_v30 = vrot.slane %v658_v5, 2 }
 0x285   :  { %5878 = vst [vmem:[#allocation68_spill] sm:$0xff] %v4214_v6  ;;  %v1665_v26 = vpop.permute.xlu0 %1664  ;;  %1778 = vrot.lane.b32.xlu1 %v4214_v6, %s2953_s22  ;;  %v691_v55 = vadd.f32 %v675_v62, %v659_v51  ;;  %v5891_v62 = vld [vmem:[#allocation58_spill] sm:$0xff]  ;;  %v665_v33 = vmul.f32 %v5897_v11, %v5897_v11 }
 0x286   :  { %v4220_v24 = vsel %vm1139_vm3, %v1706_v3, %v1665_v26  ;;  %v1710_v26 = vsel %vm1122_vm2, %v4158_v34, %v1625_v1  ;;  %v1713_v34 = vsel %vm1122_vm2, %v4160_v41, %v4168_v57  ;;  %v1712_v57 = vsel %vm1122_vm2, %v4162_v13, %v4170_v56 }
 0x287   :  { %5879 = vst [vmem:[#allocation105_spill] sm:$0xff] %v4220_v24  ;;  %1776 = vrot.lane.b32.xlu0 %v4220_v24, %s2953_s22  ;;  %v1671_v23 = vpop.permute.xlu1 %1670  ;;  %v4287_v24 = vld [vmem:[#allocation5 + $0x18] sm:$0xff]  ;;  %v1715_v56 = vsel %vm1122_vm2, %v4164_v48, %v4172_v28  ;;  %v5896_v48 = vld [vmem:[#allocation61_spill] sm:$0xff] }
 0x288   :  { %v4230_v8 = vsel %vm1139_vm3, %v1709_v18, %v1671_v23  ;;  %v4255_v23 = vld [vmem:[#allocation5] sm:$0xff] }
 0x289   :  { %5882 = vst [vmem:[#allocation87_spill] sm:$0xff] %v4230_v8  ;;  %v1669_v0 = vpop.permute.xlu0 %1668  ;;  %1782 = vrot.lane.b32.xlu1 %v4230_v8, %s2953_s22  ;;  %v674_v43 = vmul.f32 %v4255_v23, %v4255_v23  ;;  %v5892_v8 = vld [vmem:[#allocation59_spill] sm:$0xff] }
 0x28a   :  { %v4238_v17 = vsel %vm1139_vm3, %v1708_v40, %v1669_v0  ;;  %v5887_v0 = vld [vmem:[#allocation46_spill] sm:$0xff]  ;;  %v708_v47 = vmul.f32 %v5892_v8, %v5892_v8 }
 0x28b   :  { %5884 = vst [vmem:[#allocation37_spill] sm:$0xff] %v4238_v17  ;;  %1780 = vrot.lane.b32.xlu0 %v4238_v17, %s2953_s22  ;;  %v1675_v44 = vpop.permute.xlu1 %1674  ;;  %v742_v17 = vsel %vm329_vm1, %v739_v49, %v741_v19  ;;  %v690_v19 = vadd.f32 %v674_v43, %v658_v5  ;;  %v4301_v5 = vld [vmem:[#allocation5 + $0x10] sm:$0xff] }
 0x28c   :  { %v4249_v3 = vsel %vm1139_vm3, %v1711_v7, %v1675_v44  ;;  %v661_v7 = vmul.f32 %v5887_v0, %v5887_v0  ;;  %v5888_v44 = vld [vmem:[#allocation47_spill] sm:$0xff]  ;;  %v4294_v42 = vadd.f32 %v742_v17, %v691_v55  ;;  %v751_v28 = vrot.slane %v708_v47, 2 }
 0x28d   :  { %5885 = vst [vmem:[#allocation69_spill] sm:$0xff] %v4249_v3  ;;  %v1673_v18 = vpop.permute.xlu0 %1672  ;;  %1786 = vrot.lane.b32.xlu1 %v4249_v3, %s2953_s22  ;;  %v707_v1 = vmul.f32 %v5888_v44, %v5888_v44 }
 0x28e   :  { %v4260_v40 = vsel %vm1139_vm3, %v1710_v26, %v1673_v18  ;;  %v660_v26 = vmul.f32 %v5889_v58, %v5889_v58  ;;  %v663_v18 = vmul.f32 %v5891_v62, %v5891_v62  ;;  %5894 = vst [vmem:[#allocation92_spill] sm:$0xff] %v4294_v42  ;;  %v744_v6 = vrot.slane %v661_v7, 2 }
 0x28f   :  { %5886 = vst [vmem:[#allocation106_spill] sm:$0xff] %v4260_v40  ;;  %1784 = vrot.lane.b32.xlu0 %v4260_v40, %s2953_s22  ;;  %v1679_v3 = vpop.permute.xlu1 %1678  ;;  %v740_v40 = vsel %vm329_vm1, %v738_v30, %v739_v49  ;;  %v746_v38 = vrot.slane %v707_v1, 2  ;;  %v676_v49 = vmul.f32 %v4301_v5, %v4301_v5  ;;  %v4305_v30 = vld [vmem:[#allocation5 + $0x28] sm:$0xff] }
 0x290   :  { %v4275_v51 = vsel %vm1139_vm3, %v1713_v34, %v1679_v3  ;;  %v677_v3 = vmul.f32 %v4287_v24, %v4287_v24  ;;  %v743_v43 = vrot.slane %v660_v26, 2  ;;  %v679_v17 = vmul.f32 %v4305_v30, %v4305_v30 }
 0x291   :  { %5890 = vst [vmem:[#allocation90_spill] sm:$0xff] %v4275_v51  ;;  %v1677_v41 = vpop.permute.xlu0 %1676  ;;  %1790 = vrot.lane.b32.xlu1 %v4275_v51, %s2953_s22  ;;  %v749_v1 = vrot.slane %v663_v18, 2  ;;  %v747_v27 = vsel %vm329_vm1, %v744_v6, %v746_v38 }
 0x292   :  { %v4292_v34 = vsel %vm1139_vm3, %v1712_v57, %v1677_v41  ;;  %v662_v57 = vmul.f32 %v5896_v48, %v5896_v48  ;;  %v1714_v41 = vsel %vm1122_vm2, %v4166_v37, %v4174_v35  ;;  %v693_v51 = vadd.f32 %v677_v3, %v661_v7  ;;  %v4332_v3 = vld [vmem:[#allocation5 + $0x20] sm:$0xff] }
 0x293   :  { %5893 = vst [vmem:[#allocation107_spill] sm:$0xff] %v4292_v34  ;;  %1788 = vrot.lane.b32.xlu0 %v4292_v34, %s2953_s22  ;;  %v1683_v13 = vpop.permute.xlu1 %1682  ;;  %v692_v35 = vadd.f32 %v676_v49, %v660_v26  ;;  %v745_v37 = vsel %vm329_vm1, %v743_v43, %v744_v6  ;;  %v695_v7 = vadd.f32 %v679_v17, %v663_v18  ;;  %v754_v26 = vrot.slane %v665_v33, 2  ;;  %v5904_v49 = vld [vmem:[#allocation72_spill] sm:$0xff]  ;;  %v5905_v17 = vld [vmem:[#allocation73_spill] sm:$0xff] }
 0x294   :  { %v4310_v55 = vsel %vm1139_vm3, %v1715_v56, %v1683_v13  ;;  %v709_v56 = vmul.f32 %v5898_v46, %v5898_v46  ;;  %v4326_v13 = vadd.f32 %v740_v40, %v690_v19  ;;  %v752_v32 = vsel %vm329_vm1, %v749_v1, %v751_v28  ;;  %v5902_v40 = vld [vmem:[#allocation67_spill] sm:$0xff] }
 0x295   :  { %5895 = vst [vmem:[#allocation39_spill] sm:$0xff] %v4310_v55  ;;  %v1681_v34 = vpop.permute.xlu0 %1680  ;;  %1794 = vrot.lane.b32.xlu1 %v4310_v55, %s2953_s22  ;;  %v678_v55 = vmul.f32 %v4332_v3, %v4332_v3  ;;  %v664_v19 = vmul.f32 %v5902_v40, %v5902_v40  ;;  %v4345_v6 = vadd.f32 %v747_v27, %v693_v51 }
 0x296   :  { %v4324_v47 = vsel %vm1139_vm3, %v1714_v41, %v1681_v34  ;;  %5900 = vst [vmem:[#allocation108_spill] sm:$0xff] %v4326_v13  ;;  %v748_v34 = vrot.slane %v662_v57, 2  ;;  %v4337_v41 = vld [vmem:[#allocation5 + $0x38] sm:$0xff]  ;;  %v756_v18 = vrot.slane %v709_v56, 2  ;;  %v667_v43 = vmul.f32 %v5904_v49, %v5904_v49 }
 0x297   :  { %5899 = vst [vmem:[#allocation71_spill] sm:$0xff] %v4324_v47  ;;  %1792 = vrot.lane.b32.xlu0 %v4324_v47, %s2953_s22  ;;  %5901 = vst [vmem:[#allocation93_spill] sm:$0xff] %v4337_v41  ;;  %v681_v38 = vmul.f32 %v4337_v41, %v4337_v41  ;;  %v710_v28 = vmul.f32 %v5905_v17, %v5905_v17  ;;  %v4353_v47 = vadd.f32 %v745_v37, %v692_v35  ;;  %v5920_v17 = vld [vmem:[#allocation86_spill] sm:$0xff] }
 0x298   :  { %5903 = vst [vmem:[#allocation41_spill] sm:$0xff] %v4345_v6  ;;  %v4355_v63 = vadd.f32 %v752_v32, %v695_v7  ;;  %v694_v36 = vadd.f32 %v678_v55, %v662_v57  ;;  %v680_v27 = vmul.f32 %v4357_v59, %v4357_v59  ;;  %v750_v51 = vsel %vm329_vm1, %v748_v34, %v749_v1  ;;  %v4367_v32 = vld [vmem:[#allocation5 + $0x48] sm:$0xff]  ;;  %v5910_v57 = vld [vmem:[#allocation78_spill] sm:$0xff]  ;;  %v5911_v7 = vld [vmem:[#allocation79_spill] sm:$0xff] }
 0x299   :  { %1846 = vrot.lane.b32.xlu1 %v4294_v42, %s2950_s0  ;;  %5906 = vst [vmem:[#allocation74_spill] sm:$0xff] %v4353_v47  ;;  %v697_v56 = vadd.f32 %v681_v38, %v665_v33  ;;  %v753_v50 = vrot.slane %v664_v19, 2  ;;  %v757_v35 = vsel %vm329_vm1, %v754_v26, %v756_v18  ;;  %5909 = vst [vmem:[#allocation94_spill] sm:$0xff] %v4367_v32  ;;  %v759_v1 = vrot.slane %v667_v43, 2  ;;  %v4379_v18 = vld [vmem:[#allocation5 + $0x40] sm:$0xff] }
 0x29a   :  { %5907 = vst [vmem:[#allocation109_spill] sm:$0xff] %v4355_v63  ;;  %v683_v55 = vmul.f32 %v4367_v32, %v4367_v32  ;;  %v669_v37 = vmul.f32 %v5910_v57, %v5910_v57  ;;  %v711_v33 = vmul.f32 %v5911_v7, %v5911_v7  ;;  %v761_v34 = vrot.slane %v710_v28, 2  ;;  %v5924_v57 = vld [vmem:[#allocation89_spill] sm:$0xff] }
 0x29b   :  { %1844 = vrot.lane.b32.xlu0 %v4326_v13, %s2950_s0  ;;  %v4377_v38 = vadd.f32 %v750_v51, %v694_v36  ;;  %v696_v25 = vadd.f32 %v680_v27, %v664_v19  ;;  %v682_v20 = vmul.f32 %v4379_v18, %v4379_v18  ;;  %v4383_v53 = vadd.f32 %v757_v35, %v697_v56  ;;  %v4390_v36 = vld [vmem:[#allocation5 + $0x58] sm:$0xff]  ;;  %v5916_v35 = vld [vmem:[#allocation83_spill] sm:$0xff] }
 0x29c   :  { %v755_v2 = vsel %vm329_vm1, %v753_v50, %v754_v26  ;;  %v699_v28 = vadd.f32 %v683_v55, %v667_v43  ;;  %5915 = vst [vmem:[#allocation110_spill] sm:$0xff] %v4390_v36  ;;  %v685_v19 = vmul.f32 %v4390_v36, %v4390_v36  ;;  %v764_v27 = vrot.slane %v669_v37, 2  ;;  %v5917_v26 = vld [vmem:[#allocation84_spill] sm:$0xff]  ;;  %v4403_v55 = vld [vmem:[#allocation5 + $0x50] sm:$0xff] }
 0x29d   :  { %1850 = vrot.lane.b32.xlu1 %v4345_v6, %s2950_s0  ;;  %5912 = vst [vmem:[#allocation42_spill] sm:$0xff] %v4377_v38  ;;  %5913 = vst [vmem:[#allocation76_spill] sm:$0xff] %v4383_v53  ;;  %v766_v51 = vrot.slane %v711_v33, 2  ;;  %v762_v56 = vsel %vm329_vm1, %v759_v1, %v761_v34  ;;  %v671_v50 = vmul.f32 %v5916_v35, %v5916_v35  ;;  %v763_v34 = vrot.slane %v668_v60, 2 }
 0x29e   :  { %v712_v7 = vmul.f32 %v5917_v26, %v5917_v26  ;;  %v4401_v32 = vadd.f32 %v755_v2, %v696_v25  ;;  %v698_v43 = vadd.f32 %v682_v20, %v666_v61  ;;  %5919 = vst [vmem:[#allocation111_spill] sm:$0xff] %v4403_v55  ;;  %v684_v36 = vmul.f32 %v4403_v55, %v4403_v55  ;;  %v4415_v2 = vld [vmem:[#allocation5 + $0x68] sm:$0xff] }
 0x29f   :  { %1848 = vrot.lane.b32.xlu0 %v4353_v47, %s2950_s0  ;;  %v760_v33 = vsel %vm329_vm1, %v758_v45, %v759_v1  ;;  %v670_v35 = vmul.f32 %v5920_v17, %v5920_v17  ;;  %v4412_v26 = vadd.f32 %v762_v56, %v699_v28  ;;  %v701_v41 = vadd.f32 %v685_v19, %v669_v37  ;;  %v5923_v45 = vld [vmem:[#allocation88_spill] sm:$0xff]  ;;  %v4427_v19 = vld [vmem:[#allocation5 + $0x60] sm:$0xff] }
 0x2a0   :  { %5918 = vst [vmem:[#allocation95_spill] sm:$0xff] %v4401_v32  ;;  %v767_v25 = vsel %vm329_vm1, %v764_v27, %v766_v51  ;;  %5922 = vst [vmem:[#allocation43_spill] sm:$0xff] %v4415_v2  ;;  %v687_v20 = vmul.f32 %v4415_v2, %v4415_v2  ;;  %v769_v61 = vrot.slane %v671_v50, 2  ;;  %v771_v55 = vrot.slane %v712_v7, 2  ;;  %v5927_v2 = vld [vmem:[#allocation91_spill] sm:$0xff] }
 0x2a1   :  { %1854 = vrot.lane.b32.xlu1 %v4355_v63, %s2950_s0  ;;  %5921 = vst [vmem:[#allocation96_spill] sm:$0xff] %v4412_v26  ;;  %v673_v1 = vmul.f32 %v5923_v45, %v5923_v45  ;;  %v713_v17 = vmul.f32 %v5924_v57, %v5924_v57  ;;  %v4425_v28 = vadd.f32 %v760_v33, %v698_v43  ;;  %5926 = vst [vmem:[#allocation45_spill] sm:$0xff] %v4427_v19  ;;  %v4438_v43 = vld [vmem:[#allocation5 + $0x78] sm:$0xff] }
 0x2a2   :  { %v700_v37 = vadd.f32 %v684_v36, %v668_v60  ;;  %v686_v51 = vmul.f32 %v4427_v19, %v4427_v19  ;;  %v765_v56 = vsel %vm329_vm1, %v763_v34, %v764_v27  ;;  %v768_v7 = vrot.slane %v670_v35, 2 }
 0x2a3   :  { %1852 = vrot.lane.b32.xlu0 %v4377_v38, %s2950_s0  ;;  %5925 = vst [vmem:[#allocation44_spill] sm:$0xff] %v4425_v28  ;;  %v672_v45 = vmul.f32 %v5927_v2, %v5927_v2  ;;  %v4436_v57 = vadd.f32 %v767_v25, %v701_v41  ;;  %v703_v16 = vadd.f32 %v687_v20, %v671_v50  ;;  %v774_v33 = vrot.slane %v673_v1, 2  ;;  %v4447_v2 = vld [vmem:[#allocation5 + $0x70] sm:$0xff] }
 0x2a4   :  { %v689_v60 = vmul.f32 %v4438_v43, %v4438_v43  ;;  %v772_v36 = vsel %vm329_vm1, %v769_v61, %v771_v55  ;;  %v776_v19 = vrot.slane %v713_v17, 2  ;;  %v4445_v27 = vadd.f32 %v765_v56, %v700_v37 }
 0x2a5   :  { %1858 = vrot.lane.b32.xlu1 %v4383_v53, %s2950_s0  ;;  %5928 = vst [vmem:[#allocation46_spill] sm:$0xff] %v4436_v57  ;;  %v702_v34 = vadd.f32 %v686_v51, %v670_v35  ;;  %v688_v41 = vmul.f32 %v4447_v2, %v4447_v2  ;;  %v770_v50 = vsel %vm329_vm1, %v768_v7, %v769_v61  ;;  %v773_v25 = vrot.slane %v672_v45, 2 }
 0x2a6   :  { %5929 = vst [vmem:[#allocation47_spill] sm:$0xff] %v4445_v27  ;;  %v4454_v55 = vadd.f32 %v772_v36, %v703_v16  ;;  %v705_v17 = vadd.f32 %v689_v60, %v673_v1  ;;  %v777_v20 = vsel %vm329_vm1, %v774_v33, %v776_v19 }
 0x2a7   :  { %1856 = vrot.lane.b32.xlu0 %v4401_v32, %s2950_s0  ;;  %v4459_v35 = vadd.f32 %v770_v50, %v702_v34  ;;  %v704_v37 = vadd.f32 %v688_v41, %v672_v45  ;;  %v775_v51 = vsel %vm329_vm1, %v773_v25, %v774_v33 }
 0x2a8   :  { %5930 = vst [vmem:[#allocation48_spill] sm:$0xff] %v4454_v55  ;;  %v4464_v61 = vadd.f32 %v777_v20, %v705_v17 }
 0x2a9   :  { %1862 = vrot.lane.b32.xlu1 %v4412_v26, %s2950_s0  ;;  %5931 = vst [vmem:[#allocation58_spill] sm:$0xff] %v4459_v35  ;;  %v4468_v16 = vadd.f32 %v775_v51, %v704_v37 }
 0x2aa   :  { %5932 = vst [vmem:[#allocation59_spill] sm:$0xff] %v4464_v61 }
 0x2ab   :  { %1860 = vrot.lane.b32.xlu0 %v4425_v28, %s2950_s0  ;;  %5933 = vst [vmem:[#allocation61_spill] sm:$0xff] %v4468_v16 }
 0x2ad   :  { %1866 = vrot.lane.b32.xlu1 %v4436_v57, %s2950_s0 }
 0x2af   :  { %1864 = vrot.lane.b32.xlu0 %v4445_v27, %s2950_s0 }
 0x2b1   :  { %1870 = vrot.lane.b32.xlu1 %v4454_v55, %s2950_s0 }
 0x2b3   :  { %1868 = vrot.lane.b32.xlu0 %v4459_v35, %s2950_s0 }
 0x2b5   :  { %1874 = vrot.lane.b32.xlu1 %v4464_v61, %s2950_s0 }
 0x2b7   :  { %1872 = vrot.lane.b32.xlu0 %v4468_v16, %s2950_s0 }
 0x2b9   :  { %1894 = vrot.lane.b32.xlu1 %v4294_v42, %s2951_s1 }
 0x2bb   :  { %1892 = vrot.lane.b32.xlu0 %v4326_v13, %s2951_s1 }
 0x2bd   :  { %1898 = vrot.lane.b32.xlu1 %v4345_v6, %s2951_s1 }
 0x2bf   :  { %1896 = vrot.lane.b32.xlu0 %v4353_v47, %s2951_s1 }
 0x2c1   :  { %1902 = vrot.lane.b32.xlu1 %v4355_v63, %s2951_s1 }
 0x2c3   :  { %1900 = vrot.lane.b32.xlu0 %v4377_v38, %s2951_s1 }
 0x2c5   :  { %1906 = vrot.lane.b32.xlu1 %v4383_v53, %s2951_s1 }
 0x2c7   :  { %1904 = vrot.lane.b32.xlu0 %v4401_v32, %s2951_s1 }
 0x2c9   :  { %1910 = vrot.lane.b32.xlu1 %v4412_v26, %s2951_s1 }
 0x2cb   :  { %1908 = vrot.lane.b32.xlu0 %v4425_v28, %s2951_s1 }
 0x2cd   :  { %1914 = vrot.lane.b32.xlu1 %v4436_v57, %s2951_s1 }
 0x2cf   :  { %1912 = vrot.lane.b32.xlu0 %v4445_v27, %s2951_s1 }
 0x2d1   :  { %1918 = vrot.lane.b32.xlu1 %v4454_v55, %s2951_s1 }
 0x2d3   :  { %1916 = vrot.lane.b32.xlu0 %v4459_v35, %s2951_s1 }
 0x2d5   :  { %1922 = vrot.lane.b32.xlu1 %v4464_v61, %s2951_s1 }
 0x2d7   :  { %1920 = vrot.lane.b32.xlu0 %v4468_v16, %s2951_s1 }
 0x2d9   :  { %1942 = vrot.lane.b32.xlu1 %v4294_v42, %s2952_s21 }
 0x2db   :  { %1940 = vrot.lane.b32.xlu0 %v4326_v13, %s2952_s21 }
 0x2dd   :  { %1946 = vrot.lane.b32.xlu1 %v4345_v6, %s2952_s21 }
 0x2df   :  { %1944 = vrot.lane.b32.xlu0 %v4353_v47, %s2952_s21 }
 0x2e1   :  { %1950 = vrot.lane.b32.xlu1 %v4355_v63, %s2952_s21 }
 0x2e3   :  { %1948 = vrot.lane.b32.xlu0 %v4377_v38, %s2952_s21 }
 0x2e5   :  { %1954 = vrot.lane.b32.xlu1 %v4383_v53, %s2952_s21 }
 0x2e7   :  { %1952 = vrot.lane.b32.xlu0 %v4401_v32, %s2952_s21 }
 0x2e9   :  { %1958 = vrot.lane.b32.xlu1 %v4412_v26, %s2952_s21 }
 0x2eb   :  { %1956 = vrot.lane.b32.xlu0 %v4425_v28, %s2952_s21  ;;  %v4526_v45 = vpop.permute.xlu1 %1766 }
 0x2ec   :  { %5934 = vst [vmem:[#allocation65_spill] sm:$0xff] %v4526_v45 }
 0x2ed   :  { %v4528_v1 = vpop.permute.xlu0 %1764  ;;  %1962 = vrot.lane.b32.xlu1 %v4436_v57, %s2952_s21 }
 0x2ee   :  { %5935 = vst [vmem:[#allocation66_spill] sm:$0xff] %v4528_v1 }
 0x2ef   :  { %1960 = vrot.lane.b32.xlu0 %v4445_v27, %s2952_s21  ;;  %v4534_v19 = vpop.permute.xlu1 %1770 }
 0x2f0   :  { %5936 = vst [vmem:[#allocation67_spill] sm:$0xff] %v4534_v19 }
 0x2f1   :  { %v4536_v56 = vpop.permute.xlu0 %1768  ;;  %1966 = vrot.lane.b32.xlu1 %v4454_v55, %s2952_s21 }
 0x2f2   :  { %5937 = vst [vmem:[#allocation72_spill] sm:$0xff] %v4536_v56 }
 0x2f3   :  { %1964 = vrot.lane.b32.xlu0 %v4459_v35, %s2952_s21  ;;  %v4542_v7 = vpop.permute.xlu1 %1774 }
 0x2f4   :  { %5938 = vst [vmem:[#allocation75_spill] sm:$0xff] %v4542_v7 }
 0x2f5   :  { %v4544_v60 = vpop.permute.xlu0 %1772  ;;  %1970 = vrot.lane.b32.xlu1 %v4464_v61, %s2952_s21 }
 0x2f6   :  { %5939 = vst [vmem:[#allocation128_spill] sm:$0xff] %v4544_v60 }
 0x2f7   :  { %1968 = vrot.lane.b32.xlu0 %v4468_v16, %s2952_s21  ;;  %v4550_v36 = vpop.permute.xlu1 %1778 }
 0x2f8   :  { %5940 = vst [vmem:[#allocation129_spill] sm:$0xff] %v4550_v36 }
 0x2f9   :  { %v4552_v33 = vpop.permute.xlu0 %1776 }
 0x2fa   :  { %5941 = vst [vmem:[#allocation130_spill] sm:$0xff] %v4552_v33 }
 0x2fb   :  { %v4554_v34 = vpop.permute.xlu1 %1782 }
 0x2fc   :  { %5942 = vst [vmem:[#allocation131_spill] sm:$0xff] %v4554_v34 }
 0x2fd   :  { %v4556_v41 = vpop.permute.xlu0 %1780 }
 0x2fe   :  { %5943 = vst [vmem:[#allocation132_spill] sm:$0xff] %v4556_v41 }
 0x2ff   :  { %v4558_v50 = vpop.permute.xlu1 %1786 }
 0x300   :  { %5944 = vst [vmem:[#allocation133_spill] sm:$0xff] %v4558_v50 }
 0x301   :  { %v4560_v25 = vpop.permute.xlu0 %1784 }
 0x302   :  { %5945 = vst [vmem:[#allocation134_spill] sm:$0xff] %v4560_v25 }
 0x303   :  { %v4562_v17 = vpop.permute.xlu1 %1790 }
 0x304   :  { %5946 = vst [vmem:[#allocation135_spill] sm:$0xff] %v4562_v17 }
 0x305   :  { %v4564_v20 = vpop.permute.xlu0 %1788 }
 0x306   :  { %5947 = vst [vmem:[#allocation136_spill] sm:$0xff] %v4564_v20 }
 0x307   :  { %v4566_v37 = vpop.permute.xlu1 %1794 }
 0x308   :  { %5948 = vst [vmem:[#allocation137_spill] sm:$0xff] %v4566_v37 }
 0x309   :  { %v4568_v51 = vpop.permute.xlu0 %1792 }
 0x30a   :  { %5949 = vst [vmem:[#allocation138_spill] sm:$0xff] %v4568_v51 }
 0x30b   :  { %v1847_v16 = vpop.permute.xlu1 %1846 }
 0x30d   :  { %v1845_v61 = vpop.permute.xlu0 %1844 }
 0x30f   :  { %v1851_v35 = vpop.permute.xlu1 %1850 }
 0x311   :  { %v1849_v55 = vpop.permute.xlu0 %1848 }
 0x313   :  { %v1855_v57 = vpop.permute.xlu1 %1854 }
 0x315   :  { %v1853_v27 = vpop.permute.xlu0 %1852 }
 0x317   :  { %v1859_v28 = vpop.permute.xlu1 %1858 }
 0x319   :  { %v4570_v41 = vpop.permute.xlu0 %1856 }
 0x31b   :  { %v4572_v50 = vpop.permute.xlu1 %1862 }
 0x31d   :  { %v4574_v25 = vpop.permute.xlu0 %1860 }
 0x31f   :  { %v4576_v17 = vpop.permute.xlu1 %1866 }
 0x320   :  { %5950 = vst [vmem:[#allocation139_spill] sm:$0xff] %v4576_v17 }
 0x321   :  { %v4578_v20 = vpop.permute.xlu0 %1864 }
 0x323   :  { %v4580_v37 = vpop.permute.xlu1 %1870 }
 0x324   :  { %5951 = vst [vmem:[#allocation140_spill] sm:$0xff] %v4580_v37 }
 0x325   :  { %v4582_v51 = vpop.permute.xlu0 %1868 }
 0x326   :  { %5952 = vst [vmem:[#allocation141_spill] sm:$0xff] %v4582_v51 }
 0x327   :  { %v4584_v34 = vpop.permute.xlu1 %1874 }
 0x328   :  { %5953 = vst [vmem:[#allocation142_spill] sm:$0xff] %v4584_v34 }
 0x329   :  { %v4586_v26 = vpop.permute.xlu0 %1872 }
 0x32a   :  { %5954 = vst [vmem:[#allocation143_spill] sm:$0xff] %v4586_v26 }
 0x32b   :  { %v1895_v33 = vpop.permute.xlu1 %1894 }
 0x32c   :  { %v1989_v1 = vsel %vm1122_vm2, %v1847_v16, %v1895_v33  ;;  %v810_v16 = vmul.f32 %v5883_v12, %v2995_v22 }
 0x32d   :  { %v1893_v32 = vpop.permute.xlu0 %1892 }
 0x32e   :  { %v1988_v17 = vsel %vm1122_vm2, %v1845_v61, %v1893_v32 }
 0x32f   :  { %v1899_v53 = vpop.permute.xlu1 %1898 }
 0x331   :  { %v1897_v36 = vpop.permute.xlu0 %1896 }
 0x332   :  { %v1990_v61 = vsel %vm1122_vm2, %v1849_v55, %v1897_v36 }
 0x333   :  { %v1903_v38 = vpop.permute.xlu1 %1902 }
 0x334   :  { %v1993_v22 = vsel %vm1122_vm2, %v1855_v57, %v1903_v38  ;;  %v812_v57 = vmul.f32 %v5889_v58, %v2986_v15  ;;  %v4645_v38 = vmul.f32 %v5887_v0, %v2983_v14  ;;  %v814_v15 = vmul.f32 %v5896_v48, %v3036_v54  ;;  %v5958_v58 = vld [vmem:[#allocation13_spill] sm:$0xff] }
 0x335   :  { %v1901_v60 = vpop.permute.xlu0 %1900  ;;  %v4660_v14 = vmul.f32 %v5891_v62, %v5958_v58 }
 0x336   :  { %v1992_v55 = vsel %vm1122_vm2, %v1853_v27, %v1901_v60  ;;  %v895_v54 = vrot.slane %v812_v57, 2  ;;  %v896_v48 = vrot.slane %v4645_v38, 2 }
 0x337   :  { %v1907_v63 = vpop.permute.xlu1 %1906 }
 0x339   :  { %v1905_v7 = vpop.permute.xlu0 %1904 }
 0x33b   :  { %v1911_v56 = vpop.permute.xlu1 %1910 }
 0x33c   :  { %v1997_v62 = vsel %vm1122_vm2, %v4572_v50, %v1911_v56 }
 0x33d   :  { %v4588_v47 = vpop.permute.xlu0 %1908 }
 0x33e   :  { %v1996_v50 = vsel %vm1122_vm2, %v4574_v25, %v4588_v47 }
 0x33f   :  { %v4590_v19 = vpop.permute.xlu1 %1914 }
 0x341   :  { %v4592_v37 = vpop.permute.xlu0 %1912 }
 0x343   :  { %v4594_v51 = vpop.permute.xlu1 %1918 }
 0x344   :  { %5955 = vst [vmem:[#allocation144_spill] sm:$0xff] %v4594_v51 }
 0x345   :  { %v4596_v34 = vpop.permute.xlu0 %1916 }
 0x346   :  { %5956 = vst [vmem:[#allocation145_spill] sm:$0xff] %v4596_v34  ;;  %v1991_v34 = vsel %vm1122_vm2, %v1851_v35, %v1899_v53  ;;  %v2864_v53 = vld [vmem:[#allocation2] sm:$0xff] }
 0x347   :  { %v4598_v26 = vpop.permute.xlu1 %1922  ;;  %v826_v35 = vmul.f32 %v2864_v53, %v4255_v23 }
 0x349   :  { %v4600_v6 = vpop.permute.xlu0 %1920  ;;  %v842_v23 = vadd.f32 %v826_v35, %v810_v16 }
 0x34a   :  { %5957 = vst [vmem:[#allocation146_spill] sm:$0xff] %v4600_v6 }
 0x34b   :  { %v1943_v13 = vpop.permute.xlu1 %1942 }
 0x34c   :  { %v4604_v45 = vsel %vm1139_vm3, %v1989_v1, %v1943_v13  ;;  %v811_v13 = vmul.f32 %v5880_v9, %v2992_v21  ;;  %v890_v9 = vrot.slane %v810_v16, 2 }
 0x34d   :  { %v1941_v42 = vpop.permute.xlu0 %1940  ;;  %2054 = vrot.lane.b32.xlu1 %v4604_v45, %s2953_s22 }
 0x34e   :  { %v4610_v51 = vsel %vm1139_vm3, %v1988_v17, %v1941_v42  ;;  %v891_v12 = vrot.slane %v811_v13, 2  ;;  %v858_v17 = vmul.f32 %v5881_v52, %v3009_v31 }
 0x34f   :  { %2052 = vrot.lane.b32.xlu0 %v4610_v51, %s2953_s22  ;;  %v1947_v6 = vpop.permute.xlu1 %1946 }
 0x350   :  { %v4620_v32 = vsel %vm1139_vm3, %v1991_v34, %v1947_v6  ;;  %v1995_v34 = vsel %vm1122_vm2, %v1859_v28, %v1907_v63  ;;  %v892_v60 = vsel %vm329_vm1, %v890_v9, %v891_v12  ;;  %v1994_v63 = vsel %vm1122_vm2, %v4570_v41, %v1905_v7  ;;  %v2865_v28 = vld [vmem:[#allocation2 + $0x10] sm:$0xff]  ;;  %v2866_v41 = vld [vmem:[#allocation2 + $0x8] sm:$0xff] }
 0x351   :  { %v1945_v1 = vpop.permute.xlu0 %1944  ;;  %2058 = vrot.lane.b32.xlu1 %v4620_v32, %s2953_s22  ;;  %v828_v31 = vmul.f32 %v2865_v28, %v4301_v5  ;;  %v893_v53 = vrot.slane %v858_v17, 2  ;;  %v2867_v5 = vld [vmem:[#allocation2 + $0x20] sm:$0xff]  ;;  %v901_v9 = vrot.slane %v4660_v14, 2  ;;  %v1998_v28 = vsel %vm1122_vm2, %v4578_v20, %v4592_v37 }
 0x352   :  { %v4626_v42 = vsel %vm1139_vm3, %v1990_v61, %v1945_v1  ;;  %v4670_v61 = vadd.f32 %v892_v60, %v842_v23  ;;  %v827_v1 = vmul.f32 %v2866_v41, %v4240_v39  ;;  %v830_v35 = vmul.f32 %v2867_v5, %v4332_v3  ;;  %v5960_v23 = vld [vmem:[#allocation18_spill] sm:$0xff] }
 0x353   :  { %2056 = vrot.lane.b32.xlu0 %v4626_v42, %s2953_s22  ;;  %v1951_v21 = vpop.permute.xlu1 %1950  ;;  %v844_v39 = vadd.f32 %v828_v31, %v812_v57  ;;  %v816_v3 = vmul.f32 %v5902_v40, %v3058_v4  ;;  %v894_v25 = vsel %vm329_vm1, %v891_v12, %v893_v53  ;;  %v2868_v57 = vld [vmem:[#allocation2 + $0x18] sm:$0xff] }
 0x354   :  { %v4633_v6 = vsel %vm1139_vm3, %v1993_v22, %v1951_v21  ;;  %v900_v21 = vrot.slane %v814_v15, 2  ;;  %v843_v47 = vadd.f32 %v827_v1, %v811_v13  ;;  %v846_v60 = vadd.f32 %v830_v35, %v814_v15  ;;  %v2871_v35 = vld [vmem:[#allocation2 + $0x40] sm:$0xff] }
 0x355   :  { %v1949_v36 = vpop.permute.xlu0 %1948  ;;  %2062 = vrot.lane.b32.xlu1 %v4633_v6, %s2953_s22  ;;  %v829_v17 = vmul.f32 %v2868_v57, %v4287_v24  ;;  %v905_v24 = vrot.slane %v816_v3, 2  ;;  %v5969_v57 = vld [vmem:[#allocation24_spill] sm:$0xff] }
 0x356   :  { %v4639_v33 = vsel %vm1139_vm3, %v1992_v55, %v1949_v36  ;;  %v5959_v55 = vld [vmem:[#allocation11_spill] sm:$0xff]  ;;  %v902_v4 = vsel %vm329_vm1, %v900_v21, %v901_v9  ;;  %v4725_v20 = vadd.f32 %v894_v25, %v843_v47  ;;  %v834_v21 = vmul.f32 %v2871_v35, %v4379_v18 }
 0x357   :  { %2060 = vrot.lane.b32.xlu0 %v4639_v33, %s2953_s22  ;;  %v1955_v27 = vpop.permute.xlu1 %1954  ;;  %v859_v56 = vmul.f32 %v5888_v44, %v5959_v55  ;;  %v897_v44 = vsel %vm329_vm1, %v895_v54, %v896_v48  ;;  %v4727_v37 = vadd.f32 %v902_v4, %v846_v60  ;;  %v5964_v55 = vld [vmem:[#allocation30_spill] sm:$0xff]  ;;  %v5978_v35 = vld [vmem:[#allocation79_spill] sm:$0xff] }
 0x358   :  { %v4654_v16 = vsel %vm1139_vm3, %v1995_v34, %v1955_v27  ;;  %v4694_v34 = vmul.f32 %v5897_v11, %v5960_v23  ;;  %v2869_v11 = vld [vmem:[#allocation2 + $0x30] sm:$0xff]  ;;  %v4713_v12 = vadd.f32 %v897_v44, %v844_v39  ;;  %v2872_v23 = vld [vmem:[#allocation2 + $0x38] sm:$0xff] }
 0x359   :  { %v1953_v0 = vpop.permute.xlu0 %1952  ;;  %2066 = vrot.lane.b32.xlu1 %v4654_v16, %s2953_s22  ;;  %v898_v40 = vrot.slane %v859_v56, 2  ;;  %v832_v58 = vmul.f32 %v2869_v11, %v4357_v59  ;;  %v818_v59 = vmul.f32 %v5908_v10, %v3084_v29  ;;  %v5963_v29 = vld [vmem:[#allocation20_spill] sm:$0xff]  ;;  %v5968_v44 = vld [vmem:[#allocation93_spill] sm:$0xff] }
 0x35a   :  { %v4668_v52 = vsel %vm1139_vm3, %v1994_v63, %v1953_v0  ;;  %v5961_v63 = vld [vmem:[#allocation16_spill] sm:$0xff]  ;;  %v906_v15 = vrot.slane %v4694_v34, 2  ;;  %v861_v10 = vmul.f32 %v5898_v46, %v5963_v29  ;;  %v833_v47 = vmul.f32 %v2872_v23, %v5968_v44  ;;  %v2873_v11 = vld [vmem:[#allocation2 + $0x50] sm:$0xff] }
 0x35b   :  { %2064 = vrot.lane.b32.xlu0 %v4668_v52, %s2953_s22  ;;  %v1959_v7 = vpop.permute.xlu1 %1958  ;;  %v860_v0 = vmul.f32 %v5892_v8, %v5961_v63  ;;  %v5962_v8 = vld [vmem:[#allocation21_spill] sm:$0xff]  ;;  %v899_v1 = vsel %vm329_vm1, %v896_v48, %v898_v40  ;;  %v848_v53 = vadd.f32 %v832_v58, %v816_v3  ;;  %v910_v48 = vrot.slane %v818_v59, 2  ;;  %v5971_v58 = vld [vmem:[#allocation111_spill] sm:$0xff]  ;;  %v5981_v44 = vld [vmem:[#allocation40_spill] sm:$0xff] }
 0x35c   :  { %v4680_v22 = vsel %vm1139_vm3, %v1997_v62, %v1959_v7  ;;  %v819_v54 = vmul.f32 %v5904_v49, %v5962_v8  ;;  %v845_v62 = vadd.f32 %v829_v17, %v4645_v38  ;;  %v2870_v7 = vld [vmem:[#allocation2 + $0x28] sm:$0xff]  ;;  %v907_v49 = vsel %vm329_vm1, %v905_v24, %v906_v15  ;;  %v5965_v38 = vld [vmem:[#allocation82_spill] sm:$0xff]  ;;  %v5970_v17 = vld [vmem:[#allocation73_spill] sm:$0xff] }
 0x35d   :  { %v1957_v36 = vpop.permute.xlu0 %1956  ;;  %2070 = vrot.lane.b32.xlu1 %v4680_v22, %s2953_s22  ;;  %v831_v41 = vmul.f32 %v2870_v7, %v4305_v30  ;;  %v903_v5 = vrot.slane %v860_v0, 2  ;;  %v820_v56 = vmul.f32 %v5965_v38, %v5964_v55  ;;  %v5967_v30 = vld [vmem:[#allocation78_spill] sm:$0xff]  ;;  %v4748_v25 = vadd.f32 %v907_v49, %v848_v53  ;;  %v5977_v49 = vld [vmem:[#allocation28_spill] sm:$0xff] }
 0x35e   :  { %v4697_v27 = vsel %vm1139_vm3, %v1996_v50, %v1957_v36  ;;  %v5966_v50 = vld [vmem:[#allocation26_spill] sm:$0xff]  ;;  %v911_v39 = vrot.slane %v819_v54, 2  ;;  %v4744_v46 = vadd.f32 %v899_v1, %v845_v62  ;;  %v908_v60 = vrot.slane %v861_v10, 2  ;;  %v5974_v62 = vld [vmem:[#allocation31_spill] sm:$0xff]  ;;  %v2874_v1 = vld [vmem:[#allocation2 + $0x48] sm:$0xff] }
 0x35f   :  { %2068 = vrot.lane.b32.xlu0 %v4697_v27, %s2953_s22  ;;  %v821_v36 = vmul.f32 %v5967_v30, %v5966_v50  ;;  %v847_v3 = vadd.f32 %v831_v41, %v4660_v14  ;;  %v904_v18 = vsel %vm329_vm1, %v901_v9, %v903_v5  ;;  %v862_v4 = vmul.f32 %v5970_v17, %v5969_v57  ;;  %v5973_v24 = vld [vmem:[#allocation86_spill] sm:$0xff]  ;;  %v5975_v9 = vld [vmem:[#allocation83_spill] sm:$0xff] }
 0x360   :  { %v850_v40 = vadd.f32 %v834_v21, %v818_v59  ;;  %v836_v63 = vmul.f32 %v2873_v11, %v5971_v58  ;;  %v915_v0 = vrot.slane %v820_v56, 2  ;;  %v823_v7 = vmul.f32 %v5975_v9, %v5974_v62  ;;  %v5976_v53 = vld [vmem:[#allocation94_spill] sm:$0xff]  ;;  %v2875_v30 = vld [vmem:[#allocation2 + $0x60] sm:$0xff]  ;;  %v2877_v9 = vld [vmem:[#allocation2 + $0x70] sm:$0xff] }
 0x361   :  { %v1961_v13 = vpop.permute.xlu0 %1960  ;;  %2132 = vrot.lane.b32.xlu1 %v4670_v61, %s2950_s0  ;;  %v916_v14 = vrot.slane %v821_v36, 2  ;;  %v4763_v41 = vadd.f32 %v904_v18, %v847_v3  ;;  %v849_v59 = vadd.f32 %v833_v47, %v4694_v34  ;;  %v835_v5 = vmul.f32 %v2874_v1, %v5976_v53  ;;  %v5982_v47 = vld [vmem:[#allocation91_spill] sm:$0xff]  ;;  %v5983_v18 = vld [vmem:[#allocation36_spill] sm:$0xff] }
 0x362   :  { %v4717_v31 = vsel %vm1139_vm3, %v1998_v28, %v1961_v13  ;;  %v912_v28 = vsel %vm329_vm1, %v910_v48, %v911_v39  ;;  %v5972_v13 = vld [vmem:[#allocation35_spill] sm:$0xff]  ;;  %v909_v29 = vsel %vm329_vm1, %v906_v15, %v908_v60  ;;  %v913_v10 = vrot.slane %v862_v4, 2  ;;  %v5980_v48 = vld [vmem:[#allocation45_spill] sm:$0xff]  ;;  %v5984_v60 = vld [vmem:[#allocation88_spill] sm:$0xff] }
 0x363   :  { %2072 = vrot.lane.b32.xlu0 %v4717_v31, %s2953_s22  ;;  %v822_v8 = vmul.f32 %v5973_v24, %v5972_v13  ;;  %v863_v21 = vmul.f32 %v5978_v35, %v5977_v49  ;;  %v4772_v55 = vadd.f32 %v912_v28, %v850_v40  ;;  %v852_v38 = vadd.f32 %v836_v63, %v820_v56  ;;  %v2876_v56 = vld [vmem:[#allocation2 + $0x58] sm:$0xff]  ;;  %v5987_v28 = vld [vmem:[#allocation84_spill] sm:$0xff] }
 0x364   :  { %v917_v50 = vsel %vm329_vm1, %v915_v0, %v916_v14  ;;  %v838_v34 = vmul.f32 %v2875_v30, %v5980_v48  ;;  %v921_v23 = vrot.slane %v823_v7, 2  ;;  %v824_v15 = vmul.f32 %v5982_v47, %v5981_v44  ;;  %v5985_v40 = vld [vmem:[#allocation110_spill] sm:$0xff]  ;;  %v5986_v0 = vld [vmem:[#allocation33_spill] sm:$0xff] }
 0x365   :  { %2136 = vrot.lane.b32.xlu1 %v4713_v12, %s2950_s0  ;;  %5979 = vst [vmem:[#allocation13_spill] sm:$0xff] %v4772_v55  ;;  %v920_v3 = vrot.slane %v822_v8, 2  ;;  %v825_v57 = vmul.f32 %v5984_v60, %v5983_v18  ;;  %v4782_v17 = vadd.f32 %v909_v29, %v849_v59  ;;  %v851_v4 = vadd.f32 %v835_v5, %v819_v54  ;;  %v2878_v29 = vld [vmem:[#allocation2 + $0x68] sm:$0xff] }
 0x366   :  { %v837_v11 = vmul.f32 %v2876_v56, %v5985_v40  ;;  %v914_v58 = vsel %vm329_vm1, %v911_v39, %v913_v10  ;;  %v918_v63 = vrot.slane %v863_v21, 2  ;;  %v864_v13 = vmul.f32 %v5987_v28, %v5986_v0  ;;  %v5990_v10 = vld [vmem:[#allocation43_spill] sm:$0xff]  ;;  %v5998_v40 = vld [vmem:[#allocation14_spill] sm:$0xff] }
 0x367   :  { %2134 = vrot.lane.b32.xlu0 %v4725_v20, %s2950_s0  ;;  %v4790_v24 = vadd.f32 %v917_v50, %v852_v38  ;;  %v854_v62 = vadd.f32 %v838_v34, %v822_v8  ;;  %v840_v59 = vmul.f32 %v2877_v9, %v4447_v2  ;;  %v922_v54 = vsel %vm329_vm1, %v920_v3, %v921_v23  ;;  %v5991_v8 = vld [vmem:[#allocation38_spill] sm:$0xff]  ;;  %v5992_v38 = vld [vmem:[#allocation89_spill] sm:$0xff]  ;;  %v6000_v0 = vld [vmem:[#allocation15_spill] sm:$0xff] }
 0x368   :  { %v925_v1 = vrot.slane %v824_v15, 2  ;;  %v926_v53 = vrot.slane %v825_v57, 2  ;;  %v4796_v39 = vadd.f32 %v914_v58, %v851_v4  ;;  %v853_v5 = vadd.f32 %v837_v11, %v821_v36  ;;  %v2879_v3 = vld [vmem:[#allocation2 + $0x78] sm:$0xff]  ;;  %v5999_v58 = vld [vmem:[#allocation97_spill] sm:$0xff]  ;;  %v6002_v9 = vld [vmem:[#allocation19_spill] sm:$0xff] }
 0x369   :  { %2140 = vrot.lane.b32.xlu1 %v4727_v37, %s2950_s0  ;;  %5988 = vst [vmem:[#allocation11_spill] sm:$0xff] %v4790_v24  ;;  %v839_v49 = vmul.f32 %v2878_v29, %v5990_v10  ;;  %v919_v35 = vsel %vm329_vm1, %v916_v14, %v918_v63  ;;  %v923_v21 = vrot.slane %v864_v13, 2  ;;  %v865_v50 = vmul.f32 %v5992_v38, %v5991_v8  ;;  %v6001_v13 = vld [vmem:[#allocation54_spill] sm:$0xff]  ;;  %v6005_v29 = vld [vmem:[#allocation81_spill] sm:$0xff]  ;;  %v6008_v8 = vld [vmem:[#allocation92_spill] sm:$0xff] }
 0x36a   :  { %5989 = vst [vmem:[#allocation18_spill] sm:$0xff] %v4796_v39  ;;  %v4804_v2 = vadd.f32 %v922_v54, %v854_v62  ;;  %v856_v30 = vadd.f32 %v840_v59, %v824_v15  ;;  %v927_v48 = vsel %vm329_vm1, %v925_v1, %v926_v53  ;;  %v4809_v36 = vadd.f32 %v919_v35, %v853_v5  ;;  %v6003_v1 = vld [vmem:[#allocation98_spill] sm:$0xff]  ;;  %v6004_v5 = vld [vmem:[#allocation112_spill] sm:$0xff] }
 0x36b   :  { %2138 = vrot.lane.b32.xlu0 %v4744_v46, %s2950_s0  ;;  %v855_v34 = vadd.f32 %v839_v49, %v823_v7  ;;  %v841_v14 = vmul.f32 %v2879_v3, %v4438_v43  ;;  %v924_v44 = vsel %vm329_vm1, %v921_v23, %v923_v21  ;;  %v928_v47 = vrot.slane %v865_v50, 2  ;;  %v1963_v7 = vpop.permute.xlu1 %1962  ;;  %v6006_v49 = vld [vmem:[#allocation113_spill] sm:$0xff]  ;;  %v6007_v35 = vld [vmem:[#allocation32_spill] sm:$0xff]  ;;  %v6009_v50 = vld [vmem:[#allocation114_spill] sm:$0xff] }
 0x36c   :  { %5993 = vst [vmem:[#allocation16_spill] sm:$0xff] %v4804_v2  ;;  %5994 = vst [vmem:[#allocation21_spill] sm:$0xff] %v4809_v36  ;;  %v4815_v18 = vadd.f32 %v927_v48, %v856_v30  ;;  %v4889_v11 = vadd.f32 0.0081, %v5998_v40  ;;  %v4892_v63 = vadd.f32 0.0081, %v5999_v58  ;;  %v1733_v10 = vadd.f32 %v6005_v29, %v6004_v5 }
 0x36d   :  { %2144 = vrot.lane.b32.xlu1 %v4748_v25, %s2950_s0  ;;  %v4819_v15 = vadd.f32 %v924_v44, %v855_v34  ;;  %v857_v60 = vadd.f32 %v841_v14, %v825_v57  ;;  %v929_v4 = vsel %vm329_vm1, %v926_v53, %v928_v47  ;;  %v1965_v57 = vpop.permute.xlu0 %1964  ;;  %v4895_v28 = vadd.f32 0.0081, %v6000_v0  ;;  %v6010_v30 = vld [vmem:[#allocation64_spill] sm:$0xff]  ;;  %v6011_v34 = vld [vmem:[#allocation115_spill] sm:$0xff]  ;;  %v6014_v47 = vld [vmem:[#allocation85_spill] sm:$0xff] }
 0x36e   :  { %5995 = vst [vmem:[#allocation20_spill] sm:$0xff] %v4815_v18  ;;  %v4898_v62 = vadd.f32 0.0081, %v6001_v13  ;;  %v4901_v59 = vadd.f32 0.0081, %v6002_v9  ;;  %v1732_v21 = vadd.f32 %v6007_v35, %v6006_v49  ;;  %v2021_v38 = vadd.f32 %v4604_v45, %v6008_v8  ;;  %v6012_v3 = vld [vmem:[#allocation104_spill] sm:$0xff] }
 0x36f   :  { %2142 = vrot.lane.b32.xlu0 %v4763_v41, %s2950_s0  ;;  %5996 = vst [vmem:[#allocation30_spill] sm:$0xff] %v4819_v15  ;;  %v4826_v43 = vadd.f32 %v929_v4, %v857_v60  ;;  %v1967_v23 = vpop.permute.xlu1 %1966  ;;  %v4906_v53 = vadd.f32 0.0081, %v6003_v1  ;;  %v1735_v48 = vadd.f32 %v6010_v30, %v6009_v50  ;;  %v1734_v14 = vadd.f32 %v6012_v3, %v6011_v34  ;;  %v6013_v44 = vld [vmem:[#allocation116_spill] sm:$0xff]  ;;  %v6015_v4 = vld [vmem:[#allocation139_spill] sm:$0xff]  ;;  %v6016_v29 = vld [vmem:[#allocation65_spill] sm:$0xff] }
 0x370   :  { %v1737_v60 = vadd.f32 %v6014_v47, %v6013_v44  ;;  %v1813_v49 = vadd.f32 %v6016_v29, %v1733_v10  ;;  %v6017_v8 = vld [vmem:[#allocation108_spill] sm:$0xff]  ;;  %v6018_v30 = vld [vmem:[#allocation117_spill] sm:$0xff]  ;;  %v6019_v34 = vld [vmem:[#allocation34_spill] sm:$0xff] }
 0x371   :  { %2148 = vrot.lane.b32.xlu1 %v4772_v55, %s2950_s0  ;;  %5997 = vst [vmem:[#allocation82_spill] sm:$0xff] %v4826_v43  ;;  %v1969_v54 = vpop.permute.xlu0 %1968  ;;  %v2020_v50 = vadd.f32 %v4610_v51, %v6017_v8  ;;  %v1736_v3 = vadd.f32 %v6019_v34, %v6018_v30  ;;  %v6020_v44 = vld [vmem:[#allocation118_spill] sm:$0xff]  ;;  %v6021_v47 = vld [vmem:[#allocation68_spill] sm:$0xff]  ;;  %v6028_v8 = vld [vmem:[#allocation67_spill] sm:$0xff] }
 0x372   :  { %v1815_v30 = vadd.f32 %v6028_v8, %v1735_v48  ;;  %v6029_v34 = vld [vmem:[#allocation144_spill] sm:$0xff] }
 0x373   :  { %2146 = vrot.lane.b32.xlu0 %v4782_v17, %s2950_s0  ;;  %v1971_v56 = vpop.permute.xlu1 %1970  ;;  %v6036_v8 = vld [vmem:[#allocation72_spill] sm:$0xff] }
 0x375   :  { %2152 = vrot.lane.b32.xlu1 %v4790_v24, %s2950_s0 }
 0x377   :  { %2150 = vrot.lane.b32.xlu0 %v4796_v39, %s2950_s0 }
 0x379   :  { %2156 = vrot.lane.b32.xlu1 %v4804_v2, %s2950_s0 }
 0x37b   :  { %2154 = vrot.lane.b32.xlu0 %v4809_v36, %s2950_s0 }
 0x37d   :  { %2160 = vrot.lane.b32.xlu1 %v4815_v18, %s2950_s0 }
 0x37f   :  { %2158 = vrot.lane.b32.xlu0 %v4819_v15, %s2950_s0 }
 0x381   :  { %2180 = vrot.lane.b32.xlu1 %v4670_v61, %s2951_s1 }
 0x383   :  { %2162 = vrot.lane.b32.xlu0 %v4826_v43, %s2950_s0 }
 0x385   :  { %2184 = vrot.lane.b32.xlu1 %v4713_v12, %s2951_s1 }
 0x387   :  { %2182 = vrot.lane.b32.xlu0 %v4725_v20, %s2951_s1 }
 0x389   :  { %2188 = vrot.lane.b32.xlu1 %v4727_v37, %s2951_s1 }
 0x38b   :  { %2186 = vrot.lane.b32.xlu0 %v4744_v46, %s2951_s1 }
 0x38d   :  { %2192 = vrot.lane.b32.xlu1 %v4748_v25, %s2951_s1 }
 0x38f   :  { %2190 = vrot.lane.b32.xlu0 %v4763_v41, %s2951_s1 }
 0x391   :  { %2196 = vrot.lane.b32.xlu1 %v4772_v55, %s2951_s1 }
 0x393   :  { %2194 = vrot.lane.b32.xlu0 %v4782_v17, %s2951_s1 }
 0x395   :  { %2200 = vrot.lane.b32.xlu1 %v4790_v24, %s2951_s1 }
 0x397   :  { %2198 = vrot.lane.b32.xlu0 %v4796_v39, %s2951_s1 }
 0x399   :  { %2204 = vrot.lane.b32.xlu1 %v4804_v2, %s2951_s1 }
 0x39b   :  { %2202 = vrot.lane.b32.xlu0 %v4809_v36, %s2951_s1 }
 0x39d   :  { %2208 = vrot.lane.b32.xlu1 %v4815_v18, %s2951_s1 }
 0x39f   :  { %2206 = vrot.lane.b32.xlu0 %v4819_v15, %s2951_s1 }
 0x3a1   :  { %2228 = vrot.lane.b32.xlu1 %v4670_v61, %s2952_s21 }
 0x3a3   :  { %2210 = vrot.lane.b32.xlu0 %v4826_v43, %s2951_s1 }
 0x3a5   :  { %2232 = vrot.lane.b32.xlu1 %v4713_v12, %s2952_s21 }
 0x3a7   :  { %2230 = vrot.lane.b32.xlu0 %v4725_v20, %s2952_s21 }
 0x3a9   :  { %2236 = vrot.lane.b32.xlu1 %v4727_v37, %s2952_s21 }
 0x3ab   :  { %2234 = vrot.lane.b32.xlu0 %v4744_v46, %s2952_s21 }
 0x3ad   :  { %2240 = vrot.lane.b32.xlu1 %v4748_v25, %s2952_s21 }
 0x3af   :  { %2238 = vrot.lane.b32.xlu0 %v4763_v41, %s2952_s21 }
 0x3b1   :  { %2244 = vrot.lane.b32.xlu1 %v4772_v55, %s2952_s21 }
 0x3b3   :  { %2242 = vrot.lane.b32.xlu0 %v4782_v17, %s2952_s21 }
 0x3b5   :  { %2248 = vrot.lane.b32.xlu1 %v4790_v24, %s2952_s21 }
 0x3b7   :  { %2246 = vrot.lane.b32.xlu0 %v4796_v39, %s2952_s21  ;;  %v6025_v39 = vld [vmem:[#allocation87_spill] sm:$0xff] }
 0x3b9   :  { %2252 = vrot.lane.b32.xlu1 %v4804_v2, %s2952_s21  ;;  %v1739_v2 = vadd.f32 %v6021_v47, %v6020_v44  ;;  %v6030_v44 = vld [vmem:[#allocation140_spill] sm:$0xff] }
 0x3ba   :  { %v2001_v47 = vsel %vm1122_vm2, %v6030_v44, %v6029_v34  ;;  %v1814_v34 = vadd.f32 %v6036_v8, %v1734_v14  ;;  %v6037_v44 = vld [vmem:[#allocation142_spill] sm:$0xff]  ;;  %v6040_v14 = vld [vmem:[#allocation143_spill] sm:$0xff] }
 0x3bb   :  { %2250 = vrot.lane.b32.xlu0 %v4809_v36, %s2952_s21 }
 0x3bd   :  { %2256 = vrot.lane.b32.xlu1 %v4815_v18, %s2952_s21  ;;  %v1999_v18 = vsel %vm1122_vm2, %v6015_v4, %v4590_v19  ;;  %v6022_v19 = vld [vmem:[#allocation119_spill] sm:$0xff]  ;;  %v6023_v4 = vld [vmem:[#allocation105_spill] sm:$0xff] }
 0x3be   :  { %v4927_v45 = vsel %vm1139_vm3, %v1999_v18, %v1963_v7  ;;  %v1738_v36 = vadd.f32 %v6023_v4, %v6022_v19  ;;  %v6026_v18 = vld [vmem:[#allocation66_spill] sm:$0xff]  ;;  %v6031_v19 = vld [vmem:[#allocation145_spill] sm:$0xff] }
 0x3bf   :  { %2254 = vrot.lane.b32.xlu0 %v4819_v15, %s2952_s21  ;;  %v2055_v5 = vpop.permute.xlu1 %2054  ;;  %v6024_v15 = vld [vmem:[#allocation120_spill] sm:$0xff]  ;;  %v1812_v7 = vadd.f32 %v6026_v18, %v1732_v21  ;;  %v6033_v21 = vld [vmem:[#allocation74_spill] sm:$0xff]  ;;  %v6035_v18 = vld [vmem:[#allocation37_spill] sm:$0xff] }
 0x3c0   :  { %v2101_v35 = vadd.f32 %v2055_v5, %v2021_v38  ;;  %v4939_v24 = vadd.f32 %v6025_v39, %v6024_v15  ;;  %v6027_v5 = vld [vmem:[#allocation41_spill] sm:$0xff] }
 0x3c1   :  { %v2053_v10 = vpop.permute.xlu0 %2052  ;;  %2074 = vrot.lane.b32.xlu1 %v4927_v45, %s2953_s22  ;;  %v2023_v29 = vadd.f32 %v4620_v32, %v6027_v5  ;;  %v6032_v39 = vld [vmem:[#allocation141_spill] sm:$0xff] }
 0x3c2   :  { %v2581_v51 = vadd.f32 %v2101_v35, %v1813_v49  ;;  %v2100_v38 = vadd.f32 %v2053_v10, %v2020_v50  ;;  %v2000_v15 = vsel %vm1122_vm2, %v6032_v39, %v6031_v19  ;;  %v2022_v49 = vadd.f32 %v4626_v42, %v6033_v21  ;;  %v6034_v10 = vld [vmem:[#allocation121_spill] sm:$0xff] }
 0x3c3   :  { %2258 = vrot.lane.b32.xlu0 %v4826_v43, %s2952_s21  ;;  %v2059_v4 = vpop.permute.xlu1 %2058  ;;  %v4958_v35 = vsel %vm1139_vm3, %v2001_v47, %v1967_v23  ;;  %v4962_v5 = vadd.f32 %v6035_v18, %v6034_v10  ;;  %v2003_v19 = vsel %vm1122_vm2, %v6037_v44, %v4598_v26  ;;  %v4969_v39 = vsel %vm1139_vm3, %v2000_v15, %v1965_v57  ;;  %v6041_v57 = vld [vmem:[#allocation109_spill] sm:$0xff] }
 0x3c4   :  { %v2597_v32 = vmul.f32 9.0, %v2581_v51  ;;  %v2580_v48 = vadd.f32 %v2100_v38, %v1812_v7  ;;  %v2103_v50 = vadd.f32 %v2059_v4, %v2023_v29  ;;  %v6038_v29 = vld [vmem:[#allocation75_spill] sm:$0xff]  ;;  %v6039_v4 = vld [vmem:[#allocation146_spill] sm:$0xff]  ;;  %v4979_v26 = vsel %vm1139_vm3, %v2003_v19, %v1971_v56 }
 0x3c5   :  { %v2057_v42 = vpop.permute.xlu0 %2056  ;;  %2078 = vrot.lane.b32.xlu1 %v4958_v35, %s2953_s22  ;;  %v1817_v47 = vadd.f32 %v6038_v29, %v1737_v60  ;;  %v2002_v21 = vsel %vm1122_vm2, %v6040_v14, %v6039_v4  ;;  %v2025_v15 = vadd.f32 %v4633_v6, %v6041_v57  ;;  %v6042_v60 = vld [vmem:[#allocation128_spill] sm:$0xff]  ;;  %v6043_v56 = vld [vmem:[#allocation42_spill] sm:$0xff]  ;;  %v6046_v4 = vld [vmem:[#allocation95_spill] sm:$0xff] }
 0x3c6   :  { %v2613_v23 = vsub.f32 %v2597_v32, %v5998_v40  ;;  %v2596_v7 = vmul.f32 9.0, %v2580_v48  ;;  %v2583_v51 = vadd.f32 %v2103_v50, %v1815_v30  ;;  %v2102_v38 = vadd.f32 %v2057_v42, %v2022_v49  ;;  %v6044_v42 = vld [vmem:[#allocation129_spill] sm:$0xff]  ;;  %v6047_v14 = vld [vmem:[#allocation130_spill] sm:$0xff] }
 0x3c7   :  { %2076 = vrot.lane.b32.xlu0 %v4969_v39, %s2953_s22  ;;  %v2063_v10 = vpop.permute.xlu1 %2062  ;;  %v1816_v48 = vadd.f32 %v6042_v60, %v1736_v3  ;;  %v4988_v50 = vsel %vm1139_vm3, %v2002_v21, %v1969_v54  ;;  %v2024_v8 = vadd.f32 %v4639_v33, %v6043_v56  ;;  %v1819_v3 = vadd.f32 %v6044_v42, %v1739_v2 }
 0x3c8   :  { %v2629_v40 = vadd.f32 0.0729, %v2613_v23  ;;  %v2612_v30 = vsub.f32 %v2596_v7, %v5999_v58  ;;  %v2599_v49 = vmul.f32 9.0, %v2583_v51  ;;  %v2582_v32 = vadd.f32 %v2102_v38, %v1814_v34  ;;  %v6045_v7 = vld [vmem:[#allocation76_spill] sm:$0xff] }
 0x3c9   :  { %v2105_v18 = vadd.f32 %v2063_v10, %v2025_v15  ;;  %v2061_v44 = vpop.permute.xlu0 %2060  ;;  %2082 = vrot.lane.b32.xlu1 %v4979_v26, %s2953_s22  ;;  %v2027_v33 = vadd.f32 %v4654_v16, %v6045_v7  ;;  %v1818_v2 = vadd.f32 %v6047_v14, %v1738_v36  ;;  %v6054_v7 = vld [vmem:[#allocation106_spill] sm:$0xff] }
 0x3ca   :  { %v4995_v6 = vmul.f32 %v2629_v40, %v4889_v11  ;;  %v2628_v19 = vadd.f32 0.0729, %v2612_v30  ;;  %v2615_v58 = vsub.f32 %v2599_v49, %v6000_v0  ;;  %v2598_v34 = vmul.f32 9.0, %v2582_v32  ;;  %v6048_v30 = vld [vmem:[#allocation96_spill] sm:$0xff]  ;;  %v6049_v49 = vld [vmem:[#allocation131_spill] sm:$0xff] }
 0x3cb   :  { %v2585_v23 = vadd.f32 %v2105_v18, %v1817_v47  ;;  %v2104_v54 = vadd.f32 %v2061_v44, %v2024_v8  ;;  %2080 = vrot.lane.b32.xlu0 %v4988_v50, %s2953_s22  ;;  %v2067_v51 = vpop.permute.xlu1 %2066  ;;  %v2026_v0 = vadd.f32 %v4668_v52, %v6046_v4  ;;  %v6051_v44 = vld [vmem:[#allocation22_spill] sm:$0xff]  ;;  %v6055_v4 = vld [vmem:[#allocation52_spill] sm:$0xff] }
 0x3cc   :  { %v5004_v38 = vmul.f32 %v2628_v19, %v4892_v63  ;;  %v2631_v11 = vadd.f32 0.0729, %v2615_v58  ;;  %v2614_v29 = vsub.f32 %v2598_v34, %v6001_v13  ;;  %v2107_v57 = vadd.f32 %v2067_v51, %v2027_v33 }
 0x3cd   :  { %v2601_v47 = vmul.f32 9.0, %v2585_v23  ;;  %v2584_v21 = vadd.f32 %v2104_v54, %v1816_v48  ;;  %v2065_v15 = vpop.permute.xlu0 %2064  ;;  %v2029_v63 = vadd.f32 %v4680_v22, %v6048_v30  ;;  %v1821_v13 = vadd.f32 %v6049_v49, %v4939_v24  ;;  %v6058_v30 = vld [vmem:[#allocation23_spill] sm:$0xff] }
 0x3ce   :  { %v5011_v10 = vmul.f32 %v2631_v11, %v4895_v28  ;;  %v2630_v16 = vadd.f32 0.0729, %v2614_v29  ;;  %v2106_v40 = vadd.f32 %v2065_v15, %v2026_v0  ;;  %v2587_v60 = vadd.f32 %v2107_v57, %v1819_v3  ;;  %v6050_v28 = vld [vmem:[#allocation44_spill] sm:$0xff] }
 0x3cf   :  { %v2617_v32 = vsub.f32 %v2601_v47, %v6002_v9  ;;  %v2600_v52 = vmul.f32 9.0, %v2584_v21  ;;  %v2071_v36 = vpop.permute.xlu1 %2070  ;;  %v2028_v8 = vadd.f32 %v4697_v27, %v6050_v28  ;;  %v2571_v19 = vadd.f32 0.0081, %v6051_v44  ;;  %v6052_v9 = vld [vmem:[#allocation132_spill] sm:$0xff]  ;;  %v6057_v21 = vld [vmem:[#allocation134_spill] sm:$0xff] }
 0x3d0   :  { %v5019_v48 = vmul.f32 %v2630_v16, %v4898_v62  ;;  %v2586_v18 = vadd.f32 %v2106_v40, %v1818_v2  ;;  %v2109_v56 = vadd.f32 %v2071_v36, %v2029_v63  ;;  %v2603_v34 = vmul.f32 9.0, %v2587_v60  ;;  %v6053_v62 = vld [vmem:[#allocation123_spill] sm:$0xff] }
 0x3d1   :  { %v2633_v58 = vadd.f32 0.0729, %v2617_v32  ;;  %v2616_v22 = vsub.f32 %v2600_v52, %v6003_v1  ;;  %v2069_v24 = vpop.permute.xlu0 %2068  ;;  %v1820_v42 = vadd.f32 %v6052_v9, %v4962_v5  ;;  %v1742_v33 = vadd.f32 %v6054_v7, %v6053_v62  ;;  %v6056_v2 = vld [vmem:[#allocation47_spill] sm:$0xff]  ;;  %v6060_v9 = vld [vmem:[#allocation77_spill] sm:$0xff] }
 0x3d2   :  { %v2602_v3 = vmul.f32 9.0, %v2586_v18  ;;  %v2589_v23 = vadd.f32 %v2109_v56, %v1821_v13  ;;  %v2108_v54 = vadd.f32 %v2069_v24, %v2028_v8  ;;  %v2619_v11 = vsub.f32 %v2603_v34, %v6051_v44  ;;  %v6059_v18 = vld [vmem:[#allocation100_spill] sm:$0xff] }
 0x3d3   :  { %v5030_v51 = vmul.f32 %v2633_v58, %v4901_v59  ;;  %v2632_v27 = vadd.f32 0.0729, %v2616_v22  ;;  %v2133_v29 = vpop.permute.xlu1 %2132  ;;  %v2030_v5 = vadd.f32 %v4717_v31, %v6056_v2  ;;  %v2570_v47 = vadd.f32 0.0081, %v6055_v4 }
 0x3d4   :  { %v2618_v1 = vsub.f32 %v2602_v3, %v6055_v4  ;;  %v2605_v0 = vmul.f32 9.0, %v2589_v23  ;;  %v2588_v14 = vadd.f32 %v2108_v54, %v1820_v42  ;;  %v1822_v57 = vadd.f32 %v6057_v21, %v1742_v33 }
 0x3d5   :  { %v5039_v15 = vmul.f32 %v2632_v27, %v4906_v53  ;;  %v2635_v59 = vadd.f32 0.0729, %v2619_v11  ;;  %v2073_v16 = vpop.permute.xlu0 %2072  ;;  %v2573_v32 = vadd.f32 0.0081, %v6058_v30  ;;  %v2572_v8 = vadd.f32 0.0081, %v6059_v18 }
 0x3d6   :  { %v2634_v40 = vadd.f32 0.0729, %v2618_v1  ;;  %v2621_v63 = vsub.f32 %v2605_v0, %v6058_v30  ;;  %v2604_v49 = vmul.f32 9.0, %v2588_v14  ;;  %v2110_v13 = vadd.f32 %v2073_v16, %v2030_v5 }
 0x3d7   :  { %v5043_v52 = vmul.f32 %v2635_v59, %v2571_v19  ;;  %v2137_v60 = vpop.permute.xlu1 %2136  ;;  %v2574_v3 = vadd.f32 0.0081, %v6060_v9  ;;  %2800 = vrcp.f32 %v4995_v6 }
 0x3d8   :  { %v5045_v31 = vmul.f32 %v2634_v40, %v2570_v47  ;;  %v2637_v36 = vadd.f32 0.0729, %v2621_v63  ;;  %v2620_v56 = vsub.f32 %v2604_v49, %v6059_v18  ;;  %v2590_v28 = vadd.f32 %v2110_v13, %v1822_v57 }
 0x3d9   :  { %v2135_v53 = vpop.permute.xlu0 %2134  ;;  %2802 = vrcp.f32 %v5004_v38 }
 0x3da   :  { %v5049_v44 = vmul.f32 %v2637_v36, %v2573_v32  ;;  %v2636_v58 = vadd.f32 0.0729, %v2620_v56  ;;  %v2606_v22 = vmul.f32 9.0, %v2590_v28  ;;  %2804 = vrcp.f32 %v5011_v10  ;;  %v6099_v10 = vld [vmem:[#allocation62_spill] sm:$0xff] }
 0x3db   :  { %v2141_v34 = vpop.permute.xlu1 %2140  ;;  %2806 = vrcp.f32 %v5019_v48 }
 0x3dc   :  { %v5051_v24 = vmul.f32 %v2636_v58, %v2572_v8  ;;  %v2622_v19 = vsub.f32 %v2606_v22, %v6060_v9  ;;  %2808 = vrcp.f32 %v5030_v51 }
 0x3dd   :  { %v2139_v42 = vpop.permute.xlu0 %2138  ;;  %2810 = vrcp.f32 %v5039_v15 }
 0x3de   :  { %v2638_v23 = vadd.f32 0.0729, %v2622_v19  ;;  %2812 = vrcp.f32 %v5043_v52 }
 0x3df   :  { %v2145_v54 = vpop.permute.xlu1 %2144  ;;  %2814 = vrcp.f32 %v5045_v31 }
 0x3e0   :  { %v5055_v62 = vmul.f32 %v2638_v23, %v2574_v3  ;;  %2816 = vrcp.f32 %v5049_v44 }
 0x3e1   :  { %v2143_v7 = vpop.permute.xlu0 %2142  ;;  %2818 = vrcp.f32 %v5051_v24 }
 0x3e2   :  { %2820 = vrcp.f32 %v5055_v62 }
 0x3e3   :  { %v2149_v33 = vpop.permute.xlu1 %2148 }
 0x3e5   :  { %v2147_v27 = vpop.permute.xlu0 %2146 }
 0x3e7   :  { %v2153_v11 = vpop.permute.xlu1 %2152 }
 0x3e9   :  { %v2151_v4 = vpop.permute.xlu0 %2150 }
 0x3eb   :  { %v5057_v1 = vpop.permute.xlu1 %2156 }
 0x3ed   :  { %v5059_v0 = vpop.permute.xlu0 %2154 }
 0x3ef   :  { %v5061_v14 = vpop.permute.xlu1 %2160 }
 0x3f1   :  { %v5063_v2 = vpop.permute.xlu0 %2158 }
 0x3f3   :  { %v2181_v5 = vpop.permute.xlu1 %2180 }
 0x3f4   :  { %v2276_v8 = vsel %vm1122_vm2, %v2133_v29, %v2181_v5 }
 0x3f5   :  { %v5065_v47 = vpop.permute.xlu0 %2162 }
 0x3f7   :  { %v2185_v21 = vpop.permute.xlu1 %2184 }
 0x3f8   :  { %v2278_v19 = vsel %vm1122_vm2, %v2137_v60, %v2185_v21 }
 0x3f9   :  { %v2183_v57 = vpop.permute.xlu0 %2182 }
 0x3fa   :  { %v2277_v43 = vsel %vm1122_vm2, %v2135_v53, %v2183_v57 }
 0x3fb   :  { %v2189_v59 = vpop.permute.xlu1 %2188 }
 0x3fc   :  { %v2280_v5 = vsel %vm1122_vm2, %v2141_v34, %v2189_v59 }
 0x3fd   :  { %v2187_v16 = vpop.permute.xlu0 %2186 }
 0x3fe   :  { %v2279_v21 = vsel %vm1122_vm2, %v2139_v42, %v2187_v16 }
 0x3ff   :  { %v2193_v40 = vpop.permute.xlu1 %2192 }
 0x401   :  { %v2191_v30 = vpop.permute.xlu0 %2190 }
 0x402   :  { %v2281_v57 = vsel %vm1122_vm2, %v2143_v7, %v2191_v30 }
 0x403   :  { %v2197_v63 = vpop.permute.xlu1 %2196 }
 0x404   :  { %v2284_v16 = vsel %vm1122_vm2, %v2149_v33, %v2197_v63 }
 0x405   :  { %v2195_v49 = vpop.permute.xlu0 %2194 }
 0x407   :  { %v2201_v13 = vpop.permute.xlu1 %2200 }
 0x408   :  { %v2286_v30 = vsel %vm1122_vm2, %v2153_v11, %v2201_v13 }
 0x409   :  { %v2199_v32 = vpop.permute.xlu0 %2198 }
 0x40b   :  { %v2205_v36 = vpop.permute.xlu1 %2204 }
 0x40d   :  { %v2203_v18 = vpop.permute.xlu0 %2202 }
 0x40f   :  { %v2209_v56 = vpop.permute.xlu1 %2208 }
 0x411   :  { %v2207_v28 = vpop.permute.xlu0 %2206 }
 0x413   :  { %v2229_v58 = vpop.permute.xlu1 %2228 }
 0x414   :  { %v5069_v22 = vsel %vm1139_vm3, %v2276_v8, %v2229_v58 }
 0x415   :  { %v5071_v9 = vpop.permute.xlu0 %2210  ;;  %2340 = vrot.lane.b32.xlu0 %v5069_v22, %s2953_s22 }
 0x417   :  { %v2233_v3 = vpop.permute.xlu1 %2232 }
 0x418   :  { %v5077_v23 = vsel %vm1139_vm3, %v2278_v19, %v2233_v3  ;;  %v2283_v19 = vsel %vm1122_vm2, %v2147_v27, %v2195_v49  ;;  %v2288_v49 = vsel %vm1122_vm2, %v5057_v1, %v2205_v36  ;;  %v2290_v1 = vsel %vm1122_vm2, %v5061_v14, %v2209_v56  ;;  %v6063_v14 = vld [vmem:[#allocation46_spill] sm:$0xff] }
 0x419   :  { %v2231_v55 = vpop.permute.xlu0 %2230  ;;  %2344 = vrot.lane.b32.xlu0 %v5077_v23, %s2953_s22  ;;  %v2031_v56 = vadd.f32 %v4927_v45, %v6063_v14  ;;  %v6067_v45 = vld [vmem:[#allocation48_spill] sm:$0xff]  ;;  %v6073_v14 = vld [vmem:[#allocation39_spill] sm:$0xff]  ;;  %v2310_v15 = vadd.f32 %v5077_v23, %v4713_v12 }
 0x41a   :  { %v5083_v29 = vsel %vm1139_vm3, %v2277_v43, %v2231_v55  ;;  %v2282_v55 = vsel %vm1122_vm2, %v2145_v54, %v2193_v40 }
 0x41b   :  { %2342 = vrot.lane.b32.xlu1 %v5083_v29, %s2953_s22  ;;  %v2237_v8 = vpop.permute.xlu1 %2236 }
 0x41c   :  { %v5089_v60 = vsel %vm1139_vm3, %v2280_v5, %v2237_v8  ;;  %v2285_v5 = vsel %vm1122_vm2, %v2151_v4, %v2199_v32  ;;  %v2287_v4 = vsel %vm1122_vm2, %v5059_v0, %v2203_v18  ;;  %v2289_v0 = vsel %vm1122_vm2, %v5063_v2, %v2207_v28 }
 0x41d   :  { %v2235_v58 = vpop.permute.xlu0 %2234  ;;  %2348 = vrot.lane.b32.xlu0 %v5089_v60, %s2953_s22  ;;  %v2291_v28 = vsel %vm1122_vm2, %v5065_v47, %v5071_v9 }
 0x41e   :  { %v5095_v53 = vsel %vm1139_vm3, %v2279_v21, %v2235_v58 }
 0x41f   :  { %2346 = vrot.lane.b32.xlu1 %v5095_v53, %s2953_s22  ;;  %v2241_v43 = vpop.permute.xlu1 %2240 }
 0x420   :  { %v5101_v34 = vsel %vm1139_vm3, %v2282_v55, %v2241_v43  ;;  %v6061_v55 = vld [vmem:[#allocation122_spill] sm:$0xff]  ;;  %v6062_v43 = vld [vmem:[#allocation69_spill] sm:$0xff] }
 0x421   :  { %v2239_v59 = vpop.permute.xlu0 %2238  ;;  %2352 = vrot.lane.b32.xlu0 %v5101_v34, %s2953_s22  ;;  %v2314_v44 = vadd.f32 %v5101_v34, %v4748_v25  ;;  %v2801_v25 = vpop.eup %2800 }
 0x422   :  { %v5107_v42 = vsel %vm1139_vm3, %v2281_v57, %v2239_v59  ;;  %v1743_v57 = vadd.f32 %v6062_v43, %v6061_v55  ;;  %v6071_v55 = vld [vmem:[#allocation58_spill] sm:$0xff] }
 0x423   :  { %2350 = vrot.lane.b32.xlu1 %v5107_v42, %s2953_s22  ;;  %v2245_v54 = vpop.permute.xlu1 %2244  ;;  %v2032_v43 = vadd.f32 %v4969_v39, %v6071_v55  ;;  %v6079_v55 = vld [vmem:[#allocation71_spill] sm:$0xff] }
 0x424   :  { %v5113_v40 = vsel %vm1139_vm3, %v2284_v16, %v2245_v54  ;;  %v6064_v54 = vld [vmem:[#allocation133_spill] sm:$0xff] }
 0x425   :  { %v2243_v3 = vpop.permute.xlu0 %2242  ;;  %2356 = vrot.lane.b32.xlu0 %v5113_v40, %s2953_s22 }
 0x426   :  { %v5119_v7 = vsel %vm1139_vm3, %v2283_v19, %v2243_v3  ;;  %v1823_v19 = vadd.f32 %v6064_v54, %v1743_v57  ;;  %v6072_v57 = vld [vmem:[#allocation126_spill] sm:$0xff] }
 0x427   :  { %2354 = vrot.lane.b32.xlu1 %v5119_v7, %s2953_s22  ;;  %v2249_v33 = vpop.permute.xlu1 %2248  ;;  %v5341_v62 = vadd.f32 %v5119_v7, %v4782_v17  ;;  %v6107_v17 = vld [vmem:[#allocation18_spill] sm:$0xff] }
 0x428   :  { %v5125_v63 = vsel %vm1139_vm3, %v2286_v30, %v2249_v33  ;;  %v6065_v30 = vld [vmem:[#allocation124_spill] sm:$0xff]  ;;  %v6066_v33 = vld [vmem:[#allocation90_spill] sm:$0xff] }
 0x429   :  { %v2247_v8 = vpop.permute.xlu0 %2246  ;;  %2360 = vrot.lane.b32.xlu0 %v5125_v63, %s2953_s22 }
 0x42a   :  { %v5131_v27 = vsel %vm1139_vm3, %v2285_v5, %v2247_v8  ;;  %v1745_v5 = vadd.f32 %v6066_v33, %v6065_v30  ;;  %v6076_v30 = vld [vmem:[#allocation59_spill] sm:$0xff] }
 0x42b   :  { %2358 = vrot.lane.b32.xlu1 %v5131_v27, %s2953_s22  ;;  %v2253_v11 = vpop.permute.xlu1 %2252  ;;  %v2035_v33 = vadd.f32 %v4979_v26, %v6076_v30  ;;  %v5353_v7 = vadd.f32 %v5131_v27, %v6107_v17 }
 0x42c   :  { %v5138_v13 = vsel %vm1139_vm3, %v2288_v49, %v2253_v11  ;;  %v2033_v11 = vadd.f32 %v4958_v35, %v6067_v45 }
 0x42d   :  { %v2251_v32 = vpop.permute.xlu0 %2250  ;;  %2364 = vrot.lane.b32.xlu0 %v5138_v13, %s2953_s22 }
 0x42e   :  { %v5145_v21 = vsel %vm1139_vm3, %v2287_v4, %v2251_v32  ;;  %v6068_v4 = vld [vmem:[#allocation125_spill] sm:$0xff]  ;;  %v6069_v32 = vld [vmem:[#allocation107_spill] sm:$0xff] }
 0x42f   :  { %2362 = vrot.lane.b32.xlu1 %v5145_v21, %s2953_s22  ;;  %v2257_v36 = vpop.permute.xlu1 %2256 }
 0x430   :  { %v5152_v58 = vsel %vm1139_vm3, %v2290_v1, %v2257_v36  ;;  %v1744_v1 = vadd.f32 %v6069_v32, %v6068_v4 }
 0x431   :  { %v2255_v18 = vpop.permute.xlu0 %2254  ;;  %2368 = vrot.lane.b32.xlu0 %v5152_v58, %s2953_s22 }
 0x432   :  { %v5161_v59 = vsel %vm1139_vm3, %v2289_v0, %v2255_v18  ;;  %v6070_v0 = vld [vmem:[#allocation135_spill] sm:$0xff] }
 0x433   :  { %2366 = vrot.lane.b32.xlu1 %v5161_v59, %s2953_s22  ;;  %v2075_v16 = vpop.permute.xlu1 %2074  ;;  %v1825_v47 = vadd.f32 %v6070_v0, %v1745_v5  ;;  %v6078_v0 = vld [vmem:[#allocation127_spill] sm:$0xff] }
 0x434   :  { %v2111_v2 = vadd.f32 %v2075_v16, %v2031_v56  ;;  %v1747_v56 = vadd.f32 %v6073_v14, %v6072_v57  ;;  %v6074_v16 = vld [vmem:[#allocation136_spill] sm:$0xff]  ;;  %v6080_v57 = vld [vmem:[#allocation61_spill] sm:$0xff] }
 0x435   :  { %v2259_v3 = vpop.permute.xlu0 %2258  ;;  %v1824_v54 = vadd.f32 %v6074_v16, %v1744_v1  ;;  %v1746_v1 = vadd.f32 %v6079_v55, %v6078_v0  ;;  %v6085_v0 = vld [vmem:[#allocation103_spill] sm:$0xff] }
 0x436   :  { %v2591_v8 = vadd.f32 %v2111_v2, %v1823_v19  ;;  %v5174_v49 = vsel %vm1139_vm3, %v2291_v28, %v2259_v3  ;;  %v6075_v19 = vld [vmem:[#allocation25_spill] sm:$0xff] }
 0x437   :  { %2370 = vrot.lane.b32.xlu1 %v5174_v49, %s2953_s22  ;;  %v2079_v36 = vpop.permute.xlu1 %2078  ;;  %v2575_v5 = vadd.f32 0.0081, %v6075_v19 }
 0x438   :  { %v2607_v9 = vmul.f32 9.0, %v2591_v8  ;;  %v2113_v18 = vadd.f32 %v2079_v36, %v2033_v11  ;;  %v6077_v8 = vld [vmem:[#allocation137_spill] sm:$0xff] }
 0x439   :  { %v2077_v35 = vpop.permute.xlu0 %2076  ;;  %v1827_v45 = vadd.f32 %v6077_v8, %v1747_v56 }
 0x43a   :  { %v2623_v2 = vsub.f32 %v2607_v9, %v6075_v19  ;;  %v2593_v28 = vadd.f32 %v2113_v18, %v1825_v47  ;;  %v2112_v3 = vadd.f32 %v2077_v35, %v2032_v43  ;;  %v2034_v9 = vadd.f32 %v4988_v50, %v6080_v57  ;;  %v6081_v43 = vld [vmem:[#allocation27_spill] sm:$0xff]  ;;  %v6082_v35 = vld [vmem:[#allocation138_spill] sm:$0xff] }
 0x43b   :  { %v2083_v11 = vpop.permute.xlu1 %2082  ;;  %v1826_v56 = vadd.f32 %v6082_v35, %v1746_v1  ;;  %v2578_v57 = vadd.f32 0.0081, %v6085_v0  ;;  %v6088_v35 = vld [vmem:[#allocation50_spill] sm:$0xff] }
 0x43c   :  { %v2639_v4 = vadd.f32 0.0729, %v2623_v2  ;;  %v2609_v39 = vmul.f32 9.0, %v2593_v28  ;;  %v2592_v32 = vadd.f32 %v2112_v3, %v1824_v54  ;;  %v2115_v36 = vadd.f32 %v2083_v11, %v2035_v33  ;;  %v6083_v28 = vld [vmem:[#allocation102_spill] sm:$0xff]  ;;  %v6084_v11 = vld [vmem:[#allocation29_spill] sm:$0xff] }
 0x43d   :  { %v2081_v47 = vpop.permute.xlu0 %2080  ;;  %v2577_v2 = vadd.f32 0.0081, %v6081_v43  ;;  %v2576_v8 = vadd.f32 0.0081, %v6083_v28 }
 0x43e   :  { %v5197_v18 = vmul.f32 %v2639_v4, %v2575_v5  ;;  %v2625_v26 = vsub.f32 %v2609_v39, %v6081_v43  ;;  %v2608_v14 = vmul.f32 9.0, %v2592_v32  ;;  %v2595_v16 = vadd.f32 %v2115_v36, %v1827_v45  ;;  %v6086_v43 = vld [vmem:[#allocation17_spill] sm:$0xff] }
 0x43f   :  { %v2114_v19 = vadd.f32 %v2081_v47, %v2034_v9  ;;  %v2579_v45 = vadd.f32 0.0081, %v6084_v11 }
 0x440   :  { %v2641_v54 = vadd.f32 0.0729, %v2625_v26  ;;  %v2624_v3 = vsub.f32 %v2608_v14, %v6083_v28  ;;  %v2611_v30 = vmul.f32 9.0, %v2595_v16  ;;  %v5218_v26 = vadd.f32 %v6086_v43, %v6086_v43  ;;  %v6087_v14 = vld [vmem:[#allocation49_spill] sm:$0xff]  ;;  %v6090_v28 = vld [vmem:[#allocation12_spill] sm:$0xff] }
 0x441   :  { %v2594_v33 = vadd.f32 %v2114_v19, %v1826_v56  ;;  %v2420_v16 = vadd.f32 %v6087_v14, %v6087_v14  ;;  %v5224_v56 = vadd.f32 %v6088_v35, %v6088_v35  ;;  %v6089_v19 = vld [vmem:[#allocation53_spill] sm:$0xff]  ;;  %v6097_v35 = vld [vmem:[#allocation60_spill] sm:$0xff]  ;;  %2822 = vrcp.f32 %v5197_v18 }
 0x442   :  { %v5204_v50 = vmul.f32 %v2641_v54, %v2577_v2  ;;  %v2640_v5 = vadd.f32 0.0729, %v2624_v3  ;;  %v2627_v4 = vsub.f32 %v2611_v30, %v6084_v11  ;;  %v5228_v2 = vadd.f32 %v6089_v19, %v6089_v19 }
 0x443   :  { %v2610_v39 = vmul.f32 9.0, %v2594_v33  ;;  %v5231_v54 = vadd.f32 0.0081, %v5218_v26  ;;  %v5235_v3 = vadd.f32 %v6090_v28, %v6090_v28  ;;  %v2484_v30 = vadd.f32 0.0081, %v2420_v16 }
 0x444   :  { %v5208_v32 = vmul.f32 %v2640_v5, %v2576_v8  ;;  %v2643_v36 = vadd.f32 0.0729, %v2627_v4  ;;  %v5238_v33 = vadd.f32 0.0081, %v5224_v56  ;;  %v6091_v8 = vld [vmem:[#allocation55_spill] sm:$0xff]  ;;  %v5275_v38 = vadd.f32 %v6097_v35, %v6097_v35 }
 0x445   :  { %v2626_v55 = vsub.f32 %v2610_v39, %v6085_v0  ;;  %v5242_v5 = vadd.f32 %v6091_v8, %v6091_v8  ;;  %v5246_v11 = vadd.f32 0.0081, %v5228_v2  ;;  %v6092_v4 = vld [vmem:[#allocation51_spill] sm:$0xff]  ;;  %v5271_v14 = vadd.f32 0.0081, %v5235_v3  ;;  %v6098_v8 = vld [vmem:[#allocation101_spill] sm:$0xff] }
 0x446   :  { %v5211_v1 = vmul.f32 %v2643_v36, %v2579_v45  ;;  %v5250_v39 = vadd.f32 %v6092_v4, %v6092_v4  ;;  %v6093_v45 = vld [vmem:[#allocation56_spill] sm:$0xff]  ;;  %v6094_v0 = vld [vmem:[#allocation99_spill] sm:$0xff]  ;;  %v2308_v19 = vadd.f32 %v5069_v22, %v4670_v61  ;;  %v5285_v4 = vadd.f32 %v6098_v8, %v6098_v8 }
 0x447   :  { %v2642_v9 = vadd.f32 0.0729, %v2626_v55  ;;  %v5254_v36 = vadd.f32 %v6093_v45, %v6093_v45  ;;  %v5259_v55 = vadd.f32 %v6094_v0, %v6094_v0  ;;  %v5281_v28 = vadd.f32 0.0081, %v5242_v5 }
 0x448   :  { %v5289_v45 = vadd.f32 %v6099_v10, %v6099_v10  ;;  %v5310_v51 = vadd.f32 0.0081, %v5275_v38  ;;  %2824 = vrcp.f32 %v5204_v50 }
 0x449   :  { %v5214_v47 = vmul.f32 %v2642_v9, %v2578_v57  ;;  %v6095_v57 = vld [vmem:[#allocation57_spill] sm:$0xff]  ;;  %v6096_v9 = vld [vmem:[#allocation70_spill] sm:$0xff]  ;;  %v5296_v48 = vadd.f32 0.0081, %v5254_v36  ;;  %v5300_v22 = vadd.f32 0.0081, %v5259_v55  ;;  %2826 = vrcp.f32 %v5208_v32 }
 0x44a   :  { %v5263_v6 = vadd.f32 %v6095_v57, %v6095_v57  ;;  %v5267_v43 = vadd.f32 %v6096_v9, %v6096_v9  ;;  %v5293_v57 = vadd.f32 0.0081, %v5250_v39  ;;  %v5319_v10 = vadd.f32 0.0081, %v5289_v45 }
 0x44b   :  { %2828 = vrcp.f32 %v5211_v1 }
 0x44c   :  { %v5303_v9 = vadd.f32 0.0081, %v5263_v6  ;;  %v5306_v35 = vadd.f32 0.0081, %v5267_v43  ;;  %6102 = vst [vmem:[#allocation93_spill] sm:$0xff] %v5319_v10  ;;  %2830 = vrcp.f32 %v5214_v47 }
 0x44e   :  { %6100 = vst [vmem:[#allocation26_spill] sm:$0xff] %v5306_v35 }
 0x487   :  { %v2341_v0 = vpop.permute.xlu0 %2340 }
 0x488   :  { %v2388_v61 = vadd.f32 %v2341_v0, %v2308_v19  ;;  %v5316_v19 = vadd.f32 0.0081, %v5285_v4  ;;  %v6103_v0 = vld [vmem:[#allocation63_spill] sm:$0xff] }
 0x489   :  { %v5323_v35 = vadd.f32 %v6103_v0, %v6103_v0  ;;  %v2312_v0 = vadd.f32 %v5089_v60, %v4727_v37  ;;  %v6106_v37 = vld [vmem:[#allocation11_spill] sm:$0xff] }
 0x48a   :  { %v2500_v8 = vmul.f32 18.0, %v2388_v61  ;;  %6101 = vst [vmem:[#allocation78_spill] sm:$0xff] %v5316_v19  ;;  %v2309_v61 = vadd.f32 %v5083_v29, %v4725_v20  ;;  %v2311_v19 = vadd.f32 %v5095_v53, %v4744_v46  ;;  %v6105_v46 = vld [vmem:[#allocation13_spill] sm:$0xff]  ;;  %v5347_v60 = vadd.f32 %v5125_v63, %v6106_v37  ;;  %v6109_v63 = vld [vmem:[#allocation16_spill] sm:$0xff] }
 0x48b   :  { %6104 = vst [vmem:[#allocation24_spill] sm:$0xff] %v5323_v35  ;;  %v2345_v52 = vpop.permute.xlu0 %2344  ;;  %v2316_v29 = vadd.f32 %v5113_v40, %v6105_v46  ;;  %v6108_v40 = vld [vmem:[#allocation21_spill] sm:$0xff] }
 0x48c   :  { %v2516_v31 = vsub.f32 %v2500_v8, %v2420_v16  ;;  %v2390_v12 = vadd.f32 %v2345_v52, %v2310_v15  ;;  %v2313_v16 = vadd.f32 %v5107_v42, %v4763_v41  ;;  %v2803_v42 = vpop.eup %2802  ;;  %v5357_v15 = vadd.f32 %v5145_v21, %v6108_v40  ;;  %v6111_v21 = vld [vmem:[#allocation20_spill] sm:$0xff] }
 0x48d   :  { %v2343_v23 = vpop.permute.xlu1 %2342 }
 0x48e   :  { %v2532_v35 = vadd.f32 0.0729, %v2516_v31  ;;  %v2389_v10 = vadd.f32 %v2343_v23, %v2309_v61  ;;  %v2502_v24 = vmul.f32 18.0, %v2390_v12  ;;  %v6110_v12 = vld [vmem:[#allocation30_spill] sm:$0xff] }
 0x48f   :  { %v2349_v20 = vpop.permute.xlu0 %2348  ;;  %v5367_v23 = vadd.f32 %v5161_v59, %v6110_v12  ;;  %v6112_v59 = vld [vmem:[#allocation82_spill] sm:$0xff] }
 0x490   :  { %v2548_v53 = vmul.f32 %v2532_v35, %v2484_v30  ;;  %v2501_v34 = vmul.f32 18.0, %v2389_v10  ;;  %v2518_v8 = vsub.f32 %v2502_v24, %v5228_v2  ;;  %v2392_v41 = vadd.f32 %v2349_v20, %v2312_v0  ;;  %v2805_v35 = vpop.eup %2804 }
 0x491   :  { %v2347_v18 = vpop.permute.xlu1 %2346  ;;  %v5361_v30 = vadd.f32 %v5138_v13, %v6109_v63  ;;  %v2807_v31 = vpop.eup %2806  ;;  %v5371_v0 = vadd.f32 %v5152_v58, %v6111_v21 }
 0x492   :  { %v2676_v2 = vmul.f32 %v2803_v42, %v2548_v53  ;;  %v2517_v10 = vsub.f32 %v2501_v34, %v5218_v26  ;;  %v2534_v52 = vadd.f32 0.0729, %v2518_v8  ;;  %v2391_v50 = vadd.f32 %v2347_v18, %v2311_v19  ;;  %v5373_v13 = vpop.eup %2808 }
 0x493   :  { %v2504_v61 = vmul.f32 18.0, %v2392_v41  ;;  %v2353_v27 = vpop.permute.xlu0 %2352  ;;  %v2811_v46 = vpop.eup %2810  ;;  %v5380_v34 = vadd.f32 %v5174_v49, %v6112_v59 }
 0x494   :  { %v2692_v24 = vsub.f32 1.0, %v2676_v2  ;;  %v2533_v20 = vadd.f32 0.0729, %v2517_v10  ;;  %v2550_v26 = vmul.f32 %v2534_v52, %v5246_v11  ;;  %v2503_v19 = vmul.f32 18.0, %v2391_v50  ;;  %v5382_v58 = vpop.eup %2812 }
 0x495   :  { %v2520_v32 = vsub.f32 %v2504_v61, %v5242_v5  ;;  %v2351_v37 = vpop.permute.xlu1 %2350  ;;  %v2394_v53 = vadd.f32 %v2353_v27, %v2314_v44  ;;  %v2815_v18 = vpop.eup %2814 }
 0x496   :  { %v2708_v8 = vmul.f32 0.5, %v2692_v24  ;;  %v2549_v41 = vmul.f32 %v2533_v20, %v5231_v54  ;;  %v2678_v42 = vmul.f32 %v2807_v31, %v2550_v26  ;;  %v2519_v11 = vsub.f32 %v2503_v19, %v5224_v56  ;;  %v5387_v44 = vpop.eup %2816 }
 0x497   :  { %v2536_v1 = vadd.f32 0.0729, %v2520_v32  ;;  %v2393_v17 = vadd.f32 %v2351_v37, %v2313_v16  ;;  %v2506_v5 = vmul.f32 18.0, %v2394_v53  ;;  %v2357_v40 = vpop.permute.xlu0 %2356  ;;  %v2819_v52 = vpop.eup %2818 }
 0x498   :  { %v2724_v63 = vmax.f32 %v2708_v8, 0.0  ;;  %v2677_v49 = vmul.f32 %v2801_v25, %v2549_v41  ;;  %v2694_v2 = vsub.f32 1.0, %v2678_v42  ;;  %v2535_v10 = vadd.f32 0.0729, %v2519_v11  ;;  %v5391_v27 = vpop.eup %2820 }
 0x499   :  { %v2552_v50 = vmul.f32 %v2536_v1, %v5281_v28  ;;  %v2505_v54 = vmul.f32 18.0, %v2393_v17  ;;  %v2522_v31 = vsub.f32 %v2506_v5, %v5254_v36  ;;  %v2355_v56 = vpop.permute.xlu1 %2354  ;;  %v2396_v61 = vadd.f32 %v2357_v40, %v2316_v29  ;;  %v5396_v19 = vpop.eup %2822 }
 0x49a   :  { %v2740_v47 = vmin.f32 %v2724_v63, 1.0  ;;  %v2693_v16 = vsub.f32 1.0, %v2677_v49  ;;  %v2710_v12 = vmul.f32 0.5, %v2694_v2  ;;  %v2551_v21 = vmul.f32 %v2535_v10, %v5238_v33  ;;  %v5400_v41 = vpop.eup %2824 }
 0x49b   :  { %v2680_v24 = vmul.f32 %v2811_v46, %v2552_v50  ;;  %v2521_v25 = vsub.f32 %v2505_v54, %v5235_v3  ;;  %v2538_v20 = vadd.f32 0.0729, %v2522_v31  ;;  %v2395_v26 = vadd.f32 %v2355_v56, %v5341_v62  ;;  %v2361_v37 = vpop.permute.xlu0 %2360  ;;  %v5405_v40 = vpop.eup %2826 }
 0x49c   :  { %2757 = vst.msk [vmem:[#allocation7] sm:$0xff] %vm2756_vm4, %v2740_v47  ;;  %v2709_v36 = vmul.f32 0.5, %v2693_v16  ;;  %v2726_v28 = vmax.f32 %v2710_v12, 0.0  ;;  %v2679_v29 = vmul.f32 %v2805_v35, %v2551_v21  ;;  %v2508_v32 = vmul.f32 18.0, %v2396_v61  ;;  %v5410_v56 = vpop.eup %2828 }
 0x49d   :  { %v2696_v53 = vsub.f32 1.0, %v2680_v24  ;;  %v2537_v59 = vadd.f32 0.0729, %v2521_v25  ;;  %v2554_v8 = vmul.f32 %v2538_v20, %v5296_v48  ;;  %v2507_v33 = vmul.f32 18.0, %v2395_v26  ;;  %v2359_v46 = vpop.permute.xlu1 %2358 }
 0x49e   :  { %v2725_v3 = vmax.f32 %v2709_v36, 0.0  ;;  %v2742_v42 = vmin.f32 %v2726_v28, 1.0  ;;  %v2695_v62 = vsub.f32 1.0, %v2679_v29  ;;  %v2524_v11 = vsub.f32 %v2508_v32, %v5263_v6 }
 0x49f   :  { %v2712_v1 = vmul.f32 0.5, %v2696_v53  ;;  %v2553_v17 = vmul.f32 %v2537_v59, %v5271_v14  ;;  %v2682_v5 = vmul.f32 %v2815_v18, %v2554_v8  ;;  %v2523_v35 = vsub.f32 %v2507_v33, %v5250_v39  ;;  %v2365_v47 = vpop.permute.xlu0 %2364 }
 0x4a0   :  { %v2741_v63 = vmin.f32 %v2725_v3, 1.0  ;;  %2759 = vst.msk [vmem:[#allocation7 + $0x10] sm:$0xff] %vm2756_vm4, %v2742_v42  ;;  %v2711_v48 = vmul.f32 0.5, %v2695_v62  ;;  %v2540_v49 = vadd.f32 0.0729, %v2524_v11  ;;  %v2397_v2 = vadd.f32 %v2359_v46, %v5353_v7 }
 0x4a1   :  { %v2728_v10 = vmax.f32 %v2712_v1, 0.0  ;;  %v2681_v50 = vmul.f32 %v5373_v13, %v2553_v17  ;;  %v2698_v54 = vsub.f32 1.0, %v2682_v5  ;;  %v2539_v6 = vadd.f32 0.0729, %v2523_v35  ;;  %v2363_v31 = vpop.permute.xlu1 %2362  ;;  %v5416_v13 = vpop.eup %2830 }
 0x4a2   :  { %2758 = vst.msk [vmem:[#allocation7 + $0x8] sm:$0xff] %vm2756_vm4, %v2741_v63  ;;  %v2727_v39 = vmax.f32 %v2711_v48, 0.0  ;;  %v2556_v14 = vmul.f32 %v2540_v49, %v5303_v9  ;;  %v2509_v18 = vmul.f32 18.0, %v2397_v2  ;;  %v2398_v61 = vadd.f32 %v2361_v37, %v5347_v60 }
 0x4a3   :  { %v2744_v16 = vmin.f32 %v2728_v10, 1.0  ;;  %v2697_v12 = vsub.f32 1.0, %v2681_v50  ;;  %v2714_v7 = vmul.f32 0.5, %v2698_v54  ;;  %v2555_v21 = vmul.f32 %v2539_v6, %v5293_v57  ;;  %v2369_v42 = vpop.permute.xlu0 %2368  ;;  %v6113_v54 = vld [vmem:[#allocation26_spill] sm:$0xff] }
 0x4a4   :  { %v2743_v24 = vmin.f32 %v2727_v39, 1.0  ;;  %v2684_v25 = vmul.f32 %v2819_v52, %v2556_v14  ;;  %v2525_v20 = vsub.f32 %v2509_v18, %v5259_v55  ;;  %v2510_v26 = vmul.f32 18.0, %v2398_v61  ;;  %v6114_v39 = vld [vmem:[#allocation93_spill] sm:$0xff]  ;;  %v6115_v18 = vld [vmem:[#allocation80_spill] sm:$0xff] }
 0x4a5   :  { %2761 = vst.msk [vmem:[#allocation7 + $0x20] sm:$0xff] %vm2756_vm4, %v2744_v16  ;;  %v2713_v36 = vmul.f32 0.5, %v2697_v12  ;;  %v2730_v9 = vmax.f32 %v2714_v7, 0.0  ;;  %v2683_v28 = vmul.f32 %v5382_v58, %v2555_v21  ;;  %v2399_v60 = vadd.f32 %v2363_v31, %v5357_v15  ;;  %v2367_v29 = vpop.permute.xlu1 %2366  ;;  %v6116_v16 = vld [vmem:[#allocation24_spill] sm:$0xff] }
 0x4a6   :  { %2760 = vst.msk [vmem:[#allocation7 + $0x18] sm:$0xff] %vm2756_vm4, %v2743_v24  ;;  %v2700_v32 = vsub.f32 1.0, %v2684_v25  ;;  %v2541_v57 = vadd.f32 0.0729, %v2525_v20  ;;  %v2526_v37 = vsub.f32 %v2510_v26, %v5275_v38  ;;  %v2400_v52 = vadd.f32 %v2365_v47, %v5361_v30  ;;  %v6117_v26 = vld [vmem:[#allocation78_spill] sm:$0xff] }
 0x4a7   :  { %v2729_v53 = vmax.f32 %v2713_v36, 0.0  ;;  %v2746_v55 = vmin.f32 %v2730_v9, 1.0  ;;  %v2699_v59 = vsub.f32 1.0, %v2683_v28  ;;  %v2511_v8 = vmul.f32 18.0, %v2399_v60 }
 0x4a8   :  { %v2716_v33 = vmul.f32 0.5, %v2700_v32  ;;  %v2557_v46 = vmul.f32 %v2541_v57, %v5300_v22  ;;  %v2542_v3 = vadd.f32 0.0729, %v2526_v37  ;;  %v2512_v58 = vmul.f32 18.0, %v2400_v52 }
 0x4a9   :  { %v2745_v15 = vmin.f32 %v2729_v53, 1.0  ;;  %2763 = vst.msk [vmem:[#allocation7 + $0x30] sm:$0xff] %vm2756_vm4, %v2746_v55  ;;  %v2715_v62 = vmul.f32 0.5, %v2699_v59  ;;  %v2527_v11 = vsub.f32 %v2511_v8, %v5267_v43  ;;  %v2401_v38 = vadd.f32 %v2367_v29, %v5367_v23  ;;  %v2371_v49 = vpop.permute.xlu1 %2370 }
 0x4aa   :  { %v2732_v1 = vmax.f32 %v2716_v33, 0.0  ;;  %v2685_v30 = vmul.f32 %v5387_v44, %v2557_v46  ;;  %v2558_v17 = vmul.f32 %v2542_v3, %v5310_v51  ;;  %v2528_v5 = vsub.f32 %v2512_v58, %v5289_v45 }
 0x4ab   :  { %2762 = vst.msk [vmem:[#allocation7 + $0x28] sm:$0xff] %vm2756_vm4, %v2745_v15  ;;  %v2731_v22 = vmax.f32 %v2715_v62, 0.0  ;;  %v2543_v35 = vadd.f32 0.0729, %v2527_v11  ;;  %v2513_v63 = vmul.f32 18.0, %v2401_v38  ;;  %v2402_v48 = vadd.f32 %v2369_v42, %v5371_v0 }
 0x4ac   :  { %v2748_v2 = vmin.f32 %v2732_v1, 1.0  ;;  %v2701_v10 = vsub.f32 1.0, %v2685_v30  ;;  %v2686_v43 = vmul.f32 %v5391_v27, %v2558_v17  ;;  %v2544_v23 = vadd.f32 0.0729, %v2528_v5 }
 0x4ad   :  { %v2747_v50 = vmin.f32 %v2731_v22, 1.0  ;;  %v2559_v44 = vmul.f32 %v2543_v35, %v6113_v54  ;;  %v2529_v51 = vsub.f32 %v2513_v63, %v5285_v4  ;;  %v2514_v6 = vmul.f32 18.0, %v2402_v48 }
 0x4ae   :  { %2765 = vst.msk [vmem:[#allocation7 + $0x40] sm:$0xff] %vm2756_vm4, %v2748_v2  ;;  %v2717_v45 = vmul.f32 0.5, %v2701_v10  ;;  %v2702_v31 = vsub.f32 1.0, %v2686_v43  ;;  %v2560_v14 = vmul.f32 %v2544_v23, %v6114_v39  ;;  %v2403_v0 = vadd.f32 %v2371_v49, %v5380_v34 }
 0x4af   :  { %v2435_v61 = vadd.f32 %v6115_v18, %v6115_v18  ;;  %2764 = vst.msk [vmem:[#allocation7 + $0x38] sm:$0xff] %vm2756_vm4, %v2747_v50  ;;  %v2687_v27 = vmul.f32 %v5396_v19, %v2559_v44  ;;  %v2545_v47 = vadd.f32 0.0729, %v2529_v51  ;;  %v2530_v12 = vsub.f32 %v2514_v6, %v6116_v16 }
 0x4b0   :  { %v2733_v4 = vmax.f32 %v2717_v45, 0.0  ;;  %v2718_v7 = vmul.f32 0.5, %v2702_v31  ;;  %v2688_v21 = vmul.f32 %v5405_v40, %v2560_v14  ;;  %v2515_v24 = vmul.f32 18.0, %v2403_v0 }
 0x4b1   :  { %v2498_v25 = vadd.f32 0.0081, %v6116_v16  ;;  %v2703_v20 = vsub.f32 1.0, %v2687_v27  ;;  %v2561_v34 = vmul.f32 %v2545_v47, %v6117_v26  ;;  %v2546_v36 = vadd.f32 0.0729, %v2530_v12 }
 0x4b2   :  { %v2749_v9 = vmin.f32 %v2733_v4, 1.0  ;;  %v2734_v28 = vmax.f32 %v2718_v7, 0.0  ;;  %v2704_v60 = vsub.f32 1.0, %v2688_v21  ;;  %v2531_v29 = vsub.f32 %v2515_v24, %v2435_v61 }
 0x4b3   :  { %v2719_v32 = vmul.f32 0.5, %v2703_v20  ;;  %v2689_v19 = vmul.f32 %v5400_v41, %v2561_v34  ;;  %v2562_v57 = vmul.f32 %v2546_v36, %v2498_v25  ;;  %v2499_v37 = vadd.f32 0.0081, %v2435_v61 }
 0x4b4   :  { %2766 = vst.msk [vmem:[#allocation7 + $0x48] sm:$0xff] %vm2756_vm4, %v2749_v9  ;;  %v2750_v52 = vmin.f32 %v2734_v28, 1.0  ;;  %v2720_v40 = vmul.f32 0.5, %v2704_v60  ;;  %v2547_v53 = vadd.f32 0.0729, %v2531_v29 }
 0x4b5   :  { %v2735_v55 = vmax.f32 %v2719_v32, 0.0  ;;  %v2705_v59 = vsub.f32 1.0, %v2689_v19  ;;  %v2690_v8 = vmul.f32 %v5416_v13, %v2562_v57 }
 0x4b6   :  { %2767 = vst.msk [vmem:[#allocation7 + $0x50] sm:$0xff] %vm2756_vm4, %v2750_v52  ;;  %v2736_v33 = vmax.f32 %v2720_v40, 0.0  ;;  %v2563_v46 = vmul.f32 %v2547_v53, %v2499_v37 }
 0x4b7   :  { %v2751_v3 = vmin.f32 %v2735_v55, 1.0  ;;  %v2721_v58 = vmul.f32 0.5, %v2705_v59  ;;  %v2706_v42 = vsub.f32 1.0, %v2690_v8 }
 0x4b8   :  { %v2752_v15 = vmin.f32 %v2736_v33, 1.0  ;;  %v2691_v41 = vmul.f32 %v5410_v56, %v2563_v46 }
 0x4b9   :  { %2768 = vst.msk [vmem:[#allocation7 + $0x58] sm:$0xff] %vm2756_vm4, %v2751_v3  ;;  %v2737_v62 = vmax.f32 %v2721_v58, 0.0  ;;  %v2722_v11 = vmul.f32 0.5, %v2706_v42 }
 0x4ba   :  { %2769 = vst.msk [vmem:[#allocation7 + $0x60] sm:$0xff] %vm2756_vm4, %v2752_v15  ;;  %v2707_v38 = vsub.f32 1.0, %v2691_v41 }
 0x4bb   :  { %v2753_v1 = vmin.f32 %v2737_v62, 1.0  ;;  %v2738_v30 = vmax.f32 %v2722_v11, 0.0 }
 0x4bc   :  { %v2723_v13 = vmul.f32 0.5, %v2707_v38 }
 0x4bd   :  { %2770 = vst.msk [vmem:[#allocation7 + $0x68] sm:$0xff] %vm2756_vm4, %v2753_v1  ;;  %v2754_v17 = vmin.f32 %v2738_v30, 1.0 }
 0x4be   :  { %v2739_v5 = vmax.f32 %v2723_v13, 0.0 }
 0x4bf   :  { %2771 = vst.msk [vmem:[#allocation7 + $0x70] sm:$0xff] %vm2756_vm4, %v2754_v17 }
 0x4c0   :  { %v2755_v22 = vmin.f32 %v2739_v5, 1.0 }
 0x4c2   :  { %2772 = vst.msk [vmem:[#allocation7 + $0x78] sm:$0xff] %vm2756_vm4, %v2755_v22 }
 0x4c3   :  { %2931 = shalt.err (!%p2928_p0)
}
 0x4c4   :  { %2784 = dma.vmem_to_hbm [thread:$0]  %s2779_s24, 2048, %s5466_s2, [#allocation4], %s2947_s12, %s2947_s12, %s2948_s13  }
 0x4c5   :  { %2944 = dma.done.wait [#allocation4], 2048  }
 0x4c6   :  { %2945 = vsyncadd [#allocation4], 4294965248 }
 0x4c7   :  { %2788 = vsyncpa [#allocation3], 1 }
 0x4c8   :  { %2789 = vsyncpa [#allocation6], 1 }
 0x4c9   :  { %2790 = vsyncpa [#allocation4], 1 }

</bundles_post_ra>
